<compile_context>
chip_gen: v6e
topology: v6e:2x2x1
jax: 0.10.0
libtpu: 0.0.40
codegen_flags: <defaults>
</compile_context>

<pallas_src>
import jax
import jax.numpy as jnp
from jax import lax
from jax.experimental import pallas as pl
from jax.experimental.pallas import tpu as pltpu


def dcma_kernel(x_ref, y_ref,
                wk1_ref, bk1_ref, wk2_ref, bk2_ref,
                wl1t_ref, bl1_ref, wl2t_ref, bl2_ref,
                wv1_ref, bv1_ref, wv2_ref, bv2_ref,
                g1_ref, g2_ref,
                outx_ref, outy_ref):
    f32 = jnp.float32

    x = x_ref[0]                      # (C, N) f32
    y = y_ref[0]                      # (C, N) f32
    N = x.shape[1]

    # Key path: shared conv folded into wk1/wk2 on the host; rows padded to 8.
    k1 = jnp.dot(wk1_ref[...], x, preferred_element_type=f32) + bk1_ref[...]   # (8, N)
    k2 = jnp.dot(wk2_ref[...], y, preferred_element_type=f32) + bk2_ref[...]   # (8, N)

    ones_row = jnp.ones((1, N), f32)  # for softmax denominators (lane-major)

    # ------------------------- modality 1: out_x -------------------------
    # logits1 = (k1^T k2) @ wl1^T + bl1  ==  k1^T (k2 @ wl1^T) + bl1
    t1 = jnp.dot(k2, wl1t_ref[...], preferred_element_type=f32)                # (8, N)
    logits1 = lax.dot_general(k1, t1, (((0,), (0,)), ((), ())),
                              preferred_element_type=f32) + bl1_ref[...]       # (N, N)
    m1 = jnp.max(logits1, axis=-1, keepdims=True)
    p1 = jnp.exp(logits1 - m1)                                                 # unnormalized softmax

    v2 = jnp.dot(wv2_ref[...], y, preferred_element_type=f32) + bv2_ref[...]   # (C, N)
    # out_un[c, i] = sum_j v2[c, j] * p1[i, j]
    out_un1 = lax.dot_general(v2, p1, (((1,), (1,)), ((), ())),
                              preferred_element_type=f32)                      # (C, N)
    # row sums of p1 as a lane-major (1, N) vector (ones-row matmul trick)
    l1 = lax.dot_general(ones_row, p1, (((1,), (1,)), ((), ())),
                         preferred_element_type=f32)                           # (1, N)
    scale1 = g1_ref[0, 0] * pl.reciprocal(l1, approx=True)                     # (1, N)
    outx_ref[0] = out_un1 * scale1 + x

    # ------------------------- modality 2: out_y -------------------------
    # logits2 = (k2^T k1) @ wl2^T + bl2  ==  k2^T (k1 @ wl2^T) + bl2
    t2 = jnp.dot(k1, wl2t_ref[...], preferred_element_type=f32)                # (8, N)
    logits2 = lax.dot_general(k2, t2, (((0,), (0,)), ((), ())),
                              preferred_element_type=f32) + bl2_ref[...]       # (N, N)
    m2 = jnp.max(logits2, axis=-1, keepdims=True)
    p2 = jnp.exp(logits2 - m2)

    v1 = jnp.dot(wv1_ref[...], x, preferred_element_type=f32) + bv1_ref[...]   # (C, N)
    out_un2 = lax.dot_general(v1, p2, (((1,), (1,)), ((), ())),
                              preferred_element_type=f32)                      # (C, N)
    l2 = lax.dot_general(ones_row, p2, (((1,), (1,)), ((), ())),
                         preferred_element_type=f32)                           # (1, N)
    scale2 = g2_ref[0, 0] * pl.reciprocal(l2, approx=True)
    outy_ref[0] = out_un2 * scale2 + y


def _pad_rows(a, rows):
    pad = rows - a.shape[0]
    if pad <= 0:
        return a
    return jnp.pad(a, ((0, pad), (0, 0)))


def dual_cross_modal_attention(x, y, params):
    """x, y: (B, C, H, W) float32. Returns (out_x, out_y) in NCHW."""
    B, C, H, W = x.shape
    N = H * W
    Ck = params["wk1"].shape[0]
    Ck_pad = max(8, -(-Ck // 8) * 8)   # pad the tiny key dim to a full sublane tile

    # Host-side parameter folds / layout prep (grid-invariant, amortized).
    wk1f = _pad_rows(params["wks"] @ params["wk1"], Ck_pad)                 # (8, C)
    bk1f = _pad_rows(params["wks"] @ params["bk1"] + params["bks"], Ck_pad) # (8, 1)
    wk2f = _pad_rows(params["wks"] @ params["wk2"], Ck_pad)
    bk2f = _pad_rows(params["wks"] @ params["bk2"] + params["bks"], Ck_pad)
    wl1t = params["wl1"].T                                                  # (N, N) f32
    wl2t = params["wl2"].T                                                  # (N, N) f32

    xf = x.reshape(B, C, N)
    yf = y.reshape(B, C, N)

    full2d = lambda shape: pl.BlockSpec(shape, lambda b: (0, 0))
    batch3d = pl.BlockSpec((1, C, N), lambda b: (b, 0, 0))
    smem_scalar = pl.BlockSpec(memory_space=pltpu.MemorySpace.SMEM)

    in_specs = [
        batch3d, batch3d,
        full2d((Ck_pad, C)), full2d((Ck_pad, 1)),   # folded + padded key_conv1 w, b
        full2d((Ck_pad, C)), full2d((Ck_pad, 1)),   # folded + padded key_conv2 w, b
        full2d((N, N)), full2d((1, N)),             # linear1 w^T, b
        full2d((N, N)), full2d((1, N)),             # linear2 w^T, b
        full2d((C, C)), full2d((C, 1)),             # value_conv1 w, b
        full2d((C, C)), full2d((C, 1)),             # value_conv2 w, b
        smem_scalar, smem_scalar,                   # gamma1, gamma2 (SMEM scalars)
    ]
    out_specs = [batch3d, batch3d]

    outx, outy = pl.pallas_call(
        dcma_kernel,
        out_shape=[jax.ShapeDtypeStruct((B, C, N), jnp.float32),
                   jax.ShapeDtypeStruct((B, C, N), jnp.float32)],
        grid=(B,),
        in_specs=in_specs,
        out_specs=out_specs,
        compiler_params=pltpu.CompilerParams(
            dimension_semantics=("parallel",),
            vmem_limit_bytes=32 * 1024 * 1024),
    )(xf, yf,
      wk1f, bk1f, wk2f, bk2f,
      wl1t, params["bl1"], wl2t, params["bl2"],
      params["wv1"], params["bv1"], params["wv2"], params["bv2"],
      params["g1"], params["g2"])

    return outx.reshape(B, C, H, W), outy.reshape(B, C, H, W)


def reference_forward(x, y, p):
    """Pure-JAX (f32) reference mirroring the PyTorch forward."""
    B, C, H, W = x.shape
    N = H * W
    xf = x.reshape(B, C, N)
    yf = y.reshape(B, C, N)

    def conv(w, b, a):          # (Co,Ci) @ (B,Ci,N) + (Co,1)
        return jnp.einsum("oc,bcn->bon", w, a) + b[None]

    k1 = conv(p["wks"], p["bks"], conv(p["wk1"], p["bk1"], xf))
    k2 = conv(p["wks"], p["bks"], conv(p["wk2"], p["bk2"], yf))
    energy = jnp.einsum("bci,bcj->bij", k1, k2)
    logits1 = jnp.einsum("bij,kj->bik", energy, p["wl1"]) + p["bl1"][None]
    logits2 = jnp.einsum("bji,kj->bik", energy, p["wl2"]) + p["bl2"][None]
    att1 = jax.nn.softmax(logits1, axis=-1)
    att2 = jax.nn.softmax(logits2, axis=-1)
    v2 = conv(p["wv2"], p["bv2"], yf)
    v1 = conv(p["wv1"], p["bv1"], xf)
    out_y_on_x = jnp.einsum("bcj,bij->bci", v2, att1)
    out_x_on_y = jnp.einsum("bcj,bij->bci", v1, att2)
    out_x = p["g1"][0, 0] * out_y_on_x + xf
    out_y = p["g2"][0, 0] * out_x_on_y + yf
    return out_x.reshape(B, C, H, W), out_y.reshape(B, C, H, W)


def make_params(key, C, N, ratio):
    Ck = C // ratio

    def xavier(k, shape, gain=0.02):
        fan_out, fan_in = shape
        std = gain * (2.0 / (fan_in + fan_out)) ** 0.5
        return std * jax.random.normal(k, shape, jnp.float32)

    ks = jax.random.split(key, 16)
    p = {
        "wk1": xavier(ks[0], (Ck, C)), "bk1": 0.01 * jax.random.normal(ks[1], (Ck, 1)),
        "wk2": xavier(ks[2], (Ck, C)), "bk2": 0.01 * jax.random.normal(ks[3], (Ck, 1)),
        "wks": xavier(ks[4], (Ck, Ck)), "bks": 0.01 * jax.random.normal(ks[5], (Ck, 1)),
        "wl1": xavier(ks[6], (N, N)), "bl1": 0.01 * jax.random.normal(ks[7], (1, N)),
        "wl2": xavier(ks[8], (N, N)), "bl2": 0.01 * jax.random.normal(ks[9], (1, N)),
        "wv1": xavier(ks[10], (C, C)), "bv1": 0.01 * jax.random.normal(ks[11], (C, 1)),
        "wv2": xavier(ks[12], (C, C)), "bv2": 0.01 * jax.random.normal(ks[13], (C, 1)),
        # PyTorch inits gamma to 0 (output == input); use nonzero here so the
        # attention path actually contributes and is exercised by the test.
        "g1": jnp.full((1, 1), 0.5, jnp.float32),
        "g2": jnp.full((1, 1), 0.5, jnp.float32),
    }
    return {k: v.astype(jnp.float32) for k, v in p.items()}


if __name__ == "__main__":
    B, C, H, W = 2, 16, 16, 16   # size=16 -> Linear(256, 256); ratio=8 -> key dim 2
    ratio = 8
    N = H * W

    key = jax.random.PRNGKey(0)
    kx, ky, kp = jax.random.split(key, 3)
    x = jax.random.normal(kx, (B, C, H, W), jnp.float32)
    y = jax.random.normal(ky, (B, C, H, W), jnp.float32)
    params = make_params(kp, C, N, ratio)

    out_x, out_y = jax.block_until_ready(dual_cross_modal_attention(x, y, params))
    ref_x, ref_y = reference_forward(x, y, params)

    assert out_x.shape == (B, C, H, W) and out_y.shape == (B, C, H, W)
    # All attention-path matmuls are f32 now (the rank-Ck reassociation removed
    # the bf16 energy cast); remaining deltas are MXU f32 rounding + the
    # approximate reciprocal in the deferred softmax normalization.
    assert jnp.allclose(out_x, ref_x, atol=5e-3, rtol=5e-3)
    assert jnp.allclose(out_y, ref_y, atol=5e-3, rtol=5e-3)
    print("KERNEL_OK")
</pallas_src>

<mosaic_0001>
module attributes {stable_mosaic.version = 11 : i64} {
  func.func @dcma_kernel(%arg0: i32, %arg1: memref<1x16x256xf32, #tpu.memory_space<vmem>>, %arg2: memref<1x16x256xf32, #tpu.memory_space<vmem>>, %arg3: memref<8x16xf32, #tpu.memory_space<vmem>>, %arg4: memref<8x1xf32, #tpu.memory_space<vmem>>, %arg5: memref<8x16xf32, #tpu.memory_space<vmem>>, %arg6: memref<8x1xf32, #tpu.memory_space<vmem>>, %arg7: memref<256x256xf32, #tpu.memory_space<vmem>>, %arg8: memref<1x256xf32, #tpu.memory_space<vmem>>, %arg9: memref<256x256xf32, #tpu.memory_space<vmem>>, %arg10: memref<1x256xf32, #tpu.memory_space<vmem>>, %arg11: memref<16x16xf32, #tpu.memory_space<vmem>>, %arg12: memref<16x1xf32, #tpu.memory_space<vmem>>, %arg13: memref<16x16xf32, #tpu.memory_space<vmem>>, %arg14: memref<16x1xf32, #tpu.memory_space<vmem>>, %arg15: memref<1x1xf32, #tpu.memory_space<smem>>, %arg16: memref<1x1xf32, #tpu.memory_space<smem>>, %arg17: memref<1x16x256xf32, #tpu.memory_space<vmem>>, %arg18: memref<1x16x256xf32, #tpu.memory_space<vmem>>) attributes {dimension_semantics = [#tpu.dimension_semantics<parallel>], iteration_bounds = array<i64: 2>, scalar_prefetch = 0 : i64, scratch_operands = 0 : i64, tpu.core_type = #tpu.core_type<tc>, window_params = [{transform_indices = @transform_0, window_bounds = array<i64: 1, 16, 256>}, {transform_indices = @transform_1, window_bounds = array<i64: 1, 16, 256>}, {pipeline_mode = #tpu.pipeline_mode<synchronous>, transform_indices = @transform_2, window_bounds = array<i64: 8, 16>}, {pipeline_mode = #tpu.pipeline_mode<synchronous>, transform_indices = @transform_3, window_bounds = array<i64: 8, 1>}, {pipeline_mode = #tpu.pipeline_mode<synchronous>, transform_indices = @transform_4, window_bounds = array<i64: 8, 16>}, {pipeline_mode = #tpu.pipeline_mode<synchronous>, transform_indices = @transform_5, window_bounds = array<i64: 8, 1>}, {pipeline_mode = #tpu.pipeline_mode<synchronous>, transform_indices = @transform_6, window_bounds = array<i64: 256, 256>}, {pipeline_mode = #tpu.pipeline_mode<synchronous>, transform_indices = @transform_7, window_bounds = array<i64: 1, 256>}, {pipeline_mode = #tpu.pipeline_mode<synchronous>, transform_indices = @transform_8, window_bounds = array<i64: 256, 256>}, {pipeline_mode = #tpu.pipeline_mode<synchronous>, transform_indices = @transform_9, window_bounds = array<i64: 1, 256>}, {pipeline_mode = #tpu.pipeline_mode<synchronous>, transform_indices = @transform_10, window_bounds = array<i64: 16, 16>}, {pipeline_mode = #tpu.pipeline_mode<synchronous>, transform_indices = @transform_11, window_bounds = array<i64: 16, 1>}, {pipeline_mode = #tpu.pipeline_mode<synchronous>, transform_indices = @transform_12, window_bounds = array<i64: 16, 16>}, {pipeline_mode = #tpu.pipeline_mode<synchronous>, transform_indices = @transform_13, window_bounds = array<i64: 16, 1>}, {transform_indices = @transform_14, window_bounds = array<i64: 1, 1>}, {transform_indices = @transform_15, window_bounds = array<i64: 1, 1>}, {transform_indices = @transform_16, window_bounds = array<i64: 1, 16, 256>}, {transform_indices = @transform_17, window_bounds = array<i64: 1, 16, 256>}]} {
    %c0 = arith.constant 0 : index
    %c0_0 = arith.constant 0 : index
    %c0_1 = arith.constant 0 : index
    %0 = vector.load %arg1[%c0, %c0_0, %c0_1] : memref<1x16x256xf32, #tpu.memory_space<vmem>>, vector<1x16x256xf32>
    %1 = vector.shape_cast %0 : vector<1x16x256xf32> to vector<16x256xf32>
    %c0_2 = arith.constant 0 : index
    %c0_3 = arith.constant 0 : index
    %c0_4 = arith.constant 0 : index
    %2 = vector.load %arg2[%c0_2, %c0_3, %c0_4] : memref<1x16x256xf32, #tpu.memory_space<vmem>>, vector<1x16x256xf32>
    %3 = vector.shape_cast %2 : vector<1x16x256xf32> to vector<16x256xf32>
    %c0_5 = arith.constant 0 : index
    %c0_6 = arith.constant 0 : index
    %4 = vector.load %arg3[%c0_5, %c0_6] : memref<8x16xf32, #tpu.memory_space<vmem>>, vector<8x16xf32>
    %cst = arith.constant dense<0.000000e+00> : vector<8x256xf32>
    %5 = tpu.matmul %4, %1, %cst {dimension_numbers = #tpu.dot_dimension_numbers<[1], [0], [0], [1], [0, 0, 1, 1], [], []>} : vector<8x16xf32>, vector<16x256xf32>, vector<8x256xf32> -> vector<8x256xf32>
    %c0_7 = arith.constant 0 : index
    %c0_8 = arith.constant 0 : index
    %6 = vector.load %arg4[%c0_7, %c0_8] : memref<8x1xf32, #tpu.memory_space<vmem>>, vector<8x1xf32>
    %7 = vector.broadcast %6 : vector<8x1xf32> to vector<8x256xf32>
    %8 = arith.addf %5, %7 : vector<8x256xf32>
    %c0_9 = arith.constant 0 : index
    %c0_10 = arith.constant 0 : index
    %9 = vector.load %arg5[%c0_9, %c0_10] : memref<8x16xf32, #tpu.memory_space<vmem>>, vector<8x16xf32>
    %cst_11 = arith.constant dense<0.000000e+00> : vector<8x256xf32>
    %10 = tpu.matmul %9, %3, %cst_11 {dimension_numbers = #tpu.dot_dimension_numbers<[1], [0], [0], [1], [0, 0, 1, 1], [], []>} : vector<8x16xf32>, vector<16x256xf32>, vector<8x256xf32> -> vector<8x256xf32>
    %c0_12 = arith.constant 0 : index
    %c0_13 = arith.constant 0 : index
    %11 = vector.load %arg6[%c0_12, %c0_13] : memref<8x1xf32, #tpu.memory_space<vmem>>, vector<8x1xf32>
    %12 = vector.broadcast %11 : vector<8x1xf32> to vector<8x256xf32>
    %13 = arith.addf %10, %12 : vector<8x256xf32>
    %cst_14 = arith.constant 1.000000e+00 : f32
    %14 = vector.broadcast %cst_14 : f32 to vector<1x256xf32>
    %c0_15 = arith.constant 0 : index
    %c0_16 = arith.constant 0 : index
    %15 = vector.load %arg7[%c0_15, %c0_16] : memref<256x256xf32, #tpu.memory_space<vmem>>, vector<256x256xf32>
    %cst_17 = arith.constant dense<0.000000e+00> : vector<8x256xf32>
    %16 = tpu.matmul %13, %15, %cst_17 {dimension_numbers = #tpu.dot_dimension_numbers<[1], [0], [0], [1], [0, 0, 1, 1], [], []>} : vector<8x256xf32>, vector<256x256xf32>, vector<8x256xf32> -> vector<8x256xf32>
    %cst_18 = arith.constant dense<0.000000e+00> : vector<256x256xf32>
    %17 = tpu.matmul %8, %16, %cst_18 {dimension_numbers = #tpu.dot_dimension_numbers<[0], [0], [1], [1], [0, 1, 1, 1], [], []>} : vector<8x256xf32>, vector<8x256xf32>, vector<256x256xf32> -> vector<256x256xf32>
    %c0_19 = arith.constant 0 : index
    %c0_20 = arith.constant 0 : index
    %18 = vector.load %arg8[%c0_19, %c0_20] : memref<1x256xf32, #tpu.memory_space<vmem>>, vector<1x256xf32>
    %19 = vector.broadcast %18 : vector<1x256xf32> to vector<256x256xf32>
    %20 = arith.addf %17, %19 : vector<256x256xf32>
    %cst_21 = arith.constant dense<0xFF800000> : vector<256xf32>
    %21 = vector.multi_reduction <maximumf>, %20, %cst_21 [1] : vector<256x256xf32> to vector<256xf32>
    %22 = vector.shape_cast %21 : vector<256xf32> to vector<256x1xf32>
    %23 = vector.broadcast %22 : vector<256x1xf32> to vector<256x256xf32>
    %24 = arith.subf %20, %23 : vector<256x256xf32>
    %25 = math.exp %24 : vector<256x256xf32>
    %c0_22 = arith.constant 0 : index
    %c0_23 = arith.constant 0 : index
    %26 = vector.load %arg13[%c0_22, %c0_23] : memref<16x16xf32, #tpu.memory_space<vmem>>, vector<16x16xf32>
    %cst_24 = arith.constant dense<0.000000e+00> : vector<16x256xf32>
    %27 = tpu.matmul %26, %3, %cst_24 {dimension_numbers = #tpu.dot_dimension_numbers<[1], [0], [0], [1], [0, 0, 1, 1], [], []>} : vector<16x16xf32>, vector<16x256xf32>, vector<16x256xf32> -> vector<16x256xf32>
    %c0_25 = arith.constant 0 : index
    %c0_26 = arith.constant 0 : index
    %28 = vector.load %arg14[%c0_25, %c0_26] : memref<16x1xf32, #tpu.memory_space<vmem>>, vector<16x1xf32>
    %29 = vector.broadcast %28 : vector<16x1xf32> to vector<16x256xf32>
    %30 = arith.addf %27, %29 : vector<16x256xf32>
    %cst_27 = arith.constant dense<0.000000e+00> : vector<16x256xf32>
    %31 = tpu.matmul %30, %25, %cst_27 {dimension_numbers = #tpu.dot_dimension_numbers<[1], [1], [0], [0], [0, 0, 1, 0], [], []>} : vector<16x256xf32>, vector<256x256xf32>, vector<16x256xf32> -> vector<16x256xf32>
    %cst_28 = arith.constant dense<0.000000e+00> : vector<1x256xf32>
    %32 = tpu.matmul %14, %25, %cst_28 {dimension_numbers = #tpu.dot_dimension_numbers<[1], [1], [0], [0], [0, 0, 1, 0], [], []>} : vector<1x256xf32>, vector<256x256xf32>, vector<1x256xf32> -> vector<1x256xf32>
    %c0_29 = arith.constant 0 : index
    %c0_30 = arith.constant 0 : index
    %33 = memref.load %arg15[%c0_29, %c0_30] : memref<1x1xf32, #tpu.memory_space<smem>>
    %34 = tpu.reciprocal %32 {approx = true} : vector<1x256xf32> -> vector<1x256xf32>
    %35 = vector.broadcast %33 : f32 to vector<1x256xf32>
    %36 = arith.mulf %35, %34 : vector<1x256xf32>
    %37 = vector.broadcast %36 : vector<1x256xf32> to vector<16x256xf32>
    %38 = arith.mulf %31, %37 : vector<16x256xf32>
    %39 = arith.addf %38, %1 : vector<16x256xf32>
    %c0_31 = arith.constant 0 : index
    %c0_32 = arith.constant 0 : index
    %c0_33 = arith.constant 0 : index
    %40 = vector.load %arg17[%c0_31, %c0_32, %c0_33] : memref<1x16x256xf32, #tpu.memory_space<vmem>>, vector<1x16x256xf32>
    %41 = vector.shape_cast %40 : vector<1x16x256xf32> to vector<16x256xf32>
    %42 = vector.shape_cast %39 : vector<16x256xf32> to vector<1x16x256xf32>
    tpu.vector_store %arg17[%c0_31, %c0_32, %c0_33], %42 {strides = array<i32>} : memref<1x16x256xf32, #tpu.memory_space<vmem>>, vector<1x16x256xf32>,
    %c0_34 = arith.constant 0 : index
    %c0_35 = arith.constant 0 : index
    %43 = vector.load %arg9[%c0_34, %c0_35] : memref<256x256xf32, #tpu.memory_space<vmem>>, vector<256x256xf32>
    %cst_36 = arith.constant dense<0.000000e+00> : vector<8x256xf32>
    %44 = tpu.matmul %8, %43, %cst_36 {dimension_numbers = #tpu.dot_dimension_numbers<[1], [0], [0], [1], [0, 0, 1, 1], [], []>} : vector<8x256xf32>, vector<256x256xf32>, vector<8x256xf32> -> vector<8x256xf32>
    %cst_37 = arith.constant dense<0.000000e+00> : vector<256x256xf32>
    %45 = tpu.matmul %13, %44, %cst_37 {dimension_numbers = #tpu.dot_dimension_numbers<[0], [0], [1], [1], [0, 1, 1, 1], [], []>} : vector<8x256xf32>, vector<8x256xf32>, vector<256x256xf32> -> vector<256x256xf32>
    %c0_38 = arith.constant 0 : index
    %c0_39 = arith.constant 0 : index
    %46 = vector.load %arg10[%c0_38, %c0_39] : memref<1x256xf32, #tpu.memory_space<vmem>>, vector<1x256xf32>
    %47 = vector.broadcast %46 : vector<1x256xf32> to vector<256x256xf32>
    %48 = arith.addf %45, %47 : vector<256x256xf32>
    %cst_40 = arith.constant dense<0xFF800000> : vector<256xf32>
    %49 = vector.multi_reduction <maximumf>, %48, %cst_40 [1] : vector<256x256xf32> to vector<256xf32>
    %50 = vector.shape_cast %49 : vector<256xf32> to vector<256x1xf32>
    %51 = vector.broadcast %50 : vector<256x1xf32> to vector<256x256xf32>
    %52 = arith.subf %48, %51 : vector<256x256xf32>
    %53 = math.exp %52 : vector<256x256xf32>
    %c0_41 = arith.constant 0 : index
    %c0_42 = arith.constant 0 : index
    %54 = vector.load %arg11[%c0_41, %c0_42] : memref<16x16xf32, #tpu.memory_space<vmem>>, vector<16x16xf32>
    %cst_43 = arith.constant dense<0.000000e+00> : vector<16x256xf32>
    %55 = tpu.matmul %54, %1, %cst_43 {dimension_numbers = #tpu.dot_dimension_numbers<[1], [0], [0], [1], [0, 0, 1, 1], [], []>} : vector<16x16xf32>, vector<16x256xf32>, vector<16x256xf32> -> vector<16x256xf32>
    %c0_44 = arith.constant 0 : index
    %c0_45 = arith.constant 0 : index
    %56 = vector.load %arg12[%c0_44, %c0_45] : memref<16x1xf32, #tpu.memory_space<vmem>>, vector<16x1xf32>
    %57 = vector.broadcast %56 : vector<16x1xf32> to vector<16x256xf32>
    %58 = arith.addf %55, %57 : vector<16x256xf32>
    %cst_46 = arith.constant dense<0.000000e+00> : vector<16x256xf32>
    %59 = tpu.matmul %58, %53, %cst_46 {dimension_numbers = #tpu.dot_dimension_numbers<[1], [1], [0], [0], [0, 0, 1, 0], [], []>} : vector<16x256xf32>, vector<256x256xf32>, vector<16x256xf32> -> vector<16x256xf32>
    %cst_47 = arith.constant dense<0.000000e+00> : vector<1x256xf32>
    %60 = tpu.matmul %14, %53, %cst_47 {dimension_numbers = #tpu.dot_dimension_numbers<[1], [1], [0], [0], [0, 0, 1, 0], [], []>} : vector<1x256xf32>, vector<256x256xf32>, vector<1x256xf32> -> vector<1x256xf32>
    %c0_48 = arith.constant 0 : index
    %c0_49 = arith.constant 0 : index
    %61 = memref.load %arg16[%c0_48, %c0_49] : memref<1x1xf32, #tpu.memory_space<smem>>
    %62 = tpu.reciprocal %60 {approx = true} : vector<1x256xf32> -> vector<1x256xf32>
    %63 = vector.broadcast %61 : f32 to vector<1x256xf32>
    %64 = arith.mulf %63, %62 : vector<1x256xf32>
    %65 = vector.broadcast %64 : vector<1x256xf32> to vector<16x256xf32>
    %66 = arith.mulf %59, %65 : vector<16x256xf32>
    %67 = arith.addf %66, %3 : vector<16x256xf32>
    %c0_50 = arith.constant 0 : index
    %c0_51 = arith.constant 0 : index
    %c0_52 = arith.constant 0 : index
    %68 = vector.load %arg18[%c0_50, %c0_51, %c0_52] : memref<1x16x256xf32, #tpu.memory_space<vmem>>, vector<1x16x256xf32>
    %69 = vector.shape_cast %68 : vector<1x16x256xf32> to vector<16x256xf32>
    %70 = vector.shape_cast %67 : vector<16x256xf32> to vector<1x16x256xf32>
    tpu.vector_store %arg18[%c0_50, %c0_51, %c0_52], %70 {strides = array<i32>} : memref<1x16x256xf32, #tpu.memory_space<vmem>>, vector<1x16x256xf32>,
    return
  }
  func.func @transform_0(%arg0: i32) -> (i32, i32, i32) {
    %c0_i32 = arith.constant 0 : i32
    %c0_i32_0 = arith.constant 0 : i32
    %c0_i32_1 = arith.constant 0 : i32
    return %arg0, %c0_i32, %c0_i32_0 : i32, i32, i32
  }
  func.func @transform_1(%arg0: i32) -> (i32, i32, i32) {
    %c0_i32 = arith.constant 0 : i32
    %c0_i32_0 = arith.constant 0 : i32
    %c0_i32_1 = arith.constant 0 : i32
    return %arg0, %c0_i32, %c0_i32_0 : i32, i32, i32
  }
  func.func @transform_2(%arg0: i32) -> (i32, i32) {
    %c0_i32 = arith.constant 0 : i32
    %c0_i32_0 = arith.constant 0 : i32
    %c0_i32_1 = arith.constant 0 : i32
    return %c0_i32, %c0_i32_0 : i32, i32
  }
  func.func @transform_3(%arg0: i32) -> (i32, i32) {
    %c0_i32 = arith.constant 0 : i32
    %c0_i32_0 = arith.constant 0 : i32
    %c0_i32_1 = arith.constant 0 : i32
    return %c0_i32, %c0_i32_0 : i32, i32
  }
  func.func @transform_4(%arg0: i32) -> (i32, i32) {
    %c0_i32 = arith.constant 0 : i32
    %c0_i32_0 = arith.constant 0 : i32
    %c0_i32_1 = arith.constant 0 : i32
    return %c0_i32, %c0_i32_0 : i32, i32
  }
  func.func @transform_5(%arg0: i32) -> (i32, i32) {
    %c0_i32 = arith.constant 0 : i32
    %c0_i32_0 = arith.constant 0 : i32
    %c0_i32_1 = arith.constant 0 : i32
    return %c0_i32, %c0_i32_0 : i32, i32
  }
  func.func @transform_6(%arg0: i32) -> (i32, i32) {
    %c0_i32 = arith.constant 0 : i32
    %c0_i32_0 = arith.constant 0 : i32
    %c0_i32_1 = arith.constant 0 : i32
    return %c0_i32, %c0_i32_0 : i32, i32
  }
  func.func @transform_7(%arg0: i32) -> (i32, i32) {
    %c0_i32 = arith.constant 0 : i32
    %c0_i32_0 = arith.constant 0 : i32
    %c0_i32_1 = arith.constant 0 : i32
    return %c0_i32, %c0_i32_0 : i32, i32
  }
  func.func @transform_8(%arg0: i32) -> (i32, i32) {
    %c0_i32 = arith.constant 0 : i32
    %c0_i32_0 = arith.constant 0 : i32
    %c0_i32_1 = arith.constant 0 : i32
    return %c0_i32, %c0_i32_0 : i32, i32
  }
  func.func @transform_9(%arg0: i32) -> (i32, i32) {
    %c0_i32 = arith.constant 0 : i32
    %c0_i32_0 = arith.constant 0 : i32
    %c0_i32_1 = arith.constant 0 : i32
    return %c0_i32, %c0_i32_0 : i32, i32
  }
  func.func @transform_10(%arg0: i32) -> (i32, i32) {
    %c0_i32 = arith.constant 0 : i32
    %c0_i32_0 = arith.constant 0 : i32
    %c0_i32_1 = arith.constant 0 : i32
    return %c0_i32, %c0_i32_0 : i32, i32
  }
  func.func @transform_11(%arg0: i32) -> (i32, i32) {
    %c0_i32 = arith.constant 0 : i32
    %c0_i32_0 = arith.constant 0 : i32
    %c0_i32_1 = arith.constant 0 : i32
    return %c0_i32, %c0_i32_0 : i32, i32
  }
  func.func @transform_12(%arg0: i32) -> (i32, i32) {
    %c0_i32 = arith.constant 0 : i32
    %c0_i32_0 = arith.constant 0 : i32
    %c0_i32_1 = arith.constant 0 : i32
    return %c0_i32, %c0_i32_0 : i32, i32
  }
  func.func @transform_13(%arg0: i32) -> (i32, i32) {
    %c0_i32 = arith.constant 0 : i32
    %c0_i32_0 = arith.constant 0 : i32
    %c0_i32_1 = arith.constant 0 : i32
    return %c0_i32, %c0_i32_0 : i32, i32
  }
  func.func @transform_14(%arg0: i32) -> (i32, i32) {
    %c0_i32 = arith.constant 0 : i32
    %c0_i32_0 = arith.constant 0 : i32
    %c0_i32_1 = arith.constant 0 : i32
    return %c0_i32, %c0_i32_0 : i32, i32
  }
  func.func @transform_15(%arg0: i32) -> (i32, i32) {
    %c0_i32 = arith.constant 0 : i32
    %c0_i32_0 = arith.constant 0 : i32
    %c0_i32_1 = arith.constant 0 : i32
    return %c0_i32, %c0_i32_0 : i32, i32
  }
  func.func @transform_16(%arg0: i32) -> (i32, i32, i32) {
    %c0_i32 = arith.constant 0 : i32
    %c0_i32_0 = arith.constant 0 : i32
    %c0_i32_1 = arith.constant 0 : i32
    return %arg0, %c0_i32, %c0_i32_0 : i32, i32, i32
  }
  func.func @transform_17(%arg0: i32) -> (i32, i32, i32) {
    %c0_i32 = arith.constant 0 : i32
    %c0_i32_0 = arith.constant 0 : i32
    %c0_i32_1 = arith.constant 0 : i32
    return %arg0, %c0_i32, %c0_i32_0 : i32, i32, i32
  }
}

</mosaic_0001>

<bundles_post_ra>
// kernel: tpu_custom_call.1
= control target key start
LH: loop header
LB: loop body
LE: loop exit
PB: predicated region body
PF: predicated region fallthrough
CT: control target
= control target key end

     0   :  { %s5429_s0 = inlined_call_operand.hbm [shape: f32[2,16,256], index: 0, kind: input, shape index: {}]   ;;  %s5430_s1 = inlined_call_operand.hbm [shape: f32[2,16,256], index: 1, kind: input, shape index: {}]   ;;  %s5431_s2 = inlined_call_operand.vmem [shape: f32[8,16], index: 2, kind: input, shape index: {}]   ;;  %s5432_s3 = inlined_call_operand.vmem [shape: f32[8,1], index: 3, kind: input, shape index: {}]   ;;  %s5433_s4 = inlined_call_operand.vmem [shape: f32[8,16], index: 4, kind: input, shape index: {}]   ;;  %s5434_s5 = inlined_call_operand.vmem [shape: f32[8,1], index: 5, kind: input, shape index: {}]   ;;  %s5435_s6 = inlined_call_operand.hbm [shape: f32[256,256], index: 6, kind: input, shape index: {}]   ;;  %s5436_s7 = inlined_call_operand.vmem [shape: f32[1,256], index: 7, kind: input, shape index: {}]   ;;  %s5437_s8 = inlined_call_operand.hbm [shape: f32[256,256], index: 8, kind: input, shape index: {}]   ;;  %s5438_s9 = inlined_call_operand.vmem [shape: f32[1,256], index: 9, kind: input, shape index: {}]   ;;  %s5439_s10 = inlined_call_operand.vmem [shape: f32[16,16], index: 10, kind: input, shape index: {}]   ;;  %s5440_s11 = inlined_call_operand.vmem [shape: f32[16,1], index: 11, kind: input, shape index: {}]   ;;  %s5441_s12 = inlined_call_operand.vmem [shape: f32[16,16], index: 12, kind: input, shape index: {}]   ;;  %s5442_s13 = inlined_call_operand.vmem [shape: f32[16,1], index: 13, kind: input, shape index: {}]   ;;  %s5443_s14 = inlined_call_operand.<no memory space> [shape: f32[1,1], index: 14, kind: input, shape index: {}]   ;;  %s5444_s15 = inlined_call_operand.<no memory space> [shape: f32[1,1], index: 15, kind: input, shape index: {}]   ;;  %s5445_s16 = inlined_call_operand.hbm [shape: f32[2,16,256], index: 16, kind: output, shape index: {0}]   ;;  %s5446_s17 = inlined_call_operand.hbm [shape: f32[2,16,256], index: 17, kind: output, shape index: {1}]  }
   0x1   :  { %5506 = sst [smem:[#allocation44_spill]] %s5429_s0 }
   0x2   :  { %5507 = sst [smem:[#allocation45_spill]] %s5430_s1 }
   0x3   :  { %5508 = sst [smem:[#allocation46_spill]] %s5435_s6 }
   0x4   :  { %5509 = sst [smem:[#allocation47_spill]] %s5437_s8 }
   0x5   :  { %5510 = sst [smem:[#allocation48_spill]] %s5438_s9 }
   0x6   :  { %5511 = sst [smem:[#allocation49_spill]] %s5440_s11 }
   0x7   :  { %5512 = sst [smem:[#allocation50_spill]] %s5445_s16 }
   0x8   :  { %5513 = sst [smem:[#allocation51_spill]] %s5446_s17 }
   0x9   :  { %23 = sst [smem:[#allocation2]] %s5443_s14 }
   0xa   :  { %24 = sst [smem:[#allocation3]] %s5444_s15 }
   0xb   :  { %25 = vsyncpa [#allocation5], 0 }
   0xc   :  { %27 = vsyncpa [#allocation5 + $0x1], 0 }
   0xd   :  { %28 = vsyncpa [#allocation8], 0 }
   0xe   :  { %30 = vsyncpa [#allocation8 + $0x1], 0 }
   0xf   :  { %31 = vsyncpa [#allocation11], 0 }
  0x10   :  { %32 = vsyncpa [#allocation6], 0 }
  0x11   :  { %34 = vsyncpa [#allocation6 + $0x1], 0 }
  0x12   :  { %35 = vsyncpa [#allocation14], 0 }
  0x13   :  { %37 = vsyncpa [#allocation14 + $0x1], 0  ;;  %s4032_s28 = smov 0   ;;  %s4034_s29 = smov 0  }
  0x14   :  { %s4036_s0 = smov 0   ;;  %s4038_s14 = smov 0  }
  0x15 LB: > { %5514 = sst [smem:[#allocation21_spill]] %s3909_s28  ;;  %s4053_s15 = sadd.s32 4294967295, %s3921_s14   ;;  %s3921_s14 = sphi %s4038_s14, %s5618_s14   ;;  %s3917_s0 = sphi %s4036_s0, %s5620_s0   ;;  %s3913_s29 = sphi %s4034_s29, %s5622_s29   ;;  %s3909_s28 = sphi %s4032_s28, %s5621_s28  }
  0x16   : > { %5515 = sst [smem:[#allocation22_spill]] %s3917_s0  ;;  %s3249_s30 = sadd.s32 4294967294, %s3921_s14  }
  0x17   : > { %p63_p0 = scmp.ne.s32.totalorder %s3913_s29, %s3909_s28  ;;  %p5463_p1 = scmp.eq.s32.totalorder %s4053_s15, 0 }
  0x18   : > { %p407_p2 = scmp.eq.s32.totalorder %s4053_s15, 1  ;;  %p413_p3 = scmp.eq.s32.totalorder %s3249_s30, 1 }
  0x19   : > { %p4062_p4 = por %p5463_p1, %p63_p0  ;;  %p3250_p5 = scmp.ge.s32.totalorder %s3921_s14, 1 }
  0x1a   : > { %p4067_p6 = por %p413_p3, %p63_p0  ;;  %p446_p7 = scmp.lt.s32.totalorder %s3921_s14, 3 }
  0x1b   : > { %s5516_s18 = scalar_select %p4062_p4, 1, 0 }
  0x1c   : > { %s5517_s19 = scalar_select %p4067_p6, 1, 0 }
  0x1d   : > { %p4072_p8 = pnand %p3250_p5, %p446_p7  ;;  %s3923_s20 = smov [#allocation9]  }
  0x1e   : > { %5518 = sst [smem:[#allocation23_spill]] %s5517_s19  ;;  %s470_s21 = sshll.u32 %s3923_s20, 4  ;;  %s471_s21 = int_to_ptr.vmem [resolvable:$true] %s470_s21 }
  0x1f   : > { %p3365_p9 = pneg %p4072_p8  ;;  %s3924_s23 = smov [#allocation10]  }
  0x20   : > { %s486_s24 = sshll.u32 %s3924_s23, 4  ;;  %s3718_s25 = scalar_lea.vmem %s471_s21, 8192  ;;  %s487_s24 = int_to_ptr.vmem [resolvable:$true] %s486_s24 }
  0x21   : > { %p4081_p11 = pnand %p3365_p9, %p5463_p1  ;;  %p3719_p13 = scmp.ne.s32.totalorder %s471_s21, %s3718_s25 }
  0x22   : > { %p3726_p5 = scmp.lt.s32.totalorder %s471_s21, %s471_s21  ;;  %p3727_p7 = scmp.lt.s32.totalorder %s3718_s25, %s3718_s25 }
  0x23   : > { %p3709_p12 = pneg %p4081_p11 }
  0x24   : > { %p3728_p10 = por %p3727_p7, %p3726_p5 }
  0x25   : > { %p3721_p0 = pnand %p3719_p13, %p3709_p12 }
  0x27   : > { %p3722_p3 = pneg %p3721_p0 }
  0x29   : > { %p3729_p9 = pnand %p3728_p10, %p3722_p3 }
  0x2b   : > { %3732 = shalt.err (!%p3729_p9)
}
  0x2c   : > { %s5450_s26 = smov 256   ;;  %s5452_s27 = smov 16  }
  0x2d   : > { %s5521_s6 = sld [smem:[#allocation46_spill]]  ;;  %s3744_s23 = scalar_lea.vmem %s487_s24, 8192 }
  0x2e   : > { %p3745_p13 = scmp.ne.s32.totalorder %s487_s24, %s3744_s23  ;;  %p3752_p10 = scmp.lt.s32.totalorder %s487_s24, %s487_s24 }
  0x2f   : > { %p3753_p3 = scmp.lt.s32.totalorder %s3744_s23, %s3744_s23 }
  0x30   : > { %p3747_p0 = pnand %p3745_p13, %p3709_p12 }
  0x31   : > { %p3754_p7 = por %p3753_p3, %p3752_p10 }
  0x32   : > { %p3748_p5 = pneg %p3747_p0 }
  0x33   : > { %3368 = dma.hbm_to_vmem [thread:$0]  (!%p4081_p11), %s5521_s6, 8192, %s471_s21, [#allocation8], %s5450_s26, %s5450_s26, %s5452_s27  }
  0x34   : > { %p3755_p9 = pnand %p3754_p7, %p3748_p5 }
  0x36   : > { %3758 = shalt.err (!%p3755_p9)
}
  0x37   : > { %s5522_s8 = sld [smem:[#allocation47_spill]]  ;;  %s4110_s21 = sadd.s32 1, %s3921_s14  }
  0x38   : > { %5523 = sst [smem:[#allocation24_spill]] %s4110_s21  ;;  %s50_s22 = sadd.s32 1, %s3917_s0 }
  0x39   : > { %s47_s30 = ssub.s32 %s3921_s14, %s4110_s21  ;;  %p57_p12 = scmp.ne.s32.totalorder %s3917_s0, %s3913_s29 }
  0x3a   : > { %p48_p13 = scmp.eq.s32.totalorder %s47_s30, 0  ;;  %p58_p0 = scmp.eq.s32.totalorder %s3921_s14, 0 }
  0x3b   : > { %p4120_p5 = por %p407_p2, %p57_p12  ;;  %p3388_p10 = scmp.lt.s32.totalorder %s3921_s14, 2 }
  0x3c   : > { %s4126_s20 = scalar_select %p48_p13, %s3917_s0, %s50_s22  }
  0x3d   : > { %3371 = dma.hbm_to_vmem [thread:$0]  (!%p4081_p11), %s5522_s8, 8192, %s487_s24, [#allocation11], %s5450_s26, %s5450_s26, %s5452_s27  }
  0x3e   : > { %s5524_s19 = scalar_select %p4120_p5, 1, 0 }
  0x3f   : > { %5526 = sst [smem:[#allocation26_spill]] %s4126_s20  ;;  %p59_p3 = por %p58_p0, %p57_p12 }
  0x40   : > { %5525 = sst [smem:[#allocation25_spill]] %s5524_s19  ;;  %s521_s23 = sand.u32 1, %s3917_s0  }
  0x41   : > { %s3254_s25 = sshll.u32 %s521_s23, 5  ;;  %s3345_s24 = sshll.u32 %s3921_s14, 9 }
  0x42   : > { %s5527_s6 = sld [smem:[#allocation44_spill]]  ;;  %s525_s30 = scalar_lea.vmem [#allocation4], %s3254_s25 }
  0x43   : > { %s532_s21 = sshll.u32 %s525_s30, 4  ;;  %p4137_p2 = pnand %p3388_p10, %p59_p3  ;;  %s4135_s21 = int_to_ptr.vmem [resolvable:$true] %s532_s21 }
  0x44   : > { %s5529_s0 = sld [smem:[#allocation45_spill]]  ;;  %s546_s26 = scalar_lea.vmem [#allocation7], %s3254_s25 }
  0x45   : > { %s4146_s27 = sshll.u32 %s546_s26, 4  ;;  %s4148_s19 = scalar_lea.sflag [#allocation5], %s521_s23  ;;  %s4179_s27 = int_to_ptr.vmem [resolvable:$true] %s4146_s27 }
  0x46   : > { %p3761_p7 = pneg %p4137_p2 }
  0x48   : > { %s4133_s8 = scalar_lea.hbm %s5527_s6, %s3345_s24  ;;  %s3764_s20 = scalar_lea.hbm %s5527_s6, 1024 }
  0x49   : > { %s3759_s11 = scalar_lea.hbm %s4133_s8, 512  ;;  %p3765_p13 = scmp.lt.s32.totalorder %s4133_s8, %s5527_s6 }
  0x4a   : > { %s5530_s17 = smov %s5529_s0  ;;  %s4144_s16 = scalar_lea.hbm %s5529_s0, %s3345_s24 }
  0x4b   : > { %p3760_p11 = scmp.ne.s32.totalorder %s4133_s8, %s3759_s11  ;;  %p3766_p0 = scmp.lt.s32.totalorder %s3764_s20, %s3759_s11 }
  0x4d   : > { %p3762_p9 = pnand %p3761_p7, %p3760_p11  ;;  %p3767_p10 = por %p3766_p0, %p3765_p13 }
  0x4f   : > { %p3763_p12 = pneg %p3762_p9 }
  0x51   : > { %p3768_p3 = pnand %p3767_p10, %p3763_p12 }
  0x53   : > { %3771 = shalt.err (!%p3768_p3)
}
  0x54   : > { %s3772_s23 = scalar_lea.vmem %s4135_s21, 512  ;;  %s3927_s9 = smov [#allocation4]  }
  0x55   : > { %p3773_p1 = scmp.ne.s32.totalorder %s4135_s21, %s3772_s23  ;;  %s3777_s25 = sshll.u32 %s3927_s9, 4  ;;  %s3778_s25 = int_to_ptr.vmem [resolvable:$false] %s3777_s25 }
  0x56   : > { %s3779_s24 = scalar_lea.vmem %s3778_s25, 1024  ;;  %p3780_p6 = scmp.lt.s32.totalorder %s4135_s21, %s3778_s25 }
  0x57   : > { %p3775_p11 = pnand %p3773_p1, %p3761_p7  ;;  %p3781_p5 = scmp.lt.s32.totalorder %s3779_s24, %s3772_s23 }
  0x59   : > { %p3776_p9 = pneg %p3775_p11  ;;  %p3782_p4 = por %p3781_p5, %p3780_p6 }
  0x5b   : > { %p3783_p13 = pnand %p3782_p4, %p3776_p9 }
  0x5d   : > { %3786 = shalt.err (!%p3783_p13)
}
  0x5e   : > { %s5531_s11 = smov 16   ;;  %s5532_s26 = smov 256  }
  0x5f   : > { %3375 = dma.hbm_to_vmem [thread:$0]  (!%p4137_p2), %s4133_s8, 512, %s4135_s21, %s4148_s19, %s5532_s26, %s5532_s26, %s5531_s11  }
  0x60   : > { %s542_s30 = sand.u32 1, %s3921_s14   ;;  %s3787_s22 = scalar_lea.hbm %s4144_s16, 512 }
  0x61   : > { %s543_s20 = scalar_lea.sflag [#allocation8], %s542_s30  ;;  %p3788_p1 = scmp.ne.s32.totalorder %s4144_s16, %s3787_s22 }
  0x62   : > { %s3792_s9 = scalar_lea.hbm %s5530_s17, 1024  ;;  %p3793_p5 = scmp.lt.s32.totalorder %s4144_s16, %s5530_s17 }
  0x63   : > { %p3790_p4 = pnand %p3788_p1, %p3761_p7  ;;  %p3794_p12 = scmp.lt.s32.totalorder %s3792_s9, %s3787_s22 }
  0x65   : > { %p3791_p6 = pneg %p3790_p4  ;;  %p3795_p0 = por %p3794_p12, %p3793_p5 }
  0x67   : > { %p3796_p10 = pnand %p3795_p0, %p3791_p6 }
  0x69   : > { %3799 = shalt.err (!%p3796_p10)
}
  0x6a   : > { %s3800_s8 = scalar_lea.vmem %s4179_s27, 512  ;;  %s3928_s21 = smov [#allocation7]  }
  0x6b   : > { %p3801_p3 = scmp.ne.s32.totalorder %s4179_s27, %s3800_s8  ;;  %s3805_s19 = sshll.u32 %s3928_s21, 4  ;;  %s3806_s19 = int_to_ptr.vmem [resolvable:$false] %s3805_s19 }
  0x6c   : > { %s3807_s30 = scalar_lea.vmem %s3806_s19, 1024  ;;  %p3808_p13 = scmp.lt.s32.totalorder %s4179_s27, %s3806_s19 }
  0x6d   : > { %p3803_p11 = pnand %p3801_p3, %p3761_p7  ;;  %p3809_p1 = scmp.lt.s32.totalorder %s3807_s30, %s3800_s8 }
  0x6f   : > { %p3804_p9 = pneg %p3803_p11  ;;  %p3810_p4 = por %p3809_p1, %p3808_p13 }
  0x71   : > { %p3811_p5 = pnand %p3810_p4, %p3804_p9 }
  0x73   : > { %3814 = shalt.err (!%p3811_p5)
}
  0x74   : > { %3378 = dma.hbm_to_vmem [thread:$0]  (!%p4137_p2), %s4144_s16, 512, %s4179_s27, %s543_s20, %s5532_s26, %s5532_s26, %s5531_s11  }
  0x75   : > { %565 = sbr.rel (%p4072_p8) target bundleno = 2118 (0x846), region = 84 }
  0x7a   : > { %s4210_s22 = sand.u32 1, %s3913_s29   ;;  %p5533_p7 = scmp.ne.s32.totalorder %s5516_s18, 0 }
  0x7b   : > { %s4213_s0 = sshll.u32 %s4210_s22, 5  ;;  %s568_s23 = scalar_lea.sflag [#allocation5], %s4210_s22 }
  0x7c   : > { %s4217_s28 = scalar_lea.vmem [#allocation4], %s4213_s0 }
  0x7d   : > { %3884 = dma.done.wait (%p5533_p7), %s568_s23, 512  }
  0x7e   : > { %3886 = vsyncadd (%p5533_p7), %s568_s23, 4294966784  ;;  %s576_s16 = sand.u32 1, %s4053_s15   ;;  %s4225_s27 = scalar_lea.vmem [#allocation7], %s4213_s0 }
  0x7f   : > { %s577_s1 = scalar_lea.sflag [#allocation8], %s576_s16 }
  0x80   : > { %3888 = dma.done.wait (%p5533_p7), %s577_s1, 512  }
  0x81   : > { %3890 = vsyncadd (%p5533_p7), %s577_s1, 4294966784  ;;  %p5534_p8 = scmp.eq.s32.totalorder %s4053_s15, 0 }
  0x83   : > { %3892 = dma.done.wait (%p5534_p8), [#allocation8], 8192   ;;  %p5535_p2 = pmov %p5534_p8 }
  0x85   : > { %3894 = vsyncadd (%p5535_p2), [#allocation8], 4294959104  ;;  %p5536_p6 = pmov %p5535_p2 }
  0x86   : > { %p5537_p12 = pmov %p5535_p2 }
  0x87   : > { %3896 = dma.done.wait (%p5536_p6), [#allocation11], 8192  }
  0x88   : > { %3898 = vsyncadd (%p5537_p12), [#allocation11], 4294959104  ;;  %v5467_v0 = vmov 0.0   ;;  %v3930_v1 = vmov 0   ;;  %v652_v2 = vld [vmem:[%s4217_s28 + $0x18] sm:$0xff]  ;;  %v651_v4 = vld [vmem:[%s4217_s28 + $0x10] sm:$0xff] }
  0x89   : > { %732 = vmatprep.mubr.f32.mxu0 %v5467_v0  ;;  %813 = vmatprep.mubr.f32.mxu1 %v5467_v0  ;;  %v4244_v3 = vld [vmem:[%s4225_s27 + $0x18] sm:$0xff]  ;;  %v4249_v5 = vld [vmem:[%s4225_s27 + $0x10] sm:$0xff]  ;;  %v650_v6 = vld [vmem:[%s4217_s28 + $0x8] sm:$0xff]  ;;  %vm664_vm0 = vcmask 130048   ;;  %vm1031_vm1 = vcmask 64512   ;;  %s1918_s9 = sld [smem:[#allocation2]] }
  0x8a   : > { %3433 = vset.pattern.permute.xlu0 %v3930_v1  ;;  %696 = vmatprep.subr.mxu0 %v652_v2  ;;  %v4253_v7 = vld [vmem:[%s4225_s27 + $0x8] sm:$0xff]  ;;  %v649_v8 = vld [vmem:[%s4217_s28] sm:$0xff]  ;;  %v851_v13 = vld [vmem:[#allocation9 + $0xf8] sm:$0xff]  ;;  %s5572_s23 = sld [smem:[#allocation48_spill]]  ;;  %s5504_s25 = sshll.u32 %s4053_s15, 9 }
  0x8b   : > { %777 = vmatprep.subr.mxu1 %v4244_v3  ;;  %697 = vmatpush1.msra.mxu0 %v651_v4  ;;  %v4258_v9 = vld [vmem:[%s4225_s27] sm:$0xff]  ;;  %v850_v14 = vld [vmem:[#allocation9 + $0xf0] sm:$0xff]  ;;  %v849_v15 = vld [vmem:[#allocation9 + $0xe8] sm:$0xff]  ;;  %s5590_s18 = sld [smem:[#allocation49_spill]]  ;;  %s3068_s30 = scalar_lea.sflag [#allocation6], %s4210_s22 }
  0x8c   : > { %778 = vmatpush1.msra.mxu1 %v4249_v5  ;;  %v657_v10 = vld [vmem:[%s5431_s2] sm:$0xff]  ;;  %698 = vmatprep.subr.mxu0 %v650_v6  ;;  %v847_v18 = vld [vmem:[#allocation9 + $0xd8] sm:$0xff]  ;;  %v846_v19 = vld [vmem:[#allocation9 + $0xd0] sm:$0xff]  ;;  %s5606_s20 = sld [smem:[#allocation25_spill]]  ;;  %s3932_s16 = smov [#allocation12]  }
  0x8d   : > { %779 = vmatprep.subr.mxu1 %v4253_v7  ;;  %v739_v11 = vld [vmem:[%s5433_s4] sm:$0xff]  ;;  %699 = vmatpush1.msra.mxu0 %v649_v8  ;;  %v845_v20 = vld [vmem:[#allocation9 + $0xc8] sm:$0xff]  ;;  %v843_v22 = vld [vmem:[#allocation9 + $0xb8] sm:$0xff]  ;;  %s5608_s21 = sld [smem:[#allocation50_spill]] }
  0x8e   : > { %v740_v12 = vld [vmem:[%s5434_s5] sm:$0xff]  ;;  %780 = vmatpush1.msra.mxu1 %v4258_v9  ;;  %3267 = vmatmul.mubr.msk.f32.vlgmr.msra.gmra.mxu0 %vm664_vm0, %v657_v10  ;;  %v842_v23 = vld [vmem:[#allocation9 + $0xb0] sm:$0xff]  ;;  %v841_v24 = vld [vmem:[#allocation9 + $0xa8] sm:$0xff] }
  0x8f   : > { %3268 = vmatmul.mubr.msk.f32.vlgmr.msra.gmra.mxu1 %vm664_vm0, %v739_v11  ;;  %743 = vperm.xlu0 %3433, %v740_v12   ;;  %v848_v16 = vld [vmem:[#allocation9 + $0xe0] sm:$0xff]  ;;  %v839_v26 = vld [vmem:[#allocation9 + $0x98] sm:$0xff]  ;;  %v838_v27 = vld [vmem:[#allocation9 + $0x90] sm:$0xff] }
  0x90   : > { %884 = vmatprep.subr.mxu0 %v851_v13  ;;  %v658_v17 = vld [vmem:[%s5432_s3] sm:$0xff]  ;;  %1192 = vmatprep.mubr.f32.mxu1 %v5467_v0  ;;  %v837_v28 = vld [vmem:[#allocation9 + $0x88] sm:$0xff]  ;;  %v835_v30 = vld [vmem:[#allocation9 + $0x78] sm:$0xff] }
  0x91   : > { %885 = vmatpush1.msra.mxu0 %v850_v14  ;;  %v844_v21 = vld [vmem:[#allocation9 + $0xc0] sm:$0xff]  ;;  %v834_v31 = vld [vmem:[#allocation9 + $0x70] sm:$0xff]  ;;  %v833_v32 = vld [vmem:[#allocation9 + $0x68] sm:$0xff] }
  0x92   : > { %886 = vmatprep.subr.mxu0 %v849_v15  ;;  %v840_v25 = vld [vmem:[#allocation9 + $0xa0] sm:$0xff]  ;;  %v831_v34 = vld [vmem:[#allocation9 + $0x58] sm:$0xff]  ;;  %v830_v35 = vld [vmem:[#allocation9 + $0x50] sm:$0xff]  ;;  %p5609_p10 = scmp.ne.s32.totalorder %s5606_s20, 0 }
  0x93   : > { %887 = vmatpush1.msra.mxu0 %v848_v16  ;;  %661 = vperm.xlu0 %3433, %v658_v17   ;;  %v836_v29 = vld [vmem:[#allocation9 + $0x80] sm:$0xff]  ;;  %v829_v36 = vld [vmem:[#allocation9 + $0x48] sm:$0xff]  ;;  %v827_v38 = vld [vmem:[#allocation9 + $0x38] sm:$0xff]  ;;  %s5343_s19 = scalar_lea.hbm %s5608_s21, %s5504_s25 }
  0x94   : > { %888 = vmatprep.subr.mxu0 %v847_v18  ;;  %v832_v33 = vld [vmem:[#allocation9 + $0x60] sm:$0xff]  ;;  %v826_v39 = vld [vmem:[#allocation9 + $0x30] sm:$0xff]  ;;  %v825_v40 = vld [vmem:[#allocation9 + $0x28] sm:$0xff] }
  0x95   : > { %889 = vmatpush1.msra.mxu0 %v846_v19  ;;  %v828_v37 = vld [vmem:[#allocation9 + $0x40] sm:$0xff]  ;;  %v823_v42 = vld [vmem:[#allocation9 + $0x18] sm:$0xff]  ;;  %v822_v43 = vld [vmem:[#allocation9 + $0x10] sm:$0xff] }
  0x96   : > { %890 = vmatprep.subr.mxu0 %v845_v20  ;;  %v824_v41 = vld [vmem:[#allocation9 + $0x20] sm:$0xff]  ;;  %v821_v44 = vld [vmem:[#allocation9 + $0x8] sm:$0xff]  ;;  %v883_v46 = vld [vmem:[#allocation9 + $0x1f8] sm:$0xff] }
  0x97   : > { %891 = vmatpush1.msra.mxu0 %v844_v21  ;;  %v820_v45 = vld [vmem:[#allocation9] sm:$0xff]  ;;  %v882_v47 = vld [vmem:[#allocation9 + $0x1f0] sm:$0xff]  ;;  %v881_v48 = vld [vmem:[#allocation9 + $0x1e8] sm:$0xff] }
  0x98   : > { %892 = vmatprep.subr.mxu0 %v843_v22  ;;  %v880_v49 = vld [vmem:[#allocation9 + $0x1e0] sm:$0xff]  ;;  %v879_v50 = vld [vmem:[#allocation9 + $0x1d8] sm:$0xff]  ;;  %v878_v51 = vld [vmem:[#allocation9 + $0x1d0] sm:$0xff] }
  0x99   : > { %893 = vmatpush1.msra.mxu0 %v842_v23  ;;  %v877_v52 = vld [vmem:[#allocation9 + $0x1c8] sm:$0xff]  ;;  %v876_v53 = vld [vmem:[#allocation9 + $0x1c0] sm:$0xff]  ;;  %v875_v54 = vld [vmem:[#allocation9 + $0x1b8] sm:$0xff] }
  0x9a   : > { %894 = vmatprep.subr.mxu0 %v841_v24  ;;  %v874_v55 = vld [vmem:[#allocation9 + $0x1b0] sm:$0xff]  ;;  %v873_v56 = vld [vmem:[#allocation9 + $0x1a8] sm:$0xff]  ;;  %v872_v57 = vld [vmem:[#allocation9 + $0x1a0] sm:$0xff] }
  0x9b   : > { %895 = vmatpush1.msra.mxu0 %v840_v25  ;;  %v871_v58 = vld [vmem:[#allocation9 + $0x198] sm:$0xff]  ;;  %v870_v59 = vld [vmem:[#allocation9 + $0x190] sm:$0xff]  ;;  %v869_v60 = vld [vmem:[#allocation9 + $0x188] sm:$0xff] }
  0x9c   : > { %896 = vmatprep.subr.mxu0 %v839_v26  ;;  %v868_v61 = vld [vmem:[#allocation9 + $0x180] sm:$0xff]  ;;  %v867_v62 = vld [vmem:[#allocation9 + $0x178] sm:$0xff]  ;;  %v866_v63 = vld [vmem:[#allocation9 + $0x170] sm:$0xff] }
  0x9d   : > { %897 = vmatpush1.msra.mxu0 %v838_v27  ;;  %v865_v2 = vld [vmem:[#allocation9 + $0x168] sm:$0xff]  ;;  %v864_v4 = vld [vmem:[#allocation9 + $0x160] sm:$0xff]  ;;  %v863_v6 = vld [vmem:[#allocation9 + $0x158] sm:$0xff] }
  0x9e   : > { %898 = vmatprep.subr.mxu0 %v837_v28  ;;  %v862_v8 = vld [vmem:[#allocation9 + $0x150] sm:$0xff]  ;;  %v861_v10 = vld [vmem:[#allocation9 + $0x148] sm:$0xff]  ;;  %v860_v11 = vld [vmem:[#allocation9 + $0x140] sm:$0xff] }
  0x9f   : > { %899 = vmatpush1.msra.mxu0 %v836_v29  ;;  %v859_v12 = vld [vmem:[#allocation9 + $0x138] sm:$0xff]  ;;  %v858_v13 = vld [vmem:[#allocation9 + $0x130] sm:$0xff]  ;;  %v857_v14 = vld [vmem:[#allocation9 + $0x128] sm:$0xff] }
  0xa0   : > { %900 = vmatprep.subr.mxu0 %v835_v30  ;;  %v856_v15 = vld [vmem:[#allocation9 + $0x120] sm:$0xff]  ;;  %v855_v16 = vld [vmem:[#allocation9 + $0x118] sm:$0xff]  ;;  %v854_v17 = vld [vmem:[#allocation9 + $0x110] sm:$0xff] }
  0xa1   : > { %901 = vmatpush1.msra.mxu0 %v834_v31  ;;  %v853_v18 = vld [vmem:[#allocation9 + $0x108] sm:$0xff]  ;;  %v852_v19 = vld [vmem:[#allocation9 + $0x100] sm:$0xff] }
  0xa2   : > { %902 = vmatprep.subr.mxu0 %v833_v32 }
  0xa3   : > { %903 = vmatpush1.msra.mxu0 %v832_v33 }
  0xa4   : > { %904 = vmatprep.subr.mxu0 %v831_v34 }
  0xa5   : > { %905 = vmatpush1.msra.mxu0 %v830_v35 }
  0xa6   : > { %906 = vmatprep.subr.mxu0 %v829_v36 }
  0xa7   : > { %907 = vmatpush1.msra.mxu0 %v828_v37 }
  0xa8   : > { %908 = vmatprep.subr.mxu0 %v827_v38 }
  0xa9   : > { %909 = vmatpush1.msra.mxu0 %v826_v39 }
  0xaa   : > { %910 = vmatprep.subr.mxu0 %v825_v40 }
  0xab   : > { %911 = vmatpush1.msra.mxu0 %v824_v41 }
  0xac   : > { %912 = vmatprep.subr.mxu0 %v823_v42 }
  0xad   : > { %913 = vmatpush1.msra.mxu0 %v822_v43 }
  0xae   : > { %914 = vmatprep.subr.mxu0 %v821_v44 }
  0xaf   : > { %915 = vmatpush1.msra.mxu0 %v820_v45 }
  0xb0   : > { %916 = vmatprep.subr.mxu0 %v883_v46 }
  0xb1   : > { %917 = vmatpush2.msra.mxu0 %v882_v47 }
  0xb2   : > { %918 = vmatprep.subr.mxu0 %v881_v48 }
  0xb3   : > { %919 = vmatpush2.msra.mxu0 %v880_v49 }
  0xb4   : > { %920 = vmatprep.subr.mxu0 %v879_v50 }
  0xb5   : > { %921 = vmatpush2.msra.mxu0 %v878_v51 }
  0xb6   : > { %922 = vmatprep.subr.mxu0 %v877_v52 }
  0xb7   : > { %923 = vmatpush2.msra.mxu0 %v876_v53 }
  0xb8   : > { %924 = vmatprep.subr.mxu0 %v875_v54 }
  0xb9   : > { %925 = vmatpush2.msra.mxu0 %v874_v55 }
  0xba   : > { %926 = vmatprep.subr.mxu0 %v873_v56 }
  0xbb   : > { %927 = vmatpush2.msra.mxu0 %v872_v57 }
  0xbc   : > { %928 = vmatprep.subr.mxu0 %v871_v58 }
  0xbd   : > { %929 = vmatpush2.msra.mxu0 %v870_v59 }
  0xbe   : > { %930 = vmatprep.subr.mxu0 %v869_v60 }
  0xbf   : > { %931 = vmatpush2.msra.mxu0 %v868_v61 }
  0xc0   : > { %932 = vmatprep.subr.mxu0 %v867_v62 }
  0xc1   : > { %933 = vmatpush2.msra.mxu0 %v866_v63  ;;  %v1673_v63 = vld [vmem:[%s5441_s12] sm:$0xff] }
  0xc2   : > { %934 = vmatprep.subr.mxu0 %v865_v2 }
  0xc3   : > { %935 = vmatpush2.msra.mxu0 %v864_v4 }
  0xc4   : > { %936 = vmatprep.subr.mxu0 %v863_v6 }
  0xc5   : > { %937 = vmatpush2.msra.mxu0 %v862_v8 }
  0xc6   : > { %938 = vmatprep.subr.mxu0 %v861_v10 }
  0xc7   : > { %939 = vmatpush2.msra.mxu0 %v860_v11  ;;  %v957_v11 = vlaneseq }
  0xc8   : > { %940 = vmatprep.subr.mxu0 %v859_v12 }
  0xc9   : > { %941 = vmatpush2.msra.mxu0 %v858_v13 }
  0xca   : > { %942 = vmatprep.subr.mxu0 %v857_v14  ;;  %v4385_v14 = vshrl.u32 %v957_v11, 7 }
  0xcb   : > { %943 = vmatpush2.msra.mxu0 %v856_v15 }
  0xcc   : > { %944 = vmatprep.subr.mxu0 %v855_v16  ;;  %5540 = vst [vmem:[#allocation29_spill] sm:$0xff] %v4385_v14 }
  0xcd   : > { %945 = vmatpush2.msra.mxu0 %v854_v17  ;;  %v4392_v17 = vsub.s32 0, %v4385_v14 }
  0xce   : > { %946 = vmatprep.subr.mxu0 %v853_v18  ;;  %v5466_v18 = vsub.s32 1, %v4385_v14 }
  0xcf   : > { %947 = vmatpush2.msra.mxu0 %v852_v19  ;;  %5541 = vst [vmem:[#allocation30_spill] sm:$0xff] %v4392_v17  ;;  %v955_v19 = vld [vmem:[%s5436_s7] sm:$0x3] }
  0xd0   : > { %1721 = vmatprep.subr.mxu0 %v4244_v3 }
 0x10a   : > { %v744_v20 = vpop.permute.xlu0 %743 }
 0x10e   : > { %v662_v21 = vpop.permute.xlu0 %661 }
 0x14e   : > { %v734_v22 = vpop.f32.mrf.mxu0 }
 0x14f   : > { %v815_v23 = vpop.f32.mrf.mxu1  ;;  %v4278_v24 = vadd.f32 %v734_v22, %v662_v21 }
 0x150   : > { %v4283_v27 = vadd.f32 %v815_v23, %v744_v20  ;;  %v736_v3 = vpop.f32.mrf.mxu0  ;;  %v4405_v23 = vrot.slane %v955_v19, %v4392_v17 }
 0x151   : > { %5538 = vst [vmem:[#allocation27_spill] sm:$0xff] %v4278_v24  ;;  %v817_v25 = vpop.f32.mrf.mxu1  ;;  %967 = vxpose.xlu1.b32.start.end [1/1] (short) %v4278_v24, 128  ;;  %v4291_v28 = vadd.f32 %v736_v3, %v662_v21  ;;  %v1674_v21 = vld [vmem:[%s5441_s12 + $0x8] sm:$0xff] }
 0x152   : > { %v4280_v26 = vadd.f32 %v817_v25, %v744_v20  ;;  %v4409_v25 = vrot.slane %v955_v19, %v5466_v18 }
 0x153   : > { %5539 = vst [vmem:[#allocation28_spill] sm:$0xff] %v4291_v28 }
 0x154   : > { %948 = vmatprep.mubr.f32.mxu0 %v4280_v26 }
 0x155   : > { %949 = vmatmul.mubr.f32.vlgmr.msra.gmra.mxu0 %v4283_v27 }
 0x156   : > { %1722 = vmatpush1.msra.mxu0 %v4249_v5  ;;  %1757 = vmatprep.mubr.f32.mxu0 %v5467_v0 }
 0x157   : > { %1723 = vmatprep.subr.mxu0 %v4253_v7 }
 0x158   : > { %1724 = vmatpush1.msra.mxu0 %v4258_v9 }
 0x159   : > { %3301 = vmatmul.mubr.msk.f32.vlgmr.msra.gmra.mxu0 %vm664_vm0, %v1673_v63 }
 0x15a   : > { %1763 = vmatprep.mubr.f32.mxu0 %v5467_v0 }
 0x15d   : > { %3302 = vmatmul.mubr.msk.f32.gmra.mxu0 %vm664_vm0, %v1674_v21 }
 0x18e   : > { %999 = vxpose.xlu1.b32.start.end [1/1] (short) %v4291_v28, 128 }
 0x1ac   : > { %3434 = vset.pattern.permute.xlu1 %v3930_v1 }
 0x1cd   : > { %v983_v29 = vpop.trf.xlu1 }
 0x1d1   : > { %v984_v30 = vpop.trf.xlu1 }
 0x1d5   : > { %v985_v31 = vpop.trf.xlu1 }
 0x1d9   : > { %v986_v32 = vpop.trf.xlu1 }
 0x1dd   : > { %v987_v33 = vpop.trf.xlu1 }
 0x1e1   : > { %v988_v34 = vpop.trf.xlu1 }
 0x1e5   : > { %v989_v5 = vpop.trf.xlu1 }
 0x1e9   : > { %v990_v35 = vpop.trf.xlu1 }
 0x1ed   : > { %v991_v36 = vpop.trf.xlu1 }
 0x1f1   : > { %v992_v37 = vpop.trf.xlu1 }
 0x1f5   : > { %v993_v38 = vpop.trf.xlu1 }
 0x1f9   : > { %v994_v1 = vpop.trf.xlu1 }
 0x1fd   : > { %v995_v39 = vpop.trf.xlu1 }
 0x201   : > { %v996_v40 = vpop.trf.xlu1 }
 0x205   : > { %v997_v41 = vpop.trf.xlu1 }
 0x209   : > { %v998_v42 = vpop.trf.xlu1 }
 0x20d   : > { %v1015_v43 = vpop.trf.xlu1 }
 0x211   : > { %v1016_v44 = vpop.trf.xlu1 }
 0x215   : > { %v950_v7 = vpop.f32.mrf.mxu0  ;;  %v1017_v45 = vpop.trf.xlu1 }
 0x217   : > { %v952_v9 = vpop.f32.mrf.mxu0 }
 0x218   : > { %1158 = vmatprep.subr.mxu1 %v952_v9  ;;  %v1676_v9 = vld [vmem:[%s5442_s13 + $0x8] sm:$0xff] }
 0x219   : > { %1159 = vmatpush1.msra.mxu1 %v950_v7  ;;  %v1018_v46 = vpop.trf.xlu1 }
 0x21a   : > { %3269 = vmatmul.mubr.msk.f32.vlgmr.msra.gmra.mxu1 %vm1031_vm1, %v983_v29 }
 0x21b   : > { %1198 = vmatprep.mubr.f32.mxu1 %v5467_v0 }
 0x21d   : > { %v1019_v47 = vpop.trf.xlu1 }
 0x21e   : > { %3270 = vmatmul.mubr.msk.f32.gmra.mxu1 %vm1031_vm1, %v984_v30 }
 0x21f   : > { %1204 = vmatprep.mubr.f32.mxu1 %v5467_v0 }
 0x221   : > { %v1020_v48 = vpop.trf.xlu1 }
 0x222   : > { %3271 = vmatmul.mubr.msk.f32.gmra.mxu1 %vm1031_vm1, %v985_v31 }
 0x223   : > { %1210 = vmatprep.mubr.f32.mxu1 %v5467_v0 }
 0x225   : > { %v1021_v49 = vpop.trf.xlu1 }
 0x226   : > { %3272 = vmatmul.mubr.msk.f32.gmra.mxu1 %vm1031_vm1, %v986_v32 }
 0x227   : > { %1216 = vmatprep.mubr.f32.mxu1 %v5467_v0 }
 0x229   : > { %v1022_v50 = vpop.trf.xlu1 }
 0x22a   : > { %3273 = vmatmul.mubr.msk.f32.gmra.mxu1 %vm1031_vm1, %v987_v33 }
 0x22b   : > { %1222 = vmatprep.mubr.f32.mxu1 %v5467_v0 }
 0x22d   : > { %v1023_v51 = vpop.trf.xlu1 }
 0x22e   : > { %3274 = vmatmul.mubr.msk.f32.gmra.mxu1 %vm1031_vm1, %v988_v34 }
 0x22f   : > { %1228 = vmatprep.mubr.f32.mxu1 %v5467_v0 }
 0x231   : > { %v1024_v52 = vpop.trf.xlu1 }
 0x232   : > { %3275 = vmatmul.mubr.msk.f32.gmra.mxu1 %vm1031_vm1, %v989_v5 }
 0x233   : > { %1234 = vmatprep.mubr.f32.mxu1 %v5467_v0 }
 0x235   : > { %v1025_v53 = vpop.trf.xlu1 }
 0x236   : > { %3276 = vmatmul.mubr.msk.f32.gmra.mxu1 %vm1031_vm1, %v990_v35 }
 0x237   : > { %1240 = vmatprep.mubr.f32.mxu1 %v5467_v0 }
 0x239   : > { %v1026_v54 = vpop.trf.xlu1 }
 0x23a   : > { %3277 = vmatmul.mubr.msk.f32.gmra.mxu1 %vm1031_vm1, %v991_v36 }
 0x23b   : > { %1246 = vmatprep.mubr.f32.mxu1 %v5467_v0 }
 0x23d   : > { %v1027_v55 = vpop.trf.xlu1 }
 0x23e   : > { %3278 = vmatmul.mubr.msk.f32.gmra.mxu1 %vm1031_vm1, %v992_v37 }
 0x23f   : > { %1252 = vmatprep.mubr.f32.mxu1 %v5467_v0 }
 0x241   : > { %v1028_v56 = vpop.trf.xlu1 }
 0x242   : > { %3279 = vmatmul.mubr.msk.f32.gmra.mxu1 %vm1031_vm1, %v993_v38 }
 0x243   : > { %1258 = vmatprep.mubr.f32.mxu1 %v5467_v0 }
 0x245   : > { %v1029_v57 = vpop.trf.xlu1 }
 0x246   : > { %3280 = vmatmul.mubr.msk.f32.gmra.mxu1 %vm1031_vm1, %v994_v1 }
 0x247   : > { %1264 = vmatprep.mubr.f32.mxu1 %v5467_v0 }
 0x249   : > { %v1030_v58 = vpop.trf.xlu1 }
 0x24a   : > { %3281 = vmatmul.mubr.msk.f32.gmra.mxu1 %vm1031_vm1, %v995_v39 }
 0x24b   : > { %1270 = vmatprep.mubr.f32.mxu1 %v5467_v0 }
 0x24e   : > { %3282 = vmatmul.mubr.msk.f32.gmra.mxu1 %vm1031_vm1, %v996_v40 }
 0x24f   : > { %1276 = vmatprep.mubr.f32.mxu1 %v5467_v0 }
 0x252   : > { %3283 = vmatmul.mubr.msk.f32.gmra.mxu1 %vm1031_vm1, %v997_v41 }
 0x253   : > { %1282 = vmatprep.mubr.f32.mxu1 %v5467_v0 }
 0x256   : > { %3284 = vmatmul.mubr.msk.f32.gmra.mxu1 %vm1031_vm1, %v998_v42 }
 0x257   : > { %1288 = vmatprep.mubr.f32.mxu1 %v5467_v0 }
 0x25a   : > { %3285 = vmatmul.mubr.msk.f32.gmra.mxu1 %vm1031_vm1, %v1015_v43 }
 0x25b   : > { %1294 = vmatprep.mubr.f32.mxu1 %v5467_v0 }
 0x25e   : > { %3286 = vmatmul.mubr.msk.f32.gmra.mxu1 %vm1031_vm1, %v1016_v44 }
 0x25f   : > { %1300 = vmatprep.mubr.f32.mxu1 %v5467_v0 }
 0x262   : > { %3287 = vmatmul.mubr.msk.f32.gmra.mxu1 %vm1031_vm1, %v1017_v45 }
 0x263   : > { %1306 = vmatprep.mubr.f32.mxu1 %v5467_v0 }
 0x266   : > { %3288 = vmatmul.mubr.msk.f32.gmra.mxu1 %vm1031_vm1, %v1018_v46 }
 0x267   : > { %1312 = vmatprep.mubr.f32.mxu1 %v5467_v0 }
 0x26a   : > { %3289 = vmatmul.mubr.msk.f32.gmra.mxu1 %vm1031_vm1, %v1019_v47 }
 0x26b   : > { %1318 = vmatprep.mubr.f32.mxu1 %v5467_v0 }
 0x26e   : > { %3290 = vmatmul.mubr.msk.f32.gmra.mxu1 %vm1031_vm1, %v1020_v48 }
 0x26f   : > { %1324 = vmatprep.mubr.f32.mxu1 %v5467_v0 }
 0x272   : > { %3291 = vmatmul.mubr.msk.f32.gmra.mxu1 %vm1031_vm1, %v1021_v49 }
 0x273   : > { %1330 = vmatprep.mubr.f32.mxu1 %v5467_v0 }
 0x276   : > { %3292 = vmatmul.mubr.msk.f32.gmra.mxu1 %vm1031_vm1, %v1022_v50 }
 0x277   : > { %1336 = vmatprep.mubr.f32.mxu1 %v5467_v0 }
 0x27a   : > { %3293 = vmatmul.mubr.msk.f32.gmra.mxu1 %vm1031_vm1, %v1023_v51 }
 0x27b   : > { %1342 = vmatprep.mubr.f32.mxu1 %v5467_v0 }
 0x27e   : > { %3294 = vmatmul.mubr.msk.f32.gmra.mxu1 %vm1031_vm1, %v1024_v52 }
 0x27f   : > { %1348 = vmatprep.mubr.f32.mxu1 %v5467_v0 }
 0x282   : > { %3295 = vmatmul.mubr.msk.f32.gmra.mxu1 %vm1031_vm1, %v1025_v53 }
 0x283   : > { %1354 = vmatprep.mubr.f32.mxu1 %v5467_v0 }
 0x286   : > { %3296 = vmatmul.mubr.msk.f32.gmra.mxu1 %vm1031_vm1, %v1026_v54 }
 0x287   : > { %1360 = vmatprep.mubr.f32.mxu1 %v5467_v0 }
 0x28a   : > { %3297 = vmatmul.mubr.msk.f32.gmra.mxu1 %vm1031_vm1, %v1027_v55 }
 0x28b   : > { %1366 = vmatprep.mubr.f32.mxu1 %v5467_v0 }
 0x28e   : > { %3298 = vmatmul.mubr.msk.f32.gmra.mxu1 %vm1031_vm1, %v1028_v56 }
 0x28f   : > { %1372 = vmatprep.mubr.f32.mxu1 %v5467_v0 }
 0x292   : > { %3299 = vmatmul.mubr.msk.f32.gmra.mxu1 %vm1031_vm1, %v1029_v57 }
 0x293   : > { %1378 = vmatprep.mubr.f32.mxu1 %v5467_v0 }
 0x296   : > { %3300 = vmatmul.mubr.msk.f32.gmra.mxu1 %vm1031_vm1, %v1030_v58 }
 0x2da   : > { %v4358_v59 = vpop.f32.mrf.mxu1 }
 0x2dc   : > { %v4360_v60 = vpop.f32.mrf.mxu1 }
 0x2de   : > { %v4362_v61 = vpop.f32.mrf.mxu1 }
 0x2e0   : > { %v4364_v62 = vpop.f32.mrf.mxu1 }
 0x2e2   : > { %v4369_v2 = vpop.f32.mrf.mxu1 }
 0x2e4   : > { %v4373_v4 = vpop.f32.mrf.mxu1 }
 0x2e6   : > { %v4375_v6 = vpop.f32.mrf.mxu1 }
 0x2e8   : > { %v4377_v8 = vpop.f32.mrf.mxu1 }
 0x2ea   : > { %v4379_v10 = vpop.f32.mrf.mxu1 }
 0x2eb   : > { %v4549_v0 = vadd.f32 %v4379_v10, %v4405_v23  ;;  %v4563_v10 = vadd.f32 %v4373_v4, %v4409_v25  ;;  %v4579_v4 = vadd.f32 %v4362_v61, %v4405_v23 }
 0x2ec   : > { %v4381_v12 = vpop.f32.mrf.mxu1 }
 0x2ed   : > { %5544 = vst [vmem:[#allocation33_spill] sm:$0xff] %v4549_v0  ;;  %5547 = vst [vmem:[#allocation36_spill] sm:$0xff] %v4563_v10 }
 0x2ee   : > { %v4383_v13 = vpop.f32.mrf.mxu1  ;;  %5550 = vst [vmem:[#allocation39_spill] sm:$0xff] %v4579_v4 }
 0x2f0   : > { %v4387_v15 = vpop.f32.mrf.mxu1 }
 0x2f2   : > { %v4389_v16 = vpop.f32.mrf.mxu1 }
 0x2f4   : > { %v4398_v20 = vpop.f32.mrf.mxu1 }
 0x2f6   : > { %v1236_v22 = vpop.f32.mrf.mxu1 }
 0x2f7   : > { %v4412_v29 = vadd.f32 %v1236_v22, %v4405_v23 }
 0x2f8   : > { %v1238_v3 = vpop.f32.mrf.mxu1 }
 0x2f9   : > { %v4415_v30 = vadd.f32 %v1238_v3, %v4409_v25 }
 0x2fa   : > { %v1242_v31 = vpop.f32.mrf.mxu1 }
 0x2fb   : > { %v1406_v32 = vmax.f32 %v4412_v29, %v4415_v30 }
 0x2fc   : > { %v1244_v33 = vpop.f32.mrf.mxu1 }
 0x2fd   : > { %1407 = vmax.xlane.f32.xlu1 %v1406_v32 }
 0x2fe   : > { %v1248_v34 = vpop.f32.mrf.mxu1 }
 0x300   : > { %v1250_v5 = vpop.f32.mrf.mxu1 }
 0x302   : > { %v1254_v35 = vpop.f32.mrf.mxu1 }
 0x304   : > { %v1256_v36 = vpop.f32.mrf.mxu1 }
 0x306   : > { %v1260_v37 = vpop.f32.mrf.mxu1 }
 0x308   : > { %v1262_v7 = vpop.f32.mrf.mxu1 }
 0x309   : > { %v4467_v22 = vadd.f32 %v1262_v7, %v4409_v25  ;;  %v4486_v7 = vadd.f32 %v1254_v35, %v4405_v23  ;;  %v4503_v35 = vadd.f32 %v1244_v33, %v4409_v25 }
 0x30a   : > { %v1266_v38 = vpop.f32.mrf.mxu1 }
 0x30b   : > { %v4462_v19 = vadd.f32 %v1266_v38, %v4405_v23  ;;  %v4479_v38 = vadd.f32 %v1256_v36, %v4409_v25  ;;  %v4498_v36 = vadd.f32 %v1248_v34, %v4405_v23  ;;  %v4516_v34 = vadd.f32 %v4398_v20, %v4409_v25 }
 0x30c   : > { %v1268_v1 = vpop.f32.mrf.mxu1 }
 0x30d   : > { %v4455_v58 = vadd.f32 %v1268_v1, %v4409_v25 }
 0x30e   : > { %1684 = vperm.xlu1 %3434, %v1676_v9   ;;  %v1272_v39 = vpop.f32.mrf.mxu1  ;;  %v4474_v9 = vadd.f32 %v1260_v37, %v4405_v23  ;;  %v4491_v37 = vadd.f32 %v1250_v5, %v4409_v25  ;;  %v4510_v5 = vadd.f32 %v1242_v31, %v4405_v23 }
 0x30f   : > { %v4450_v56 = vadd.f32 %v1272_v39, %v4405_v23  ;;  %v1421_v3 = vmax.f32 %v4462_v19, %v4455_v58 }
 0x310   : > { %v1274_v40 = vpop.f32.mrf.mxu1  ;;  %v1418_v39 = vmax.f32 %v4474_v9, %v4467_v22  ;;  %v1409_v33 = vmax.f32 %v4510_v5, %v4503_v35 }
 0x311   : > { %v4443_v53 = vadd.f32 %v1274_v40, %v4409_v25 }
 0x312   : > { %v1278_v41 = vpop.f32.mrf.mxu1 }
 0x313   : > { %v4438_v51 = vadd.f32 %v1278_v41, %v4405_v23  ;;  %v1424_v63 = vmax.f32 %v4450_v56, %v4443_v53 }
 0x314   : > { %v1280_v42 = vpop.f32.mrf.mxu1 }
 0x315   : > { %v4431_v48 = vadd.f32 %v1280_v42, %v4409_v25  ;;  %v1415_v42 = vmax.f32 %v4486_v7, %v4479_v38 }
 0x316   : > { %v1284_v43 = vpop.f32.mrf.mxu1 }
 0x317   : > { %v4423_v45 = vadd.f32 %v1284_v43, %v4405_v23  ;;  %v1427_v54 = vmax.f32 %v4438_v51, %v4431_v48 }
 0x318   : > { %v1286_v44 = vpop.f32.mrf.mxu1 }
 0x319   : > { %v4426_v46 = vadd.f32 %v1286_v44, %v4409_v25 }
 0x31a   : > { %v4428_v47 = vpop.f32.mrf.mxu1 }
 0x31b   : > { %v1430_v49 = vmax.f32 %v4423_v45, %v4426_v46 }
 0x31c   : > { %v4435_v50 = vpop.f32.mrf.mxu1 }
 0x31d   : > { %1431 = vmax.xlane.f32.xlu0 %v1430_v49  ;;  %v1412_v49 = vmax.f32 %v4498_v36, %v4491_v37 }
 0x31e   : > { %v4440_v52 = vpop.f32.mrf.mxu1 }
 0x320   : > { %v4447_v55 = vpop.f32.mrf.mxu1 }
 0x321   : > { %1428 = vmax.xlane.f32.xlu0 %v1427_v54 }
 0x322   : > { %v4452_v57 = vpop.f32.mrf.mxu1 }
 0x324   : > { %v4459_v11 = vpop.f32.mrf.mxu1 }
 0x325   : > { %1425 = vmax.xlane.f32.xlu0 %v1424_v63 }
 0x326   : > { %v4464_v21 = vpop.f32.mrf.mxu1 }
 0x328   : > { %v4471_v32 = vpop.f32.mrf.mxu1 }
 0x329   : > { %1422 = vmax.xlane.f32.xlu0 %v1421_v3 }
 0x32a   : > { %v4476_v1 = vpop.f32.mrf.mxu1 }
 0x32c   : > { %v4483_v40 = vpop.f32.mrf.mxu1 }
 0x32d   : > { %1419 = vmax.xlane.f32.xlu0 %v1418_v39  ;;  %v4525_v39 = vadd.f32 %v4389_v16, %v4405_v23  ;;  %v4543_v16 = vadd.f32 %v4381_v12, %v4409_v25  ;;  %v4559_v12 = vadd.f32 %v4375_v6, %v4405_v23  ;;  %v4573_v6 = vadd.f32 %v4364_v62, %v4409_v25 }
 0x32e   : > { %v4488_v41 = vpop.f32.mrf.mxu1  ;;  %v4589_v62 = vadd.f32 %v4358_v59, %v4405_v23 }
 0x32f   : > { %v1403_v20 = vmax.f32 %v4525_v39, %v4516_v34  ;;  %5543 = vst [vmem:[#allocation32_spill] sm:$0xff] %v4543_v16  ;;  %5546 = vst [vmem:[#allocation35_spill] sm:$0xff] %v4559_v12 }
 0x330   : > { %v4495_v43 = vpop.f32.mrf.mxu1  ;;  %5549 = vst [vmem:[#allocation38_spill] sm:$0xff] %v4573_v6  ;;  %5551 = vst [vmem:[#allocation40_spill] sm:$0xff] %v4589_v62 }
 0x331   : > { %1416 = vmax.xlane.f32.xlu0 %v1415_v42  ;;  %v4531_v42 = vadd.f32 %v4387_v15, %v4409_v25 }
 0x332   : > { %v4500_v44 = vpop.f32.mrf.mxu1 }
 0x334   : > { %v4507_v54 = vpop.f32.mrf.mxu1 }
 0x335   : > { %1413 = vmax.xlane.f32.xlu0 %v1412_v49  ;;  %v4539_v49 = vadd.f32 %v4383_v13, %v4405_v23  ;;  %v4553_v13 = vadd.f32 %v4377_v8, %v4409_v25  ;;  %v4569_v8 = vadd.f32 %v4369_v2, %v4405_v23  ;;  %v4583_v2 = vadd.f32 %v4360_v60, %v4409_v25 }
 0x336   : > { %v4512_v63 = vpop.f32.mrf.mxu1 }
 0x337   : > { %2123 = vxpose.xlu1.b32.start.end [1/1] (short) %v4280_v26, 128  ;;  %5542 = vst [vmem:[#allocation31_spill] sm:$0xff] %v4539_v49  ;;  %5545 = vst [vmem:[#allocation34_spill] sm:$0xff] %v4553_v13  ;;  %v1385_v61 = vmax.f32 %v4589_v62, %v4583_v2 }
 0x338   : > { %v4521_v3 = vpop.f32.mrf.mxu1  ;;  %5548 = vst [vmem:[#allocation37_spill] sm:$0xff] %v4569_v8 }
 0x339   : > { %1410 = vmax.xlane.f32.xlu0 %v1409_v33  ;;  %v1400_v33 = vmax.f32 %v4539_v49, %v4531_v42 }
 0x33a   : > { %v4527_v31 = vpop.f32.mrf.mxu1 }
 0x33c   : > { %v4535_v26 = vpop.f32.mrf.mxu1 }
 0x33d   : > { %1404 = vmax.xlane.f32.xlu0 %v1403_v20  ;;  %v1397_v20 = vmax.f32 %v4549_v0, %v4543_v16 }
 0x33e   : > { %v1344_v18 = vpop.f32.mrf.mxu1 }
 0x340   : > { %v1346_v15 = vpop.f32.mrf.mxu1 }
 0x341   : > { %1401 = vmax.xlane.f32.xlu0 %v1400_v33  ;;  %v1394_v33 = vmax.f32 %v4559_v12, %v4553_v13 }
 0x342   : > { %v1350_v14 = vpop.f32.mrf.mxu1 }
 0x344   : > { %v1352_v17 = vpop.f32.mrf.mxu1 }
 0x345   : > { %1398 = vmax.xlane.f32.xlu0 %v1397_v20  ;;  %v1391_v20 = vmax.f32 %v4569_v8, %v4563_v10 }
 0x346   : > { %v1356_v24 = vpop.f32.mrf.mxu1 }
 0x348   : > { %v1358_v28 = vpop.f32.mrf.mxu1 }
 0x349   : > { %1395 = vmax.xlane.f32.xlu0 %v1394_v33  ;;  %v1388_v33 = vmax.f32 %v4579_v4, %v4573_v6 }
 0x34a   : > { %v1362_v0 = vpop.f32.mrf.mxu1 }
 0x34c   : > { %v1364_v16 = vpop.f32.mrf.mxu1 }
 0x34d   : > { %1392 = vmax.xlane.f32.xlu0 %v1391_v20 }
 0x34e   : > { %v1368_v12 = vpop.f32.mrf.mxu1 }
 0x350   : > { %v1370_v13 = vpop.f32.mrf.mxu1 }
 0x351   : > { %1389 = vmax.xlane.f32.xlu0 %v1388_v33  ;;  %v4608_v62 = vadd.f32 %v1370_v13, %v4409_v25  ;;  %v4624_v13 = vadd.f32 %v1358_v28, %v4409_v25  ;;  %v4640_v28 = vadd.f32 %v1346_v15, %v4409_v25  ;;  %v4659_v15 = vadd.f32 %v4521_v3, %v4409_v25 }
 0x352   : > { %v1374_v8 = vpop.f32.mrf.mxu1  ;;  %v4679_v3 = vadd.f32 %v4495_v43, %v4409_v25  ;;  %v4699_v43 = vadd.f32 %v4471_v32, %v4409_v25  ;;  %v4719_v32 = vadd.f32 %v4447_v55, %v4409_v25 }
 0x353   : > { %v4594_v20 = vadd.f32 %v1374_v8, %v4405_v23  ;;  %v4613_v8 = vadd.f32 %v1368_v12, %v4405_v23  ;;  %v4629_v12 = vadd.f32 %v1356_v24, %v4405_v23  ;;  %v4645_v24 = vadd.f32 %v1344_v18, %v4405_v23 }
 0x354   : > { %v1376_v10 = vpop.f32.mrf.mxu1  ;;  %5552 = vst [vmem:[#allocation41_spill] sm:$0xff] %v4719_v32 }
 0x355   : > { %v4597_v60 = vadd.f32 %v1376_v10, %v4409_v25  ;;  %1386 = vmax.xlane.f32.xlu0 %v1385_v61  ;;  %v4616_v61 = vadd.f32 %v1364_v16, %v4409_v25  ;;  %v4632_v16 = vadd.f32 %v1352_v17, %v4409_v25  ;;  %v4649_v17 = vadd.f32 %v4535_v26, %v4409_v25 }
 0x356   : > { %v1380_v49 = vpop.f32.mrf.mxu1  ;;  %v4669_v26 = vadd.f32 %v4507_v54, %v4409_v25  ;;  %v4689_v54 = vadd.f32 %v4483_v40, %v4409_v25  ;;  %v4709_v40 = vadd.f32 %v4459_v11, %v4409_v25  ;;  %v4729_v11 = vadd.f32 %v4435_v50, %v4409_v25 }
 0x357   : > { %v1475_v4 = vmax.f32 %v4594_v20, %v4597_v60  ;;  %v4602_v59 = vadd.f32 %v1380_v49, %v4405_v23  ;;  %v1472_v49 = vmax.f32 %v4613_v8, %v4608_v62 }
 0x358   : > { %v1382_v6 = vpop.f32.mrf.mxu1 }
 0x359   : > { %v4605_v33 = vadd.f32 %v1382_v6, %v4409_v25  ;;  %1476 = vmax.xlane.f32.xlu0 %v1475_v4  ;;  %v4621_v6 = vadd.f32 %v1362_v0, %v4405_v23  ;;  %v4637_v0 = vadd.f32 %v1350_v14, %v4405_v23  ;;  %v4655_v14 = vadd.f32 %v4527_v31, %v4405_v23  ;;  %v1675_v25 = vld [vmem:[%s5442_s13] sm:$0xff] }
 0x35b   : > { %v1478_v10 = vmax.f32 %v4602_v59, %v4605_v33  ;;  %v1469_v4 = vmax.f32 %v4621_v6, %v4616_v61  ;;  %v1457_v18 = vmax.f32 %v4655_v14, %v4649_v17 }
 0x35d   : > { %1479 = vmax.xlane.f32.xlu0 %v1478_v10  ;;  %v1466_v10 = vmax.f32 %v4629_v12, %v4624_v13 }
 0x361   : > { %1473 = vmax.xlane.f32.xlu0 %v1472_v49  ;;  %v1463_v49 = vmax.f32 %v4637_v0, %v4632_v16 }
 0x365   : > { %1470 = vmax.xlane.f32.xlu0 %v1469_v4  ;;  %v1460_v4 = vmax.f32 %v4645_v24, %v4640_v28 }
 0x369   : > { %1467 = vmax.xlane.f32.xlu0 %v1466_v10  ;;  %v4665_v10 = vadd.f32 %v4512_v63, %v4405_v23 }
 0x36b   : > { %v1454_v31 = vmax.f32 %v4665_v10, %v4659_v15 }
 0x36d   : > { %1464 = vmax.xlane.f32.xlu0 %v1463_v49  ;;  %v4675_v49 = vadd.f32 %v4500_v44, %v4405_v23 }
 0x36f   : > { %v1451_v63 = vmax.f32 %v4675_v49, %v4669_v26 }
 0x371   : > { %1461 = vmax.xlane.f32.xlu0 %v1460_v4  ;;  %v4685_v4 = vadd.f32 %v4488_v41, %v4405_v23 }
 0x373   : > { %v1448_v44 = vmax.f32 %v4685_v4, %v4679_v3 }
 0x375   : > { %1458 = vmax.xlane.f32.xlu0 %v1457_v18  ;;  %v4695_v18 = vadd.f32 %v4476_v1, %v4405_v23 }
 0x377   : > { %v1445_v41 = vmax.f32 %v4695_v18, %v4689_v54 }
 0x379   : > { %1455 = vmax.xlane.f32.xlu0 %v1454_v31  ;;  %v4705_v31 = vadd.f32 %v4464_v21, %v4405_v23 }
 0x37b   : > { %v1442_v1 = vmax.f32 %v4705_v31, %v4699_v43 }
 0x37d   : > { %1452 = vmax.xlane.f32.xlu0 %v1451_v63  ;;  %v4715_v63 = vadd.f32 %v4452_v57, %v4405_v23 }
 0x37f   : > { %v1439_v21 = vmax.f32 %v4715_v63, %v4709_v40 }
 0x381   : > { %1449 = vmax.xlane.f32.xlu0 %v1448_v44  ;;  %v4725_v44 = vadd.f32 %v4440_v52, %v4405_v23 }
 0x383   : > { %5553 = vst [vmem:[#allocation42_spill] sm:$0xff] %v4725_v44  ;;  %v1436_v57 = vmax.f32 %v4725_v44, %v4719_v32 }
 0x385   : > { %1446 = vmax.xlane.f32.xlu0 %v1445_v41  ;;  %v4735_v41 = vadd.f32 %v4428_v47, %v4405_v23 }
 0x387   : > { %5554 = vst [vmem:[#allocation43_spill] sm:$0xff] %v4735_v41  ;;  %v1433_v55 = vmax.f32 %v4735_v41, %v4729_v11 }
 0x389   : > { %1443 = vmax.xlane.f32.xlu0 %v1442_v1 }
 0x38d   : > { %1440 = vmax.xlane.f32.xlu0 %v1439_v21 }
 0x391   : > { %1437 = vmax.xlane.f32.xlu0 %v1436_v57 }
 0x395   : > { %1434 = vmax.xlane.f32.xlu0 %v1433_v55 }
 0x3a6   : > { %v1432_v1 = vpop.xlane.xlu0 %1431 }
 0x3a7   : > { %v1511_v52 = vsub.f32 %v4423_v45, %v1432_v1  ;;  %v1512_v21 = vsub.f32 %v4426_v46, %v1432_v1 }
 0x3a9   : > { %v1605_v50 = vmul.f32 1.442695, %v1511_v52  ;;  %v1607_v44 = vmul.f32 1.442695, %v1512_v21 }
 0x3aa   : > { %v1429_v32 = vpop.xlane.xlu0 %1428 }
 0x3ab   : > { %3435 = vpow2.f32 %v1605_v50  ;;  %v1509_v23 = vsub.f32 %v4438_v51, %v1429_v32  ;;  %v1510_v47 = vsub.f32 %v4431_v48, %v1429_v32  ;;  %1679 = vperm.xlu0 %3433, %v1675_v25  }
 0x3ac   : > { %3437 = vpow2.f32 %v1607_v44 }
 0x3ad   : > { %v1601_v57 = vmul.f32 1.442695, %v1509_v23  ;;  %v1603_v55 = vmul.f32 1.442695, %v1510_v47 }
 0x3ae   : > { %v1426_v41 = vpop.xlane.xlu0 %1425 }
 0x3af   : > { %3439 = vpow2.f32 %v1601_v57  ;;  %v1507_v45 = vsub.f32 %v4450_v56, %v1426_v41  ;;  %v1508_v46 = vsub.f32 %v4443_v53, %v1426_v41  ;;  %v5487_v53 = vmov 1.0  }
 0x3b0   : > { %3441 = vpow2.f32 %v1603_v55  ;;  %1911 = vmatprep.mubr.f32.mxu0 %v5487_v53 }
 0x3b1   : > { %v1597_v1 = vmul.f32 1.442695, %v1507_v45  ;;  %v1599_v52 = vmul.f32 1.442695, %v1508_v46 }
 0x3b2   : > { %v1423_v21 = vpop.xlane.xlu0 %1422 }
 0x3b3   : > { %3443 = vpow2.f32 %v1597_v1  ;;  %v1505_v50 = vsub.f32 %v4462_v19, %v1423_v21  ;;  %v1506_v51 = vsub.f32 %v4455_v58, %v1423_v21 }
 0x3b4   : > { %3445 = vpow2.f32 %v1599_v52  ;;  %v1408_v52 = vpop.xlane.xlu1 %1407 }
 0x3b5   : > { %v1593_v48 = vmul.f32 1.442695, %v1505_v50  ;;  %v1595_v32 = vmul.f32 1.442695, %v1506_v51 }
 0x3b6   : > { %v1420_v44 = vpop.xlane.xlu0 %1419 }
 0x3b7   : > { %3447 = vpow2.f32 %v1593_v48  ;;  %v1503_v25 = vsub.f32 %v4474_v9, %v1420_v44  ;;  %v1504_v56 = vsub.f32 %v4467_v22, %v1420_v44 }
 0x3b8   : > { %v3436_v23 = vpop.eup %3435  ;;  %3449 = vpow2.f32 %v1595_v32  ;;  %v1496_v32 = vsub.f32 %v4415_v30, %v1408_v52 }
 0x3b9   : > { %v3438_v41 = vpop.eup %3437  ;;  %v1589_v47 = vmul.f32 1.442695, %v1503_v25  ;;  %v1591_v57 = vmul.f32 1.442695, %v1504_v56 }
 0x3ba   : > { %1770 = vmatprep.subr.mxu1 %v3438_v41  ;;  %1847 = vmatprep.subr.mxu0 %v3438_v41  ;;  %v1417_v58 = vpop.xlane.xlu0 %1416 }
 0x3bb   : > { %3451 = vpow2.f32 %v1589_v47  ;;  %1771 = vmatpush1.xpose.msra.mxu1 %v3436_v23  ;;  %1848 = vmatpush1.xpose.msra.mxu0 %v3436_v23  ;;  %v1501_v19 = vsub.f32 %v4486_v7, %v1417_v58  ;;  %v1502_v9 = vsub.f32 %v4479_v38, %v1417_v58  ;;  %v1495_v23 = vsub.f32 %v4412_v29, %v1408_v52 }
 0x3bc   : > { %v3440_v55 = vpop.eup %3439  ;;  %3453 = vpow2.f32 %v1591_v57  ;;  %v1575_v57 = vmul.f32 1.442695, %v1496_v32 }
 0x3bd   : > { %v3442_v22 = vpop.eup %3441  ;;  %v1585_v45 = vmul.f32 1.442695, %v1501_v19  ;;  %v1587_v46 = vmul.f32 1.442695, %v1502_v9 }
 0x3be   : > { %1772 = vmatprep.subr.mxu1 %v3442_v22  ;;  %1849 = vmatprep.subr.mxu0 %v3442_v22  ;;  %v1414_v1 = vpop.xlane.xlu0 %1413 }
 0x3bf   : > { %3455 = vpow2.f32 %v1585_v45  ;;  %1773 = vmatpush1.xpose.msra.mxu1 %v3440_v55  ;;  %1850 = vmatpush1.xpose.msra.mxu0 %v3440_v55  ;;  %v1499_v21 = vsub.f32 %v4498_v36, %v1414_v1  ;;  %v1500_v50 = vsub.f32 %v4491_v37, %v1414_v1  ;;  %v5555_v1 = vld [vmem:[#allocation31_spill] sm:$0xff] }
 0x3c0   : > { %v3444_v51 = vpop.eup %3443  ;;  %3457 = vpow2.f32 %v1587_v46 }
 0x3c1   : > { %v3446_v7 = vpop.eup %3445  ;;  %v1581_v38 = vmul.f32 1.442695, %v1499_v21  ;;  %v1583_v48 = vmul.f32 1.442695, %v1500_v50 }
 0x3c2   : > { %1774 = vmatprep.subr.mxu1 %v3446_v7  ;;  %1851 = vmatprep.subr.mxu0 %v3446_v7  ;;  %v1411_v44 = vpop.xlane.xlu0 %1410 }
 0x3c3   : > { %3459 = vpow2.f32 %v1581_v38  ;;  %1775 = vmatpush1.xpose.msra.mxu1 %v3444_v51  ;;  %1852 = vmatpush1.xpose.msra.mxu0 %v3444_v51  ;;  %v1497_v25 = vsub.f32 %v4510_v5, %v1411_v44  ;;  %v1498_v56 = vsub.f32 %v4503_v35, %v1411_v44  ;;  %v1573_v35 = vmul.f32 1.442695, %v1495_v23 }
 0x3c4   : > { %v3448_v36 = vpop.eup %3447  ;;  %3461 = vpow2.f32 %v1583_v48 }
 0x3c5   : > { %v3450_v37 = vpop.eup %3449  ;;  %v1577_v41 = vmul.f32 1.442695, %v1497_v25  ;;  %v1579_v47 = vmul.f32 1.442695, %v1498_v56  ;;  %v5558_v25 = vld [vmem:[#allocation34_spill] sm:$0xff] }
 0x3c6   : > { %1776 = vmatprep.subr.mxu1 %v3450_v37  ;;  %1853 = vmatprep.subr.mxu0 %v3450_v37  ;;  %v1405_v30 = vpop.xlane.xlu0 %1404 }
 0x3c7   : > { %3463 = vpow2.f32 %v1577_v41  ;;  %1777 = vmatpush1.xpose.msra.mxu1 %v3448_v36  ;;  %1854 = vmatpush1.xpose.msra.mxu0 %v3448_v36  ;;  %v1494_v58 = vsub.f32 %v4516_v34, %v1405_v30  ;;  %v1493_v9 = vsub.f32 %v4525_v39, %v1405_v30  ;;  %v5556_v39 = vld [vmem:[#allocation32_spill] sm:$0xff]  ;;  %v5559_v41 = vld [vmem:[#allocation35_spill] sm:$0xff] }
 0x3c8   : > { %v3452_v19 = vpop.eup %3451  ;;  %3465 = vpow2.f32 %v1579_v47 }
 0x3c9   : > { %v3454_v5 = vpop.eup %3453  ;;  %2091 = vxpose.xlu0.b32.start.end [1/1] (short) %v4283_v27, 128  ;;  %3467 = vpow2.f32 %v1575_v57  ;;  %v1571_v29 = vmul.f32 1.442695, %v1494_v58  ;;  %v1569_v34 = vmul.f32 1.442695, %v1493_v9  ;;  %v5561_v9 = vld [vmem:[#allocation37_spill] sm:$0xff] }
 0x3ca   : > { %1778 = vmatprep.subr.mxu1 %v3454_v5  ;;  %1855 = vmatprep.subr.mxu0 %v3454_v5  ;;  %v1402_v55 = vpop.xlane.xlu0 %1401  ;;  %3469 = vpow2.f32 %v1573_v35 }
 0x3cb   : > { %1779 = vmatpush1.xpose.msra.mxu1 %v3452_v19  ;;  %1856 = vmatpush1.xpose.msra.mxu0 %v3452_v19  ;;  %v1492_v22 = vsub.f32 %v4531_v42, %v1402_v55  ;;  %v1491_v52 = vsub.f32 %v5555_v1, %v1402_v55  ;;  %3471 = vpow2.f32 %v1571_v29  ;;  %v5557_v42 = vld [vmem:[#allocation33_spill] sm:$0xff]  ;;  %v5560_v19 = vld [vmem:[#allocation36_spill] sm:$0xff] }
 0x3cc   : > { %v3456_v45 = vpop.eup %3455  ;;  %3473 = vpow2.f32 %v1569_v34  ;;  %v5562_v34 = vld [vmem:[#allocation38_spill] sm:$0xff] }
 0x3cd   : > { %v3458_v46 = vpop.eup %3457  ;;  %v1567_v21 = vmul.f32 1.442695, %v1492_v22  ;;  %v1565_v38 = vmul.f32 1.442695, %v1491_v52 }
 0x3ce   : > { %1780 = vmatprep.subr.mxu1 %v3458_v46  ;;  %1857 = vmatprep.subr.mxu0 %v3458_v46  ;;  %v1399_v27 = vpop.xlane.xlu0 %1398 }
 0x3cf   : > { %1781 = vmatpush1.xpose.msra.mxu1 %v3456_v45  ;;  %1858 = vmatpush1.xpose.msra.mxu0 %v3456_v45  ;;  %v1490_v50 = vsub.f32 %v5556_v39, %v1399_v27  ;;  %v1489_v48 = vsub.f32 %v5557_v42, %v1399_v27  ;;  %3475 = vpow2.f32 %v1567_v21  ;;  %v5563_v21 = vld [vmem:[#allocation39_spill] sm:$0xff] }
 0x3d0   : > { %v3460_v51 = vpop.eup %3459  ;;  %3477 = vpow2.f32 %v1565_v38 }
 0x3d1   : > { %v3462_v7 = vpop.eup %3461  ;;  %v1563_v32 = vmul.f32 1.442695, %v1490_v50  ;;  %v1561_v23 = vmul.f32 1.442695, %v1489_v48  ;;  %v5564_v48 = vld [vmem:[#allocation40_spill] sm:$0xff] }
 0x3d2   : > { %1782 = vmatprep.subr.mxu1 %v3462_v7  ;;  %1859 = vmatprep.subr.mxu0 %v3462_v7  ;;  %v1396_v44 = vpop.xlane.xlu0 %1395 }
 0x3d3   : > { %1783 = vmatpush1.xpose.msra.mxu1 %v3460_v51  ;;  %1860 = vmatpush1.xpose.msra.mxu0 %v3460_v51  ;;  %v1488_v56 = vsub.f32 %v5558_v25, %v1396_v44  ;;  %v1487_v47 = vsub.f32 %v5559_v41, %v1396_v44  ;;  %3479 = vpow2.f32 %v1563_v32 }
 0x3d4   : > { %v3464_v36 = vpop.eup %3463  ;;  %3481 = vpow2.f32 %v1561_v23 }
 0x3d5   : > { %v3466_v37 = vpop.eup %3465  ;;  %v1559_v57 = vmul.f32 1.442695, %v1488_v56  ;;  %v1557_v35 = vmul.f32 1.442695, %v1487_v47 }
 0x3d6   : > { %1784 = vmatprep.subr.mxu1 %v3466_v37  ;;  %1861 = vmatprep.subr.mxu0 %v3466_v37  ;;  %v1393_v30 = vpop.xlane.xlu0 %1392  ;;  %v3468_v58 = vpop.eup %3467 }
 0x3d7   : > { %1785 = vmatpush1.xpose.msra.mxu1 %v3464_v36  ;;  %1862 = vmatpush1.xpose.msra.mxu0 %v3464_v36  ;;  %v1486_v5 = vsub.f32 %v5560_v19, %v1393_v30  ;;  %v1485_v29 = vsub.f32 %v5561_v9, %v1393_v30  ;;  %v3470_v55 = vpop.eup %3469  ;;  %3483 = vpow2.f32 %v1559_v57 }
 0x3d8   : > { %1786 = vmatprep.subr.mxu1 %v3468_v58  ;;  %1863 = vmatprep.subr.mxu0 %v3468_v58  ;;  %v3472_v46 = vpop.eup %3471  ;;  %3485 = vpow2.f32 %v1557_v35 }
 0x3d9   : > { %v1555_v22 = vmul.f32 1.442695, %v1486_v5  ;;  %v1553_v52 = vmul.f32 1.442695, %v1485_v29  ;;  %v3474_v39 = vpop.eup %3473 }
 0x3da   : > { %v1390_v45 = vpop.xlane.xlu0 %1389 }
 0x3db   : > { %v1484_v1 = vsub.f32 %v5562_v34, %v1390_v45  ;;  %1787 = vmatpush1.xpose.msra.mxu1 %v3470_v55  ;;  %1864 = vmatpush1.xpose.msra.mxu0 %v3470_v55  ;;  %v1483_v27 = vsub.f32 %v5563_v21, %v1390_v45  ;;  %3487 = vpow2.f32 %v1555_v22 }
 0x3dc   : > { %1788 = vmatprep.subr.mxu1 %v3472_v46  ;;  %1865 = vmatprep.subr.mxu0 %v3472_v46  ;;  %v3476_v7 = vpop.eup %3475  ;;  %3489 = vpow2.f32 %v1553_v52 }
 0x3dd   : > { %v1551_v50 = vmul.f32 1.442695, %v1484_v1  ;;  %v1549_v42 = vmul.f32 1.442695, %v1483_v27  ;;  %v3478_v44 = vpop.eup %3477 }
 0x3de   : > { %v1387_v51 = vpop.xlane.xlu0 %1386 }
 0x3df   : > { %v1482_v38 = vsub.f32 %v4583_v2, %v1387_v51  ;;  %1789 = vmatpush1.xpose.msra.mxu1 %v3474_v39  ;;  %1866 = vmatpush1.xpose.msra.mxu0 %v3474_v39  ;;  %v1481_v32 = vsub.f32 %v5564_v48, %v1387_v51  ;;  %3491 = vpow2.f32 %v1551_v50 }
 0x3e0   : > { %1790 = vmatprep.subr.mxu1 %v3476_v7  ;;  %1867 = vmatprep.subr.mxu0 %v3476_v7  ;;  %v3480_v36 = vpop.eup %3479  ;;  %3493 = vpow2.f32 %v1549_v42 }
 0x3e1   : > { %v1547_v25 = vmul.f32 1.442695, %v1482_v38  ;;  %v1545_v37 = vmul.f32 1.442695, %v1481_v32  ;;  %v3482_v2 = vpop.eup %3481 }
 0x3e2   : > { %v1477_v56 = vpop.xlane.xlu0 %1476 }
 0x3e3   : > { %1791 = vmatpush1.xpose.msra.mxu1 %v3478_v44  ;;  %1868 = vmatpush1.xpose.msra.mxu0 %v3478_v44  ;;  %3495 = vpow2.f32 %v1547_v25  ;;  %v1542_v23 = vsub.f32 %v4597_v60, %v1477_v56  ;;  %v1541_v58 = vsub.f32 %v4594_v20, %v1477_v56 }
 0x3e4   : > { %1792 = vmatprep.subr.mxu1 %v3480_v36  ;;  %1869 = vmatprep.subr.mxu0 %v3480_v36  ;;  %v3484_v47 = vpop.eup %3483  ;;  %3497 = vpow2.f32 %v1545_v37 }
 0x3e5   : > { %v3486_v35 = vpop.eup %3485  ;;  %v1667_v9 = vmul.f32 1.442695, %v1542_v23 }
 0x3e6   : > { %v1480_v41 = vpop.xlane.xlu0 %1479 }
 0x3e7   : > { %v1543_v57 = vsub.f32 %v4602_v59, %v1480_v41  ;;  %v1544_v30 = vsub.f32 %v4605_v33, %v1480_v41  ;;  %1793 = vmatpush1.xpose.msra.mxu1 %v3482_v2  ;;  %1870 = vmatpush1.xpose.msra.mxu0 %v3482_v2  ;;  %v1665_v59 = vmul.f32 1.442695, %v1541_v58 }
 0x3e8   : > { %1794 = vmatprep.subr.mxu1 %v3484_v47  ;;  %1871 = vmatprep.subr.mxu0 %v3484_v47  ;;  %v3488_v55 = vpop.eup %3487 }
 0x3e9   : > { %v1669_v19 = vmul.f32 1.442695, %v1543_v57  ;;  %v1671_v5 = vmul.f32 1.442695, %v1544_v30  ;;  %v3490_v22 = vpop.eup %3489 }
 0x3ea   : > { %v1474_v29 = vpop.xlane.xlu0 %1473 }
 0x3eb   : > { %3499 = vpow2.f32 %v1669_v19  ;;  %v1540_v60 = vsub.f32 %v4608_v62, %v1474_v29  ;;  %1795 = vmatpush1.xpose.msra.mxu1 %v3486_v35  ;;  %1872 = vmatpush1.xpose.msra.mxu0 %v3486_v35  ;;  %v1539_v33 = vsub.f32 %v4613_v8, %v1474_v29 }
 0x3ec   : > { %3501 = vpow2.f32 %v1671_v5  ;;  %1796 = vmatprep.subr.mxu1 %v3488_v55  ;;  %1873 = vmatprep.subr.mxu0 %v3488_v55  ;;  %v3492_v46 = vpop.eup %3491 }
 0x3ed   : > { %3503 = vpow2.f32 %v1667_v9  ;;  %v1663_v20 = vmul.f32 1.442695, %v1540_v60  ;;  %v1661_v62 = vmul.f32 1.442695, %v1539_v33  ;;  %v3494_v52 = vpop.eup %3493 }
 0x3ee   : > { %v1471_v45 = vpop.xlane.xlu0 %1470  ;;  %3505 = vpow2.f32 %v1665_v59 }
 0x3ef   : > { %v1538_v34 = vsub.f32 %v4616_v61, %v1471_v45  ;;  %1797 = vmatpush1.xpose.msra.mxu1 %v3490_v22  ;;  %1874 = vmatpush1.xpose.msra.mxu0 %v3490_v22  ;;  %v1537_v1 = vsub.f32 %v4621_v6, %v1471_v45  ;;  %3507 = vpow2.f32 %v1663_v20 }
 0x3f0   : > { %1798 = vmatprep.subr.mxu1 %v3492_v46  ;;  %1875 = vmatprep.subr.mxu0 %v3492_v46  ;;  %v3496_v8 = vpop.eup %3495  ;;  %3509 = vpow2.f32 %v1661_v62 }
 0x3f1   : > { %v1659_v21 = vmul.f32 1.442695, %v1538_v34  ;;  %v1657_v61 = vmul.f32 1.442695, %v1537_v1  ;;  %v3498_v51 = vpop.eup %3497 }
 0x3f2   : > { %v1468_v27 = vpop.xlane.xlu0 %1467 }
 0x3f3   : > { %v1536_v39 = vsub.f32 %v4624_v13, %v1468_v27  ;;  %1799 = vmatpush1.xpose.msra.mxu1 %v3494_v52  ;;  %1876 = vmatpush1.xpose.msra.mxu0 %v3494_v52  ;;  %v1535_v50 = vsub.f32 %v4629_v12, %v1468_v27  ;;  %3511 = vpow2.f32 %v1659_v21 }
 0x3f4   : > { %1800 = vmatprep.subr.mxu1 %v3496_v8  ;;  %1877 = vmatprep.subr.mxu0 %v3496_v8  ;;  %3513 = vpow2.f32 %v1657_v61 }
 0x3f5   : > { %v1655_v7 = vmul.f32 1.442695, %v1536_v39  ;;  %v1653_v13 = vmul.f32 1.442695, %v1535_v50 }
 0x3f6   : > { %v1465_v38 = vpop.xlane.xlu0 %1464 }
 0x3f7   : > { %v1534_v6 = vsub.f32 %v4632_v16, %v1465_v38  ;;  %1801 = vmatpush1.xpose.msra.mxu1 %v3498_v51  ;;  %1878 = vmatpush1.xpose.msra.mxu0 %v3498_v51  ;;  %v1533_v32 = vsub.f32 %v4637_v0, %v1465_v38  ;;  %3515 = vpow2.f32 %v1655_v7 }
 0x3f8   : > { %v3500_v42 = vpop.eup %3499  ;;  %3517 = vpow2.f32 %v1653_v13 }
 0x3f9   : > { %v3502_v48 = vpop.eup %3501  ;;  %v1651_v44 = vmul.f32 1.442695, %v1534_v6  ;;  %v1649_v16 = vmul.f32 1.442695, %v1533_v32  ;;  %v5565_v32 = vld [vmem:[#allocation41_spill] sm:$0xff] }
 0x3fa   : > { %1802 = vmatprep.subr.mxu1 %v3502_v48  ;;  %1879 = vmatprep.subr.mxu0 %v3502_v48  ;;  %v1462_v25 = vpop.xlane.xlu0 %1461  ;;  %v3504_v12 = vpop.eup %3503 }
 0x3fb   : > { %v1532_v56 = vsub.f32 %v4640_v28, %v1462_v25  ;;  %1803 = vmatpush2.xpose.msra.mxu1 %v3500_v42  ;;  %1880 = vmatpush2.xpose.msra.mxu0 %v3500_v42  ;;  %v1531_v36 = vsub.f32 %v4645_v24, %v1462_v25  ;;  %v3506_v37 = vpop.eup %3505  ;;  %3519 = vpow2.f32 %v1651_v44  ;;  %v5566_v25 = vld [vmem:[#allocation42_spill] sm:$0xff] }
 0x3fc   : > { %1804 = vmatprep.subr.mxu1 %v3504_v12  ;;  %1881 = vmatprep.subr.mxu0 %v3504_v12  ;;  %v3508_v23 = vpop.eup %3507  ;;  %3521 = vpow2.f32 %v1649_v16 }
 0x3fd   : > { %v1647_v2 = vmul.f32 1.442695, %v1532_v56  ;;  %v1645_v28 = vmul.f32 1.442695, %v1531_v36  ;;  %v3510_v57 = vpop.eup %3509 }
 0x3fe   : > { %v1459_v0 = vpop.xlane.xlu0 %1458 }
 0x3ff   : > { %v1530_v41 = vsub.f32 %v4649_v17, %v1459_v0  ;;  %1805 = vmatpush2.xpose.msra.mxu1 %v3506_v37  ;;  %1882 = vmatpush2.xpose.msra.mxu0 %v3506_v37  ;;  %v1529_v47 = vsub.f32 %v4655_v14, %v1459_v0  ;;  %3523 = vpow2.f32 %v1647_v2  ;;  %v1759_v2 = vpop.f32.mrf.mxu0 }
 0x400   : > { %1806 = vmatprep.subr.mxu1 %v3508_v23  ;;  %1883 = vmatprep.subr.mxu0 %v3508_v23  ;;  %v3512_v24 = vpop.eup %3511  ;;  %3525 = vpow2.f32 %v1645_v28  ;;  %v5567_v23 = vld [vmem:[#allocation43_spill] sm:$0xff] }
 0x401   : > { %v1643_v30 = vmul.f32 1.442695, %v1530_v41  ;;  %v1641_v17 = vmul.f32 1.442695, %v1529_v47  ;;  %v3514_v35 = vpop.eup %3513 }
 0x402   : > { %v1456_v58 = vpop.xlane.xlu0 %1455 }
 0x403   : > { %v1528_v19 = vsub.f32 %v4659_v15, %v1456_v58  ;;  %1807 = vmatpush2.xpose.msra.mxu1 %v3510_v57  ;;  %1884 = vmatpush2.xpose.msra.mxu0 %v3510_v57  ;;  %v1527_v5 = vsub.f32 %v4665_v10, %v1456_v58  ;;  %3527 = vpow2.f32 %v1643_v30  ;;  %v1761_v30 = vpop.f32.mrf.mxu0 }
 0x404   : > { %1808 = vmatprep.subr.mxu1 %v3512_v24  ;;  %1885 = vmatprep.subr.mxu0 %v3512_v24  ;;  %v3516_v14 = vpop.eup %3515  ;;  %3529 = vpow2.f32 %v1641_v17 }
 0x405   : > { %v1639_v9 = vmul.f32 1.442695, %v1528_v19  ;;  %v1637_v15 = vmul.f32 1.442695, %v1527_v5  ;;  %v3518_v59 = vpop.eup %3517 }
 0x406   : > { %v1453_v29 = vpop.xlane.xlu0 %1452 }
 0x407   : > { %v1526_v55 = vsub.f32 %v4669_v26, %v1453_v29  ;;  %1809 = vmatpush2.xpose.msra.mxu1 %v3514_v35  ;;  %1886 = vmatpush2.xpose.msra.mxu0 %v3514_v35  ;;  %v1525_v60 = vsub.f32 %v4675_v49, %v1453_v29  ;;  %3531 = vpow2.f32 %v1639_v9 }
 0x408   : > { %1810 = vmatprep.subr.mxu1 %v3516_v14  ;;  %1887 = vmatprep.subr.mxu0 %v3516_v14  ;;  %v3520_v10 = vpop.eup %3519  ;;  %3533 = vpow2.f32 %v1637_v15  ;;  %v1765_v14 = vpop.f32.mrf.mxu0 }
 0x409   : > { %v1635_v33 = vmul.f32 1.442695, %v1526_v55  ;;  %v1633_v26 = vmul.f32 1.442695, %v1525_v60  ;;  %v3522_v46 = vpop.eup %3521 }
 0x40a   : > { %v1450_v22 = vpop.xlane.xlu0 %1449  ;;  %v1767_v60 = vpop.f32.mrf.mxu0 }
 0x40b   : > { %v1524_v20 = vsub.f32 %v4679_v3, %v1450_v22  ;;  %1811 = vmatpush2.xpose.msra.mxu1 %v3518_v59  ;;  %1888 = vmatpush2.xpose.msra.mxu0 %v3518_v59  ;;  %v1523_v45 = vsub.f32 %v4685_v4, %v1450_v22  ;;  %3535 = vpow2.f32 %v1635_v33  ;;  %v1685_v59 = vpop.permute.xlu1 %1684  ;;  %v1975_v33 = vld [vmem:[#allocation10 + $0xf8] sm:$0xff] }
 0x40c   : > { %1812 = vmatprep.subr.mxu1 %v3520_v10  ;;  %1889 = vmatprep.subr.mxu0 %v3520_v10  ;;  %v3524_v49 = vpop.eup %3523  ;;  %3537 = vpow2.f32 %v1633_v26  ;;  %v1768_v10 = vadd.f32 %v1767_v60, %v1685_v59  ;;  %v1974_v26 = vld [vmem:[#allocation10 + $0xf0] sm:$0xff]  ;;  %v1984_v60 = vld [vmem:[#allocation10 + $0x140] sm:$0xff] }
 0x40d   : > { %v1631_v34 = vmul.f32 1.442695, %v1524_v20  ;;  %v1629_v3 = vmul.f32 1.442695, %v1523_v45  ;;  %v3526_v21 = vpop.eup %3525  ;;  %v1973_v45 = vld [vmem:[#allocation10 + $0xe8] sm:$0xff] }
 0x40e   : > { %v1447_v62 = vpop.xlane.xlu0 %1446 }
 0x40f   : > { %v1522_v1 = vsub.f32 %v4689_v54, %v1447_v62  ;;  %1813 = vmatpush2.xpose.msra.mxu1 %v3522_v46  ;;  %1890 = vmatpush2.xpose.msra.mxu0 %v3522_v46  ;;  %v1521_v52 = vsub.f32 %v4695_v18, %v1447_v62  ;;  %3539 = vpow2.f32 %v1631_v34  ;;  %v1766_v46 = vadd.f32 %v1765_v14, %v1685_v59  ;;  %v1972_v34 = vld [vmem:[#allocation10 + $0xe0] sm:$0xff]  ;;  %v1971_v62 = vld [vmem:[#allocation10 + $0xd8] sm:$0xff] }
 0x410   : > { %1814 = vmatprep.subr.mxu1 %v3524_v49  ;;  %1891 = vmatprep.subr.mxu0 %v3524_v49  ;;  %v3528_v4 = vpop.eup %3527  ;;  %3541 = vpow2.f32 %v1629_v3  ;;  %v1970_v49 = vld [vmem:[#allocation10 + $0xd0] sm:$0xff]  ;;  %v1969_v3 = vld [vmem:[#allocation10 + $0xc8] sm:$0xff]  ;;  %v1987_v14 = vld [vmem:[#allocation10 + $0x158] sm:$0xff] }
 0x411   : > { %v1627_v27 = vmul.f32 1.442695, %v1522_v1  ;;  %v1625_v54 = vmul.f32 1.442695, %v1521_v52  ;;  %v3530_v50 = vpop.eup %3529  ;;  %v5568_v1 = vmov 0.0   ;;  %v1968_v52 = vld [vmem:[#allocation10 + $0xc0] sm:$0xff] }
 0x412   : > { %v1444_v8 = vpop.xlane.xlu0 %1443  ;;  %v1983_v59 = vld [vmem:[#allocation10 + $0x138] sm:$0xff] }
 0x413   : > { %v1520_v39 = vsub.f32 %v4699_v43, %v1444_v8  ;;  %1815 = vmatpush2.xpose.msra.mxu1 %v3526_v21  ;;  %1892 = vmatpush2.xpose.msra.mxu0 %v3526_v21  ;;  %v1519_v61 = vsub.f32 %v4705_v31, %v1444_v8  ;;  %3543 = vpow2.f32 %v1627_v27  ;;  %v5569_v21 = vld [vmem:[#allocation28_spill] sm:$0xff]  ;;  %v1967_v27 = vld [vmem:[#allocation10 + $0xb8] sm:$0xff]  ;;  %v1966_v8 = vld [vmem:[#allocation10 + $0xb0] sm:$0xff] }
 0x414   : > { %1816 = vmatprep.subr.mxu1 %v3528_v4  ;;  %1893 = vmatprep.subr.mxu0 %v3528_v4  ;;  %v3532_v18 = vpop.eup %3531  ;;  %3545 = vpow2.f32 %v1625_v54  ;;  %v1965_v4 = vld [vmem:[#allocation10 + $0xa8] sm:$0xff]  ;;  %v1963_v54 = vld [vmem:[#allocation10 + $0x98] sm:$0xff] }
 0x415   : > { %v1623_v51 = vmul.f32 1.442695, %v1520_v39  ;;  %v1621_v43 = vmul.f32 1.442695, %v1519_v61  ;;  %v3534_v42 = vpop.eup %3533  ;;  %v1964_v39 = vld [vmem:[#allocation10 + $0xa0] sm:$0xff]  ;;  %v1962_v61 = vld [vmem:[#allocation10 + $0x90] sm:$0xff] }
 0x416   : > { %v1441_v7 = vpop.xlane.xlu0 %1440 }
 0x417   : > { %v1518_v38 = vsub.f32 %v4709_v40, %v1441_v7  ;;  %1817 = vmatpush2.xpose.msra.mxu1 %v3530_v50  ;;  %1894 = vmatpush2.xpose.msra.mxu0 %v3530_v50  ;;  %v1517_v6 = vsub.f32 %v4715_v63, %v1441_v7  ;;  %3547 = vpow2.f32 %v1623_v51  ;;  %v1961_v50 = vld [vmem:[#allocation10 + $0x88] sm:$0xff]  ;;  %v1960_v51 = vld [vmem:[#allocation10 + $0x80] sm:$0xff]  ;;  %v1959_v7 = vld [vmem:[#allocation10 + $0x78] sm:$0xff] }
 0x418   : > { %1818 = vmatprep.subr.mxu1 %v3532_v18  ;;  %1895 = vmatprep.subr.mxu0 %v3532_v18  ;;  %v3536_v31 = vpop.eup %3535  ;;  %3549 = vpow2.f32 %v1621_v43  ;;  %v1958_v18 = vld [vmem:[#allocation10 + $0x70] sm:$0xff]  ;;  %v1956_v43 = vld [vmem:[#allocation10 + $0x60] sm:$0xff] }
 0x419   : > { %v1619_v48 = vmul.f32 1.442695, %v1518_v38  ;;  %v1617_v40 = vmul.f32 1.442695, %v1517_v6  ;;  %v3538_v56 = vpop.eup %3537  ;;  %v1957_v38 = vld [vmem:[#allocation10 + $0x68] sm:$0xff]  ;;  %v1955_v6 = vld [vmem:[#allocation10 + $0x58] sm:$0xff] }
 0x41a   : > { %v1438_v13 = vpop.xlane.xlu0 %1437 }
 0x41b   : > { %v1516_v44 = vsub.f32 %v5565_v32, %v1438_v13  ;;  %1819 = vmatpush2.xpose.msra.mxu1 %v3534_v42  ;;  %1896 = vmatpush2.xpose.msra.mxu0 %v3534_v42  ;;  %v1515_v12 = vsub.f32 %v5566_v25, %v1438_v13  ;;  %3551 = vpow2.f32 %v1619_v48  ;;  %v1954_v42 = vld [vmem:[#allocation10 + $0x50] sm:$0xff]  ;;  %v1953_v48 = vld [vmem:[#allocation10 + $0x48] sm:$0xff]  ;;  %v1952_v13 = vld [vmem:[#allocation10 + $0x40] sm:$0xff] }
 0x41c   : > { %1820 = vmatprep.subr.mxu1 %v3536_v31  ;;  %1897 = vmatprep.subr.mxu0 %v3536_v31  ;;  %v3540_v63 = vpop.eup %3539  ;;  %3553 = vpow2.f32 %v1617_v40  ;;  %v1951_v31 = vld [vmem:[#allocation10 + $0x38] sm:$0xff]  ;;  %v1950_v32 = vld [vmem:[#allocation10 + $0x30] sm:$0xff]  ;;  %v1948_v40 = vld [vmem:[#allocation10 + $0x20] sm:$0xff] }
 0x41d   : > { %v1615_v16 = vmul.f32 1.442695, %v1516_v44  ;;  %v1613_v0 = vmul.f32 1.442695, %v1515_v12  ;;  %v3542_v28 = vpop.eup %3541  ;;  %v1949_v44 = vld [vmem:[#allocation10 + $0x28] sm:$0xff]  ;;  %v1947_v25 = vld [vmem:[#allocation10 + $0x18] sm:$0xff] }
 0x41e   : > { %v1435_v36 = vpop.xlane.xlu0 %1434  ;;  %v1946_v12 = vld [vmem:[#allocation10 + $0x10] sm:$0xff] }
 0x41f   : > { %v1514_v37 = vsub.f32 %v4729_v11, %v1435_v36  ;;  %1821 = vmatpush2.xpose.msra.mxu1 %v3538_v56  ;;  %1898 = vmatpush2.xpose.msra.mxu0 %v3538_v56  ;;  %v1513_v41 = vsub.f32 %v5567_v23, %v1435_v36  ;;  %3555 = vpow2.f32 %v1615_v16  ;;  %v1945_v56 = vld [vmem:[#allocation10 + $0x8] sm:$0xff]  ;;  %v1944_v16 = vld [vmem:[#allocation10] sm:$0xff]  ;;  %v2007_v36 = vld [vmem:[#allocation10 + $0x1f8] sm:$0xff] }
 0x420   : > { %1822 = vmatprep.subr.mxu1 %v3540_v63  ;;  %1899 = vmatprep.subr.mxu0 %v3540_v63  ;;  %v3544_v57 = vpop.eup %3543  ;;  %3557 = vpow2.f32 %v1613_v0  ;;  %v2006_v63 = vld [vmem:[#allocation10 + $0x1f0] sm:$0xff]  ;;  %v2003_v0 = vld [vmem:[#allocation10 + $0x1d8] sm:$0xff] }
 0x421   : > { %v1611_v47 = vmul.f32 1.442695, %v1514_v37  ;;  %v1609_v11 = vmul.f32 1.442695, %v1513_v41  ;;  %v3546_v58 = vpop.eup %3545  ;;  %v2005_v37 = vld [vmem:[#allocation10 + $0x1e8] sm:$0xff]  ;;  %v2002_v23 = vld [vmem:[#allocation10 + $0x1d0] sm:$0xff] }
 0x422   : > { %v2001_v41 = vld [vmem:[#allocation10 + $0x1c8] sm:$0xff] }
 0x423   : > { %1823 = vmatpush2.xpose.msra.mxu1 %v3542_v28  ;;  %1900 = vmatpush2.xpose.msra.mxu0 %v3542_v28  ;;  %3559 = vpow2.f32 %v1611_v47  ;;  %v2000_v28 = vld [vmem:[#allocation10 + $0x1c0] sm:$0xff]  ;;  %v1999_v47 = vld [vmem:[#allocation10 + $0x1b8] sm:$0xff] }
 0x424   : > { %1824 = vmatprep.subr.mxu1 %v3544_v57  ;;  %1901 = vmatprep.subr.mxu0 %v3544_v57  ;;  %v3548_v19 = vpop.eup %3547  ;;  %3561 = vpow2.f32 %v1609_v11  ;;  %v1998_v57 = vld [vmem:[#allocation10 + $0x1b0] sm:$0xff]  ;;  %v1996_v11 = vld [vmem:[#allocation10 + $0x1a0] sm:$0xff] }
 0x425   : > { %v3550_v5 = vpop.eup %3549 }
 0x426   : > { %v1680_v24 = vpop.permute.xlu0 %1679 }
 0x427   : > { %v1762_v17 = vadd.f32 %v1761_v30, %v1680_v24  ;;  %1825 = vmatpush2.xpose.msra.mxu1 %v3546_v58  ;;  %1902 = vmatpush2.xpose.msra.mxu0 %v3546_v58  ;;  %v1760_v20 = vadd.f32 %v1759_v2, %v1680_v24  ;;  %v2004_v2 = vld [vmem:[#allocation10 + $0x1e0] sm:$0xff]  ;;  %v1997_v30 = vld [vmem:[#allocation10 + $0x1a8] sm:$0xff]  ;;  %v1995_v58 = vld [vmem:[#allocation10 + $0x198] sm:$0xff] }
 0x428   : > { %1826 = vmatprep.subr.mxu1 %v3548_v19  ;;  %1903 = vmatprep.subr.mxu0 %v3548_v19  ;;  %v3552_v35 = vpop.eup %3551  ;;  %v1994_v24 = vld [vmem:[#allocation10 + $0x190] sm:$0xff]  ;;  %v1993_v19 = vld [vmem:[#allocation10 + $0x188] sm:$0xff] }
 0x429   : > { %1834 = vmatprep.mubr.f32.mxu1 %v1762_v17  ;;  %v3554_v9 = vpop.eup %3553  ;;  %v1992_v17 = vld [vmem:[#allocation10 + $0x180] sm:$0xff] }
 0x42b   : > { %1827 = vmatpush2.xpose.msra.mxu1 %v3550_v5  ;;  %1904 = vmatpush2.xpose.msra.mxu0 %v3550_v5  ;;  %v1991_v5 = vld [vmem:[#allocation10 + $0x178] sm:$0xff] }
 0x42c   : > { %1828 = vmatprep.subr.mxu1 %v3552_v35  ;;  %1905 = vmatprep.subr.mxu0 %v3552_v35  ;;  %v3556_v29 = vpop.eup %3555  ;;  %v1990_v35 = vld [vmem:[#allocation10 + $0x170] sm:$0xff] }
 0x42d   : > { %v3558_v55 = vpop.eup %3557 }
 0x42f   : > { %1829 = vmatpush2.xpose.msra.mxu1 %v3554_v9  ;;  %1906 = vmatpush2.xpose.msra.mxu0 %v3554_v9  ;;  %v1989_v9 = vld [vmem:[#allocation10 + $0x168] sm:$0xff] }
 0x430   : > { %1830 = vmatprep.subr.mxu1 %v3556_v29  ;;  %1907 = vmatprep.subr.mxu0 %v3556_v29  ;;  %v3560_v15 = vpop.eup %3559  ;;  %v1988_v29 = vld [vmem:[#allocation10 + $0x160] sm:$0xff] }
 0x431   : > { %v3562_v22 = vpop.eup %3561 }
 0x433   : > { %1831 = vmatpush2.xpose.msra.mxu1 %v3558_v55  ;;  %1908 = vmatpush2.xpose.msra.mxu0 %v3558_v55  ;;  %v1986_v55 = vld [vmem:[#allocation10 + $0x150] sm:$0xff] }
 0x434   : > { %1832 = vmatprep.subr.mxu1 %v3560_v15  ;;  %1909 = vmatprep.subr.mxu0 %v3560_v15  ;;  %v1985_v15 = vld [vmem:[#allocation10 + $0x148] sm:$0xff] }
 0x437   : > { %1833 = vmatpush2.xpose.msra.mxu1 %v3562_v22  ;;  %1910 = vmatpush2.xpose.msra.mxu0 %v3562_v22  ;;  %v1981_v22 = vld [vmem:[#allocation10 + $0x128] sm:$0xff] }
 0x438   : > { %2008 = vmatprep.subr.mxu1 %v1975_v33  ;;  %v1982_v33 = vld [vmem:[#allocation10 + $0x130] sm:$0xff] }
 0x43a   : > { %1835 = vmatmul.mubr.f32.vlgmr.msra.gmra.mxu1 %v1760_v20  ;;  %1912 = vmatmul.mubr.f32.vlgmr.msra.gmra.mxu0 %v5487_v53  ;;  %v1979_v20 = vld [vmem:[#allocation10 + $0x118] sm:$0xff] }
 0x43b   : > { %2009 = vmatpush1.msra.mxu1 %v1974_v26  ;;  %1840 = vmatprep.mubr.f32.mxu1 %v1768_v10  ;;  %v1980_v10 = vld [vmem:[#allocation10 + $0x120] sm:$0xff]  ;;  %v1978_v26 = vld [vmem:[#allocation10 + $0x110] sm:$0xff] }
 0x43c   : > { %2010 = vmatprep.subr.mxu1 %v1973_v45  ;;  %2315 = vmatprep.mubr.f32.mxu0 %v5568_v1  ;;  %v1977_v45 = vld [vmem:[#allocation10 + $0x108] sm:$0xff] }
 0x43d   : > { %2011 = vmatpush1.msra.mxu1 %v1972_v34  ;;  %v5570_v34 = vld [vmem:[#allocation27_spill] sm:$0xff] }
 0x43e   : > { %1841 = vmatmul.mubr.f32.gmra.mxu1 %v1766_v46  ;;  %2012 = vmatprep.subr.mxu1 %v1971_v62  ;;  %v1976_v46 = vld [vmem:[#allocation10 + $0x100] sm:$0xff]  ;;  %v3699_v62 = vld [vmem:[%s4217_s28 + $0x18] sm:$0xff] }
 0x43f   : > { %2013 = vmatpush1.msra.mxu1 %v1970_v49  ;;  %2072 = vmatprep.mubr.f32.mxu1 %v5569_v21  ;;  %v3700_v49 = vld [vmem:[%s4217_s28 + $0x10] sm:$0xff] }
 0x440   : > { %2014 = vmatprep.subr.mxu1 %v1969_v3  ;;  %v3701_v3 = vld [vmem:[%s4217_s28 + $0x8] sm:$0xff] }
 0x441   : > { %2015 = vmatpush1.msra.mxu1 %v1968_v52  ;;  %v3702_v52 = vld [vmem:[%s4217_s28] sm:$0xff]  ;;  %s4820_s28 = scalar_lea.vmem [#allocation12], %s4213_s0 }
 0x442   : > { %2016 = vmatprep.subr.mxu1 %v1967_v27 }
 0x443   : > { %2017 = vmatpush1.msra.mxu1 %v1966_v8 }
 0x444   : > { %2018 = vmatprep.subr.mxu1 %v1965_v4 }
 0x445   : > { %2019 = vmatpush1.msra.mxu1 %v1964_v39  ;;  %v1921_v39 = vstv %s1918_s9  ;;  %s3086_s9 = sshll.u32 %s4820_s28, 4  ;;  %s5335_s9 = int_to_ptr.vmem [resolvable:$true] %s3086_s9 }
 0x446   : > { %2020 = vmatprep.subr.mxu1 %v1963_v54 }
 0x447   : > { %2021 = vmatpush1.msra.mxu1 %v1962_v61 }
 0x448   : > { %2022 = vmatprep.subr.mxu1 %v1961_v50 }
 0x449   : > { %2023 = vmatpush1.msra.mxu1 %v1960_v51 }
 0x44a   : > { %2024 = vmatprep.subr.mxu1 %v1959_v7  ;;  %v5571_v7 = vld [vmem:[#allocation30_spill] sm:$0xff] }
 0x44b   : > { %2025 = vmatpush1.msra.mxu1 %v1958_v18 }
 0x44c   : > { %2026 = vmatprep.subr.mxu1 %v1957_v38 }
 0x44d   : > { %2027 = vmatpush1.msra.mxu1 %v1956_v43 }
 0x44e   : > { %2028 = vmatprep.subr.mxu1 %v1955_v6 }
 0x44f   : > { %2029 = vmatpush1.msra.mxu1 %v1954_v42 }
 0x450   : > { %2030 = vmatprep.subr.mxu1 %v1953_v48 }
 0x451   : > { %2031 = vmatpush1.msra.mxu1 %v1952_v13 }
 0x452   : > { %2032 = vmatprep.subr.mxu1 %v1951_v31 }
 0x453   : > { %2033 = vmatpush1.msra.mxu1 %v1950_v32 }
 0x454   : > { %2034 = vmatprep.subr.mxu1 %v1949_v44 }
 0x455   : > { %2035 = vmatpush1.msra.mxu1 %v1948_v40 }
 0x456   : > { %2036 = vmatprep.subr.mxu1 %v1947_v25 }
 0x457   : > { %2037 = vmatpush1.msra.mxu1 %v1946_v12  ;;  %v2107_v12 = vpop.trf.xlu0 }
 0x458   : > { %2038 = vmatprep.subr.mxu1 %v1945_v56 }
 0x459   : > { %2039 = vmatpush1.msra.mxu1 %v1944_v16 }
 0x45a   : > { %2040 = vmatprep.subr.mxu1 %v2007_v36 }
 0x45b   : > { %2041 = vmatpush2.msra.mxu1 %v2006_v63  ;;  %v2108_v56 = vpop.trf.xlu0 }
 0x45c   : > { %2042 = vmatprep.subr.mxu1 %v2005_v37 }
 0x45d   : > { %2043 = vmatpush2.msra.mxu1 %v2004_v2 }
 0x45e   : > { %2044 = vmatprep.subr.mxu1 %v2003_v0 }
 0x45f   : > { %2045 = vmatpush2.msra.mxu1 %v2002_v23  ;;  %v2109_v16 = vpop.trf.xlu0 }
 0x460   : > { %2046 = vmatprep.subr.mxu1 %v2001_v41 }
 0x461   : > { %2047 = vmatpush2.msra.mxu1 %v2000_v28 }
 0x462   : > { %2048 = vmatprep.subr.mxu1 %v1999_v47 }
 0x463   : > { %2049 = vmatpush2.msra.mxu1 %v1998_v57  ;;  %v2110_v36 = vpop.trf.xlu0 }
 0x464   : > { %2050 = vmatprep.subr.mxu1 %v1997_v30  ;;  %v2139_v30 = vpop.trf.xlu1 }
 0x465   : > { %2051 = vmatpush2.msra.mxu1 %v1996_v11 }
 0x466   : > { %2052 = vmatprep.subr.mxu1 %v1995_v58 }
 0x467   : > { %2053 = vmatpush2.msra.mxu1 %v1994_v24  ;;  %v2111_v63 = vpop.trf.xlu0 }
 0x468   : > { %2054 = vmatprep.subr.mxu1 %v1993_v19  ;;  %v2140_v58 = vpop.trf.xlu1 }
 0x469   : > { %2055 = vmatpush2.msra.mxu1 %v1992_v17 }
 0x46a   : > { %2056 = vmatprep.subr.mxu1 %v1991_v5 }
 0x46b   : > { %2057 = vmatpush2.msra.mxu1 %v1990_v35  ;;  %v2112_v0 = vpop.trf.xlu0 }
 0x46c   : > { %2058 = vmatprep.subr.mxu1 %v1989_v9  ;;  %v2141_v19 = vpop.trf.xlu1 }
 0x46d   : > { %2059 = vmatpush2.msra.mxu1 %v1988_v29 }
 0x46e   : > { %2060 = vmatprep.subr.mxu1 %v1987_v14 }
 0x46f   : > { %2061 = vmatpush2.msra.mxu1 %v1986_v55  ;;  %v2113_v23 = vpop.trf.xlu0 }
 0x470   : > { %2062 = vmatprep.subr.mxu1 %v1985_v15  ;;  %v2142_v5 = vpop.trf.xlu1 }
 0x471   : > { %2063 = vmatpush2.msra.mxu1 %v1984_v60 }
 0x472   : > { %2064 = vmatprep.subr.mxu1 %v1983_v59 }
 0x473   : > { %2065 = vmatpush2.msra.mxu1 %v1982_v33  ;;  %v2114_v41 = vpop.trf.xlu0 }
 0x474   : > { %2066 = vmatprep.subr.mxu1 %v1981_v22  ;;  %v2143_v9 = vpop.trf.xlu1 }
 0x475   : > { %2067 = vmatpush2.msra.mxu1 %v1980_v10 }
 0x476   : > { %2068 = vmatprep.subr.mxu1 %v1979_v20 }
 0x477   : > { %2069 = vmatpush2.msra.mxu1 %v1978_v26  ;;  %v2115_v28 = vpop.trf.xlu0 }
 0x478   : > { %2070 = vmatprep.subr.mxu1 %v1977_v45  ;;  %v2144_v14 = vpop.trf.xlu1 }
 0x479   : > { %2071 = vmatpush2.msra.mxu1 %v1976_v46  ;;  %v2796_v46 = vld [vmem:[%s5439_s10] sm:$0xff] }
 0x47a   : > { %2073 = vmatmul.mubr.f32.vlgmr.msra.gmra.mxu1 %v5570_v34  ;;  %2844 = vmatprep.subr.mxu1 %v3699_v62  ;;  %v2797_v34 = vld [vmem:[%s5439_s10 + $0x8] sm:$0xff] }
 0x47b   : > { %2845 = vmatpush1.msra.mxu1 %v3700_v49  ;;  %2880 = vmatprep.mubr.f32.mxu1 %v5568_v1  ;;  %v2116_v47 = vpop.trf.xlu0 }
 0x47c   : > { %2846 = vmatprep.subr.mxu1 %v3701_v3  ;;  %v2145_v55 = vpop.trf.xlu1 }
 0x47d   : > { %2847 = vmatpush1.msra.mxu1 %v3702_v52 }
 0x47e   : > { %3335 = vmatmul.mubr.msk.f32.vlgmr.msra.gmra.mxu1 %vm664_vm0, %v2796_v46 }
 0x47f   : > { %v2117_v57 = vpop.trf.xlu0  ;;  %2886 = vmatprep.mubr.f32.mxu1 %v5568_v1 }
 0x480   : > { %v2146_v15 = vpop.trf.xlu1 }
 0x482   : > { %3336 = vmatmul.mubr.msk.f32.gmra.mxu1 %vm664_vm0, %v2797_v34 }
 0x483   : > { %v2118_v11 = vpop.trf.xlu0  ;;  %3034 = vmatprep.mubr.f32.mxu1 %v5487_v53 }
 0x484   : > { %v2147_v60 = vpop.trf.xlu1 }
 0x487   : > { %v2119_v24 = vpop.trf.xlu0 }
 0x488   : > { %v2148_v59 = vpop.trf.xlu1 }
 0x48b   : > { %v2120_v17 = vpop.trf.xlu0 }
 0x48c   : > { %v2149_v33 = vpop.trf.xlu1 }
 0x48f   : > { %v2121_v35 = vpop.trf.xlu0 }
 0x490   : > { %v2150_v22 = vpop.trf.xlu1 }
 0x493   : > { %v2122_v29 = vpop.trf.xlu0 }
 0x494   : > { %v2151_v10 = vpop.trf.xlu1 }
 0x498   : > { %v2152_v20 = vpop.trf.xlu1 }
 0x49c   : > { %v2153_v26 = vpop.trf.xlu1 }
 0x4a0   : > { %v2154_v45 = vpop.trf.xlu1 }
 0x4fa   : > { %v1913_v21 = vpop.f32.mrf.mxu0  ;;  %v1836_v8 = vpop.f32.mrf.mxu1 }
 0x4fb   : > { %3563 = vrcp.f32 %v1913_v21 }
 0x4fc   : > { %v1915_v27 = vpop.f32.mrf.mxu0  ;;  %v1838_v4 = vpop.f32.mrf.mxu1 }
 0x4fd   : > { %3565 = vrcp.f32 %v1915_v27 }
 0x4fe   : > { %v1842_v61 = vpop.f32.mrf.mxu1 }
 0x500   : > { %v1844_v43 = vpop.f32.mrf.mxu1 }
 0x508   : > { %v3564_v54 = vpop.eup %3563 }
 0x509   : > { %v1922_v50 = vmul.f32 %v3564_v54, %v1921_v39 }
 0x50a   : > { %v3566_v51 = vpop.eup %3565 }
 0x50b   : > { %v1927_v18 = vrot.slane %v1922_v50, %v5571_v7  ;;  %v1923_v38 = vmul.f32 %v3566_v51, %v1921_v39 }
 0x50d   : > { %v1932_v6 = vmul.f32 %v1927_v18, %v1836_v8  ;;  %v1934_v42 = vmul.f32 %v1927_v18, %v1842_v61  ;;  %v1931_v48 = vrot.slane %v1923_v38, %v5571_v7 }
 0x50f   : > { %v1936_v13 = vadd.f32 %v3702_v52, %v1932_v6  ;;  %v1938_v31 = vadd.f32 %v3700_v49, %v1934_v42  ;;  %v1933_v32 = vmul.f32 %v1931_v48, %v1838_v4  ;;  %v1935_v44 = vmul.f32 %v1931_v48, %v1844_v43 }
 0x511   : > { %1940 = vst [vmem:[%s4820_s28] sm:$0xff] %v1936_v13  ;;  %1942 = vst [vmem:[%s4820_s28 + $0x10] sm:$0xff] %v1938_v31  ;;  %v1937_v40 = vadd.f32 %v3701_v3, %v1933_v32  ;;  %v1939_v25 = vadd.f32 %v3699_v62, %v1935_v44 }
 0x513   : > { %1941 = vst [vmem:[%s4820_s28 + $0x8] sm:$0xff] %v1937_v40  ;;  %1943 = vst [vmem:[%s4820_s28 + $0x18] sm:$0xff] %v1939_v25  ;;  %s3819_s28 = sshll.u32 %s3932_s16, 4  ;;  %s3820_s28 = int_to_ptr.vmem [resolvable:$false] %s3819_s28 }
 0x514   : > { %s3821_s1 = scalar_lea.vmem %s3820_s28, 1024  ;;  %p3822_p9 = scmp.lt.s32.totalorder %s5335_s9, %s3820_s28 }
 0x53a   : > { %v2074_v37 = vpop.f32.mrf.mxu1 }
 0x53c   : > { %v2076_v2 = vpop.f32.mrf.mxu1 }
 0x53d   : > { %2281 = vmatprep.subr.mxu0 %v2076_v2 }
 0x53e   : > { %2282 = vmatpush1.msra.mxu0 %v2074_v37  ;;  %v5573_v37 = vld [vmem:[#allocation29_spill] sm:$0xff] }
 0x53f   : > { %3303 = vmatmul.mubr.msk.f32.vlgmr.msra.gmra.mxu0 %vm1031_vm1, %v2107_v12  ;;  %v5574_v2 = vsub.s32 1, %v5573_v37 }
 0x540   : > { %2321 = vmatprep.mubr.f32.mxu0 %v5568_v1 }
 0x543   : > { %3304 = vmatmul.mubr.msk.f32.gmra.mxu0 %vm1031_vm1, %v2108_v56  ;;  %v2079_v56 = vld [vmem:[%s5572_s23] sm:$0x3]  ;;  %s3815_s23 = scalar_lea.vmem %s5335_s9, 512 }
 0x544   : > { %2327 = vmatprep.mubr.f32.mxu0 %v5568_v1  ;;  %p3816_p0 = scmp.ne.s32.totalorder %s5335_s9, %s3815_s23  ;;  %p3823_p13 = scmp.lt.s32.totalorder %s3821_s1, %s3815_s23 }
 0x546   : > { %p3817_p3 = pnand %p3816_p0, %p5609_p10  ;;  %p3824_p1 = por %p3823_p13, %p3822_p9 }
 0x547   : > { %3305 = vmatmul.mubr.msk.f32.gmra.mxu0 %vm1031_vm1, %v2109_v16 }
 0x548   : > { %2333 = vmatprep.mubr.f32.mxu0 %v5568_v1  ;;  %p3818_p11 = pneg %p3817_p3 }
 0x54a   : > { %p3825_p4 = pnand %p3824_p1, %p3818_p11 }
 0x54b   : > { %3306 = vmatmul.mubr.msk.f32.gmra.mxu0 %vm1031_vm1, %v2110_v36 }
 0x54c   : > { %2339 = vmatprep.mubr.f32.mxu0 %v5568_v1 }
 0x54f   : > { %3307 = vmatmul.mubr.msk.f32.gmra.mxu0 %vm1031_vm1, %v2111_v63  ;;  %v4929_v63 = vrot.slane %v2079_v56, %v5571_v7 }
 0x550   : > { %2345 = vmatprep.mubr.f32.mxu0 %v5568_v1 }
 0x553   : > { %3308 = vmatmul.mubr.msk.f32.gmra.mxu0 %vm1031_vm1, %v2112_v0  ;;  %v4933_v0 = vrot.slane %v2079_v56, %v5574_v2 }
 0x554   : > { %2351 = vmatprep.mubr.f32.mxu0 %v5568_v1 }
 0x557   : > { %3309 = vmatmul.mubr.msk.f32.gmra.mxu0 %vm1031_vm1, %v2113_v23 }
 0x558   : > { %2357 = vmatprep.mubr.f32.mxu0 %v5568_v1 }
 0x55b   : > { %3310 = vmatmul.mubr.msk.f32.gmra.mxu0 %vm1031_vm1, %v2114_v41 }
 0x55c   : > { %2363 = vmatprep.mubr.f32.mxu0 %v5568_v1 }
 0x55f   : > { %3311 = vmatmul.mubr.msk.f32.gmra.mxu0 %vm1031_vm1, %v2115_v28 }
 0x560   : > { %2369 = vmatprep.mubr.f32.mxu0 %v5568_v1 }
 0x563   : > { %3312 = vmatmul.mubr.msk.f32.gmra.mxu0 %vm1031_vm1, %v2116_v47 }
 0x564   : > { %2375 = vmatprep.mubr.f32.mxu0 %v5568_v1 }
 0x567   : > { %3313 = vmatmul.mubr.msk.f32.gmra.mxu0 %vm1031_vm1, %v2117_v57 }
 0x568   : > { %2381 = vmatprep.mubr.f32.mxu0 %v5568_v1 }
 0x56b   : > { %3314 = vmatmul.mubr.msk.f32.gmra.mxu0 %vm1031_vm1, %v2118_v11 }
 0x56c   : > { %2387 = vmatprep.mubr.f32.mxu0 %v5568_v1 }
 0x56f   : > { %3315 = vmatmul.mubr.msk.f32.gmra.mxu0 %vm1031_vm1, %v2119_v24 }
 0x570   : > { %2393 = vmatprep.mubr.f32.mxu0 %v5568_v1 }
 0x573   : > { %3316 = vmatmul.mubr.msk.f32.gmra.mxu0 %vm1031_vm1, %v2120_v17 }
 0x574   : > { %2399 = vmatprep.mubr.f32.mxu0 %v5568_v1 }
 0x577   : > { %3317 = vmatmul.mubr.msk.f32.gmra.mxu0 %vm1031_vm1, %v2121_v35 }
 0x578   : > { %2405 = vmatprep.mubr.f32.mxu0 %v5568_v1 }
 0x57b   : > { %3318 = vmatmul.mubr.msk.f32.gmra.mxu0 %vm1031_vm1, %v2122_v29 }
 0x57c   : > { %2411 = vmatprep.mubr.f32.mxu0 %v5568_v1 }
 0x57f   : > { %3319 = vmatmul.mubr.msk.f32.gmra.mxu0 %vm1031_vm1, %v2139_v30 }
 0x580   : > { %2417 = vmatprep.mubr.f32.mxu0 %v5568_v1 }
 0x583   : > { %3320 = vmatmul.mubr.msk.f32.gmra.mxu0 %vm1031_vm1, %v2140_v58 }
 0x584   : > { %2423 = vmatprep.mubr.f32.mxu0 %v5568_v1 }
 0x587   : > { %3321 = vmatmul.mubr.msk.f32.gmra.mxu0 %vm1031_vm1, %v2141_v19 }
 0x588   : > { %2429 = vmatprep.mubr.f32.mxu0 %v5568_v1 }
 0x58b   : > { %3322 = vmatmul.mubr.msk.f32.gmra.mxu0 %vm1031_vm1, %v2142_v5 }
 0x58c   : > { %2435 = vmatprep.mubr.f32.mxu0 %v5568_v1 }
 0x58f   : > { %3323 = vmatmul.mubr.msk.f32.gmra.mxu0 %vm1031_vm1, %v2143_v9 }
 0x590   : > { %2441 = vmatprep.mubr.f32.mxu0 %v5568_v1 }
 0x593   : > { %3324 = vmatmul.mubr.msk.f32.gmra.mxu0 %vm1031_vm1, %v2144_v14 }
 0x594   : > { %2447 = vmatprep.mubr.f32.mxu0 %v5568_v1 }
 0x597   : > { %3325 = vmatmul.mubr.msk.f32.gmra.mxu0 %vm1031_vm1, %v2145_v55 }
 0x598   : > { %2453 = vmatprep.mubr.f32.mxu0 %v5568_v1 }
 0x59b   : > { %3326 = vmatmul.mubr.msk.f32.gmra.mxu0 %vm1031_vm1, %v2146_v15 }
 0x59c   : > { %2459 = vmatprep.mubr.f32.mxu0 %v5568_v1 }
 0x59f   : > { %3327 = vmatmul.mubr.msk.f32.gmra.mxu0 %vm1031_vm1, %v2147_v60 }
 0x5a0   : > { %2465 = vmatprep.mubr.f32.mxu0 %v5568_v1 }
 0x5a3   : > { %3328 = vmatmul.mubr.msk.f32.gmra.mxu0 %vm1031_vm1, %v2148_v59 }
 0x5a4   : > { %2471 = vmatprep.mubr.f32.mxu0 %v5568_v1 }
 0x5a7   : > { %3329 = vmatmul.mubr.msk.f32.gmra.mxu0 %vm1031_vm1, %v2149_v33 }
 0x5a8   : > { %2477 = vmatprep.mubr.f32.mxu0 %v5568_v1 }
 0x5ab   : > { %3330 = vmatmul.mubr.msk.f32.gmra.mxu0 %vm1031_vm1, %v2150_v22 }
 0x5ac   : > { %2483 = vmatprep.mubr.f32.mxu0 %v5568_v1 }
 0x5af   : > { %3331 = vmatmul.mubr.msk.f32.gmra.mxu0 %vm1031_vm1, %v2151_v10 }
 0x5b0   : > { %2489 = vmatprep.mubr.f32.mxu0 %v5568_v1 }
 0x5b3   : > { %3332 = vmatmul.mubr.msk.f32.gmra.mxu0 %vm1031_vm1, %v2152_v20 }
 0x5b4   : > { %2495 = vmatprep.mubr.f32.mxu0 %v5568_v1 }
 0x5b7   : > { %3333 = vmatmul.mubr.msk.f32.gmra.mxu0 %vm1031_vm1, %v2153_v26 }
 0x5b8   : > { %2501 = vmatprep.mubr.f32.mxu0 %v5568_v1 }
 0x5bb   : > { %3334 = vmatmul.mubr.msk.f32.gmra.mxu0 %vm1031_vm1, %v2154_v45 }
 0x5ff   : > { %v4899_v62 = vpop.f32.mrf.mxu0 }
 0x601   : > { %v4901_v49 = vpop.f32.mrf.mxu0 }
 0x603   : > { %v4903_v3 = vpop.f32.mrf.mxu0 }
 0x604   : > { %v5056_v37 = vadd.f32 %v4903_v3, %v4929_v63 }
 0x605   : > { %v4905_v52 = vpop.f32.mrf.mxu0 }
 0x606   : > { %5578 = vst [vmem:[#allocation34_spill] sm:$0xff] %v5056_v37 }
 0x607   : > { %v4907_v21 = vpop.f32.mrf.mxu0 }
 0x609   : > { %v4909_v27 = vpop.f32.mrf.mxu0 }
 0x60b   : > { %v4911_v1 = vpop.f32.mrf.mxu0 }
 0x60d   : > { %v4913_v8 = vpop.f32.mrf.mxu0 }
 0x60f   : > { %v4915_v4 = vpop.f32.mrf.mxu0 }
 0x611   : > { %v4917_v39 = vpop.f32.mrf.mxu0 }
 0x613   : > { %v2347_v54 = vpop.f32.mrf.mxu0 }
 0x615   : > { %v2349_v61 = vpop.f32.mrf.mxu0 }
 0x616   : > { %v4998_v34 = vadd.f32 %v2349_v61, %v4933_v0 }
 0x617   : > { %v4919_v50 = vpop.f32.mrf.mxu0 }
 0x619   : > { %v4921_v51 = vpop.f32.mrf.mxu0 }
 0x61b   : > { %v2359_v18 = vpop.f32.mrf.mxu0 }
 0x61c   : > { %v4990_v26 = vadd.f32 %v2359_v18, %v4929_v63 }
 0x61d   : > { %v2361_v38 = vpop.f32.mrf.mxu0 }
 0x61e   : > { %v4978_v59 = vadd.f32 %v2361_v38, %v4933_v0 }
 0x61f   : > { %v4923_v43 = vpop.f32.mrf.mxu0 }
 0x620   : > { %v2529_v38 = vmax.f32 %v4990_v26, %v4978_v59  ;;  %v5036_v56 = vadd.f32 %v4923_v43, %v4929_v63 }
 0x621   : > { %v2367_v6 = vpop.f32.mrf.mxu0 }
 0x623   : > { %v2371_v42 = vpop.f32.mrf.mxu0 }
 0x624   : > { %v4970_v55 = vadd.f32 %v2371_v42, %v4929_v63 }
 0x625   : > { %v2373_v48 = vpop.f32.mrf.mxu0 }
 0x626   : > { %v4958_v5 = vadd.f32 %v2373_v48, %v4933_v0 }
 0x627   : > { %v2377_v13 = vpop.f32.mrf.mxu0 }
 0x628   : > { %v2535_v33 = vmax.f32 %v4970_v55, %v4958_v5 }
 0x629   : > { %v2379_v31 = vpop.f32.mrf.mxu0 }
 0x62a   : > { %v5003_v42 = vadd.f32 %v2379_v31, %v4933_v0 }
 0x62b   : > { %v2383_v32 = vpop.f32.mrf.mxu0 }
 0x62c   : > { %v4947_v58 = vadd.f32 %v2383_v32, %v4929_v63  ;;  %v5010_v32 = vadd.f32 %v2347_v54, %v4929_v63 }
 0x62d   : > { %v2385_v44 = vpop.f32.mrf.mxu0 }
 0x62e   : > { %v4942_v57 = vadd.f32 %v2385_v44, %v4933_v0  ;;  %v5013_v44 = vadd.f32 %v2377_v13, %v4929_v63  ;;  %v2523_v31 = vmax.f32 %v5010_v32, %v4998_v34  ;;  %v5032_v13 = vadd.f32 %v4911_v1, %v4929_v63 }
 0x62f   : > { %v2389_v40 = vpop.f32.mrf.mxu0 }
 0x630   : > { %v2541_v35 = vmax.f32 %v4947_v58, %v4942_v57  ;;  %v4993_v45 = vadd.f32 %v2389_v40, %v4929_v63  ;;  %v5019_v40 = vadd.f32 %v4913_v8, %v4933_v0  ;;  %v2538_v54 = vmax.f32 %v5013_v44, %v5003_v42  ;;  %5576 = vst [vmem:[#allocation32_spill] sm:$0xff] %v5032_v13 }
 0x631   : > { %v2391_v25 = vpop.f32.mrf.mxu0 }
 0x632   : > { %v4983_v22 = vadd.f32 %v2391_v25, %v4933_v0  ;;  %5575 = vst [vmem:[#allocation31_spill] sm:$0xff] %v5019_v40  ;;  %v5024_v25 = vadd.f32 %v2367_v6, %v4933_v0  ;;  %v5042_v6 = vadd.f32 %v4905_v52, %v4933_v0  ;;  %v5060_v52 = vadd.f32 %v4919_v50, %v4929_v63 }
 0x633   : > { %v2395_v12 = vpop.f32.mrf.mxu0  ;;  %v5076_v50 = vadd.f32 %v4915_v4, %v4929_v63  ;;  %v5090_v4 = vadd.f32 %v4901_v49, %v4933_v0 }
 0x634   : > { %v4973_v15 = vadd.f32 %v2395_v12, %v4929_v63  ;;  %v2544_v18 = vmax.f32 %v4993_v45, %v4983_v22  ;;  %5577 = vst [vmem:[#allocation33_spill] sm:$0xff] %v5042_v6  ;;  %v2532_v1 = vmax.f32 %v5036_v56, %v5024_v25 }
 0x635   : > { %v2397_v16 = vpop.f32.mrf.mxu0  ;;  %5579 = vst [vmem:[#allocation35_spill] sm:$0xff] %v5076_v50  ;;  %5582 = vst [vmem:[#allocation38_spill] sm:$0xff] %v5090_v4 }
 0x636   : > { %v4963_v9 = vadd.f32 %v2397_v16, %v4933_v0  ;;  %v2517_v16 = vmax.f32 %v5032_v13, %v5019_v40 }
 0x637   : > { %v2401_v36 = vpop.f32.mrf.mxu0 }
 0x638   : > { %v4936_v41 = vadd.f32 %v2401_v36, %v4929_v63  ;;  %v2547_v10 = vmax.f32 %v4973_v15, %v4963_v9  ;;  %v5048_v36 = vadd.f32 %v4921_v51, %v4933_v0  ;;  %v2511_v51 = vmax.f32 %v5056_v37, %v5042_v6 }
 0x639   : > { %v2403_v23 = vpop.f32.mrf.mxu0 }
 0x63a   : > { %v4939_v28 = vadd.f32 %v2403_v23, %v4933_v0  ;;  %v5068_v23 = vadd.f32 %v4917_v39, %v4933_v0 }
 0x63b   : > { %v2407_v47 = vpop.f32.mrf.mxu0 }
 0x63c   : > { %v2550_v30 = vmax.f32 %v4936_v41, %v4939_v28  ;;  %v4950_v24 = vadd.f32 %v2407_v47, %v4929_v63  ;;  %v2526_v47 = vmax.f32 %v5060_v52, %v5048_v36  ;;  %v2520_v39 = vmax.f32 %v5076_v50, %v5068_v23 }
 0x63d   : > { %v2409_v11 = vpop.f32.mrf.mxu0 }
 0x63e   : > { %v4953_v19 = vadd.f32 %v2409_v11, %v4933_v0  ;;  %2551 = vmax.xlane.f32.xlu1 %v2550_v30  ;;  %v5080_v11 = vadd.f32 %v4909_v27, %v4933_v0  ;;  %v5096_v27 = vadd.f32 %v4899_v62, %v4929_v63 }
 0x63f   : > { %v4955_v17 = vpop.f32.mrf.mxu0 }
 0x640   : > { %v2553_v29 = vmax.f32 %v4950_v24, %v4953_v19  ;;  %5580 = vst [vmem:[#allocation36_spill] sm:$0xff] %v5080_v11  ;;  %5583 = vst [vmem:[#allocation39_spill] sm:$0xff] %v5096_v27 }
 0x641   : > { %v4967_v14 = vpop.f32.mrf.mxu0 }
 0x642   : > { %2554 = vmax.xlane.f32.xlu0 %v2553_v29  ;;  %2542 = vmax.xlane.f32.xlu1 %v2541_v35  ;;  %v5086_v29 = vadd.f32 %v4907_v21, %v4929_v63  ;;  %v2508_v21 = vmax.f32 %v5096_v27, %v5090_v4 }
 0x643   : > { %v4975_v60 = vpop.f32.mrf.mxu0 }
 0x644   : > { %5581 = vst [vmem:[#allocation37_spill] sm:$0xff] %v5086_v29 }
 0x645   : > { %v4987_v20 = vpop.f32.mrf.mxu0 }
 0x646   : > { %2548 = vmax.xlane.f32.xlu0 %v2547_v10  ;;  %2536 = vmax.xlane.f32.xlu1 %v2535_v33  ;;  %v2514_v10 = vmax.f32 %v5086_v29, %v5080_v11 }
 0x647   : > { %v4995_v46 = vpop.f32.mrf.mxu0 }
 0x649   : > { %v5007_v48 = vpop.f32.mrf.mxu0 }
 0x64a   : > { %2545 = vmax.xlane.f32.xlu0 %v2544_v18  ;;  %2530 = vmax.xlane.f32.xlu1 %v2529_v38 }
 0x64b   : > { %v5015_v61 = vpop.f32.mrf.mxu0 }
 0x64d   : > { %v5028_v12 = vpop.f32.mrf.mxu0 }
 0x64e   : > { %2539 = vmax.xlane.f32.xlu0 %v2538_v54  ;;  %2524 = vmax.xlane.f32.xlu1 %v2523_v31 }
 0x64f   : > { %v5038_v8 = vpop.f32.mrf.mxu0 }
 0x651   : > { %v5052_v43 = vpop.f32.mrf.mxu0 }
 0x652   : > { %2533 = vmax.xlane.f32.xlu0 %v2532_v1  ;;  %2518 = vmax.xlane.f32.xlu1 %v2517_v16 }
 0x653   : > { %v5062_v2 = vpop.f32.mrf.mxu0 }
 0x655   : > { %v5072_v3 = vpop.f32.mrf.mxu0 }
 0x656   : > { %2527 = vmax.xlane.f32.xlu0 %v2526_v47  ;;  %2512 = vmax.xlane.f32.xlu1 %v2511_v51 }
 0x657   : > { %v2449_v30 = vpop.f32.mrf.mxu0 }
 0x659   : > { %v2451_v35 = vpop.f32.mrf.mxu0 }
 0x65a   : > { %2521 = vmax.xlane.f32.xlu0 %v2520_v39 }
 0x65b   : > { %v2455_v33 = vpop.f32.mrf.mxu0 }
 0x65d   : > { %v2457_v38 = vpop.f32.mrf.mxu0 }
 0x65e   : > { %2515 = vmax.xlane.f32.xlu0 %v2514_v10 }
 0x65f   : > { %v2461_v18 = vpop.f32.mrf.mxu0 }
 0x661   : > { %v2463_v31 = vpop.f32.mrf.mxu0 }
 0x662   : > { %2509 = vmax.xlane.f32.xlu0 %v2508_v21 }
 0x663   : > { %v2467_v54 = vpop.f32.mrf.mxu0 }
 0x665   : > { %v2469_v16 = vpop.f32.mrf.mxu0 }
 0x667   : > { %v2473_v1 = vpop.f32.mrf.mxu0 }
 0x669   : > { %v2475_v49 = vpop.f32.mrf.mxu0 }
 0x66b   : > { %v2479_v51 = vpop.f32.mrf.mxu0 }
 0x66d   : > { %v2481_v47 = vpop.f32.mrf.mxu0 }
 0x66f   : > { %v2485_v39 = vpop.f32.mrf.mxu0 }
 0x670   : > { %v5112_v13 = vadd.f32 %v2485_v39, %v4929_v63 }
 0x671   : > { %v2487_v53 = vpop.f32.mrf.mxu0 }
 0x672   : > { %v5107_v21 = vadd.f32 %v2487_v53, %v4933_v0 }
 0x673   : > { %v2491_v7 = vpop.f32.mrf.mxu0 }
 0x674   : > { %v2592_v53 = vmax.f32 %v5112_v13, %v5107_v21 }
 0x675   : > { %v2493_v37 = vpop.f32.mrf.mxu0 }
 0x676   : > { %v5126_v50 = vadd.f32 %v2493_v37, %v4933_v0  ;;  %v5142_v37 = vadd.f32 %v2481_v47, %v4933_v0  ;;  %v5158_v47 = vadd.f32 %v2469_v16, %v4933_v0  ;;  %v5175_v16 = vadd.f32 %v2457_v38, %v4933_v0 }
 0x677   : > { %v2497_v6 = vpop.f32.mrf.mxu0 }
 0x678   : > { %v5101_v10 = vadd.f32 %v2497_v6, %v4929_v63 }
 0x679   : > { %v2499_v62 = vpop.f32.mrf.mxu0 }
 0x67a   : > { %5584 = vst [vmem:[#allocation40_spill] sm:$0xff] %v5101_v10  ;;  %v5104_v29 = vadd.f32 %v2499_v62, %v4933_v0  ;;  %v5121_v62 = vadd.f32 %v2475_v49, %v4933_v0 }
 0x67b   : > { %v2503_v27 = vpop.f32.mrf.mxu0 }
 0x67c   : > { %v2598_v4 = vmax.f32 %v5101_v10, %v5104_v29  ;;  %v5115_v40 = vadd.f32 %v2503_v27, %v4929_v63  ;;  %v5131_v10 = vadd.f32 %v2473_v1, %v4929_v63  ;;  %v5134_v27 = vadd.f32 %v2491_v7, %v4929_v63 }
 0x67d   : > { %v2505_v11 = vpop.f32.mrf.mxu0  ;;  %v5147_v1 = vadd.f32 %v2461_v18, %v4929_v63  ;;  %v5150_v7 = vadd.f32 %v2479_v51, %v4929_v63  ;;  %v5163_v18 = vadd.f32 %v2449_v30, %v4929_v63  ;;  %v5166_v51 = vadd.f32 %v2467_v54, %v4929_v63 }
 0x67e   : > { %v5118_v6 = vadd.f32 %v2505_v11, %v4933_v0  ;;  %2599 = vmax.xlane.f32.xlu0 %v2598_v4  ;;  %v5137_v11 = vadd.f32 %v2463_v31, %v4933_v0  ;;  %v2586_v4 = vmax.f32 %v5131_v10, %v5121_v62  ;;  %v2595_v49 = vmax.f32 %v5134_v27, %v5126_v50 }
 0x67f   : > { %v5153_v31 = vadd.f32 %v2451_v35, %v4933_v0  ;;  %v5170_v35 = vadd.f32 %v5052_v43, %v4933_v0  ;;  %v5181_v30 = vadd.f32 %v5038_v8, %v4929_v63  ;;  %v5184_v54 = vadd.f32 %v2455_v33, %v4929_v63 }
 0x680   : > { %v2601_v39 = vmax.f32 %v5115_v40, %v5118_v6  ;;  %v5188_v43 = vadd.f32 %v5007_v48, %v4933_v0  ;;  %v5200_v33 = vadd.f32 %v4995_v46, %v4929_v63  ;;  %v5208_v48 = vadd.f32 %v4967_v14, %v4933_v0 }
 0x681   : > { %v2568_v38 = vmax.f32 %v5181_v30, %v5170_v35  ;;  %v2577_v8 = vmax.f32 %v5184_v54, %v5175_v16 }
 0x682   : > { %2593 = vmax.xlane.f32.xlu0 %v2592_v53  ;;  %2602 = vmax.xlane.f32.xlu1 %v2601_v39  ;;  %v2580_v53 = vmax.f32 %v5147_v1, %v5137_v11  ;;  %v2589_v39 = vmax.f32 %v5150_v7, %v5142_v37  ;;  %5585 = vst [vmem:[#allocation41_spill] sm:$0xff] %v5200_v33  ;;  %5586 = vst [vmem:[#allocation42_spill] sm:$0xff] %v5208_v48 }
 0x686   : > { %2587 = vmax.xlane.f32.xlu0 %v2586_v4  ;;  %2596 = vmax.xlane.f32.xlu1 %v2595_v49  ;;  %v2574_v4 = vmax.f32 %v5163_v18, %v5153_v31  ;;  %v2583_v49 = vmax.f32 %v5166_v51, %v5158_v47 }
 0x68a   : > { %2581 = vmax.xlane.f32.xlu0 %v2580_v53  ;;  %2590 = vmax.xlane.f32.xlu1 %v2589_v39  ;;  %v5194_v53 = vadd.f32 %v5072_v3, %v4933_v0  ;;  %v5204_v39 = vadd.f32 %v5062_v2, %v4929_v63  ;;  %v2562_v3 = vmax.f32 %v5200_v33, %v5188_v43 }
 0x68b   : > { %v5220_v2 = vadd.f32 %v4955_v17, %v4929_v63  ;;  %v5236_v17 = vadd.f32 %v4975_v60, %v4929_v63 }
 0x68c   : > { %v2571_v46 = vmax.f32 %v5204_v39, %v5194_v53 }
 0x68d   : > { %5587 = vst [vmem:[#allocation43_spill] sm:$0xff] %v5220_v2  ;;  %v2556_v14 = vmax.f32 %v5220_v2, %v5208_v48  ;;  %5589 = vst [vmem:[#allocation27_spill] sm:$0xff] %v5236_v17 }
 0x68e   : > { %2575 = vmax.xlane.f32.xlu0 %v2574_v4  ;;  %2584 = vmax.xlane.f32.xlu1 %v2583_v49  ;;  %v5214_v4 = vadd.f32 %v5028_v12, %v4933_v0  ;;  %v5224_v49 = vadd.f32 %v5015_v61, %v4929_v63  ;;  %v5230_v12 = vadd.f32 %v4987_v20, %v4933_v0  ;;  %v2799_v0 = vld [vmem:[%s5590_s18 + $0x8] sm:$0xff] }
 0x690   : > { %5588 = vst [vmem:[#allocation28_spill] sm:$0xff] %v5230_v12  ;;  %v2559_v61 = vmax.f32 %v5236_v17, %v5230_v12 }
 0x692   : > { %2569 = vmax.xlane.f32.xlu0 %v2568_v38  ;;  %2578 = vmax.xlane.f32.xlu1 %v2577_v8  ;;  %v2565_v38 = vmax.f32 %v5224_v49, %v5214_v4  ;;  %v2798_v8 = vld [vmem:[%s5590_s18] sm:$0xff] }
 0x696   : > { %2563 = vmax.xlane.f32.xlu0 %v2562_v3  ;;  %2572 = vmax.xlane.f32.xlu1 %v2571_v46 }
 0x69a   : > { %2557 = vmax.xlane.f32.xlu0 %v2556_v14  ;;  %2566 = vmax.xlane.f32.xlu1 %v2565_v38 }
 0x69e   : > { %2560 = vmax.xlane.f32.xlu1 %v2559_v61 }
 0x6af   : > { %2802 = vperm.xlu1 %3434, %v2798_v8  }
 0x6b0   : > { %2807 = vperm.xlu0 %3433, %v2799_v0  }
 0x6c7   : > { %v2552_v20 = vpop.xlane.xlu1 %2551 }
 0x6c8   : > { %v2633_v63 = vsub.f32 %v4939_v28, %v2552_v20  ;;  %v2632_v14 = vsub.f32 %v4936_v41, %v2552_v20 }
 0x6ca   : > { %v2726_v2 = vmul.f32 1.442695, %v2633_v63  ;;  %v2724_v8 = vmul.f32 1.442695, %v2632_v14 }
 0x6cb   : > { %v2555_v60 = vpop.xlane.xlu0 %2554  ;;  %v2543_v33 = vpop.xlane.xlu1 %2542 }
 0x6cc   : > { %v2634_v3 = vsub.f32 %v4950_v24, %v2555_v60  ;;  %v2635_v46 = vsub.f32 %v4953_v19, %v2555_v60  ;;  %v2627_v20 = vsub.f32 %v4942_v57, %v2543_v33 }
 0x6ce   : > { %v2728_v38 = vmul.f32 1.442695, %v2634_v3  ;;  %v2730_v61 = vmul.f32 1.442695, %v2635_v46 }
 0x6cf   : > { %v2549_v48 = vpop.xlane.xlu0 %2548 }
 0x6d0   : > { %3567 = vpow2.f32 %v2728_v38  ;;  %v2631_v17 = vsub.f32 %v4963_v9, %v2549_v48  ;;  %v2630_v0 = vsub.f32 %v4973_v15, %v2549_v48  ;;  %v2626_v9 = vsub.f32 %v4947_v58, %v2543_v33 }
 0x6d1   : > { %3569 = vpow2.f32 %v2730_v61  ;;  %v2714_v15 = vmul.f32 1.442695, %v2627_v20 }
 0x6d2   : > { %3571 = vpow2.f32 %v2726_v2  ;;  %v2722_v28 = vmul.f32 1.442695, %v2631_v17  ;;  %v2720_v19 = vmul.f32 1.442695, %v2630_v0  ;;  %v2537_v2 = vpop.xlane.xlu1 %2536  ;;  %v2712_v46 = vmul.f32 1.442695, %v2626_v9 }
 0x6d3   : > { %v2546_v12 = vpop.xlane.xlu0 %2545  ;;  %3573 = vpow2.f32 %v2724_v8  ;;  %v2623_v57 = vsub.f32 %v4958_v5, %v2537_v2 }
 0x6d4   : > { %v2629_v24 = vsub.f32 %v4983_v22, %v2546_v12  ;;  %v2628_v41 = vsub.f32 %v4993_v45, %v2546_v12  ;;  %3575 = vpow2.f32 %v2722_v28 }
 0x6d5   : > { %3577 = vpow2.f32 %v2720_v19  ;;  %v2706_v61 = vmul.f32 1.442695, %v2623_v57 }
 0x6d6   : > { %v2718_v63 = vmul.f32 1.442695, %v2629_v24  ;;  %v2716_v3 = vmul.f32 1.442695, %v2628_v41  ;;  %v2531_v5 = vpop.xlane.xlu1 %2530 }
 0x6d7   : > { %v2540_v60 = vpop.xlane.xlu0 %2539 }
 0x6d8   : > { %3579 = vpow2.f32 %v2718_v63  ;;  %v2625_v48 = vsub.f32 %v5003_v42, %v2540_v60  ;;  %v2624_v45 = vsub.f32 %v5013_v44, %v2540_v60  ;;  %v2622_v42 = vsub.f32 %v4970_v55, %v2537_v2 }
 0x6d9   : > { %3581 = vpow2.f32 %v2716_v3  ;;  %v2619_v55 = vsub.f32 %v4978_v59, %v2531_v5 }
 0x6da   : > { %3583 = vpow2.f32 %v2714_v15  ;;  %v2710_v12 = vmul.f32 1.442695, %v2625_v48  ;;  %v2708_v14 = vmul.f32 1.442695, %v2624_v45  ;;  %v2704_v0 = vmul.f32 1.442695, %v2622_v42  ;;  %v2525_v15 = vpop.xlane.xlu1 %2524 }
 0x6db   : > { %v2534_v33 = vpop.xlane.xlu0 %2533  ;;  %3585 = vpow2.f32 %v2712_v46  ;;  %v2698_v9 = vmul.f32 1.442695, %v2619_v55  ;;  %v5591_v42 = vld [vmem:[#allocation35_spill] sm:$0xff] }
 0x6dc   : > { %3587 = vpow2.f32 %v2710_v12  ;;  %v2621_v44 = vsub.f32 %v5024_v25, %v2534_v33  ;;  %v2620_v28 = vsub.f32 %v5036_v56, %v2534_v33  ;;  %v2618_v25 = vsub.f32 %v4990_v26, %v2531_v5 }
 0x6dd   : > { %v3568_v17 = vpop.eup %3567  ;;  %3589 = vpow2.f32 %v2708_v14  ;;  %v2615_v26 = vsub.f32 %v4998_v34, %v2525_v15 }
 0x6de   : > { %v3570_v22 = vpop.eup %3569  ;;  %3591 = vpow2.f32 %v2706_v61  ;;  %v2702_v19 = vmul.f32 1.442695, %v2621_v44  ;;  %v2700_v63 = vmul.f32 1.442695, %v2620_v28  ;;  %v2696_v59 = vmul.f32 1.442695, %v2618_v25  ;;  %v2519_v33 = vpop.xlane.xlu1 %2518 }
 0x6df   : > { %2893 = vmatprep.subr.mxu0 %v3570_v22  ;;  %2970 = vmatprep.subr.mxu1 %v3570_v22  ;;  %v3572_v58 = vpop.eup %3571  ;;  %v2528_v20 = vpop.xlane.xlu0 %2527  ;;  %3593 = vpow2.f32 %v2704_v0  ;;  %v2690_v12 = vmul.f32 1.442695, %v2615_v26  ;;  %v5592_v61 = vld [vmem:[#allocation31_spill] sm:$0xff]  ;;  %v5597_v26 = vld [vmem:[#allocation34_spill] sm:$0xff] }
 0x6e0   : > { %2894 = vmatpush1.xpose.msra.mxu0 %v3568_v17  ;;  %2971 = vmatpush1.xpose.msra.mxu1 %v3568_v17  ;;  %v3574_v38 = vpop.eup %3573  ;;  %3595 = vpow2.f32 %v2702_v19  ;;  %v2617_v56 = vsub.f32 %v5048_v36, %v2528_v20  ;;  %v2616_v48 = vsub.f32 %v5060_v52, %v2528_v20  ;;  %v2614_v36 = vsub.f32 %v5010_v32, %v2525_v15  ;;  %v5594_v19 = vld [vmem:[#allocation36_spill] sm:$0xff] }
 0x6e1   : > { %2895 = vmatprep.subr.mxu0 %v3572_v58  ;;  %2972 = vmatprep.subr.mxu1 %v3572_v58  ;;  %v3576_v8 = vpop.eup %3575  ;;  %3597 = vpow2.f32 %v2700_v63  ;;  %v2611_v32 = vsub.f32 %v5592_v61, %v2519_v33 }
 0x6e2   : > { %v3578_v24 = vpop.eup %3577  ;;  %3599 = vpow2.f32 %v2698_v9  ;;  %v2694_v17 = vmul.f32 1.442695, %v2617_v56  ;;  %v2692_v45 = vmul.f32 1.442695, %v2616_v48  ;;  %v2688_v34 = vmul.f32 1.442695, %v2614_v36  ;;  %v2513_v25 = vpop.xlane.xlu1 %2512 }
 0x6e3   : > { %v2522_v46 = vpop.xlane.xlu0 %2521  ;;  %3601 = vpow2.f32 %v2696_v59  ;;  %v2682_v55 = vmul.f32 1.442695, %v2611_v32 }
 0x6e4   : > { %2896 = vmatpush1.xpose.msra.mxu0 %v3574_v38  ;;  %2973 = vmatpush1.xpose.msra.mxu1 %v3574_v38  ;;  %3603 = vpow2.f32 %v2694_v17  ;;  %v2613_v52 = vsub.f32 %v5068_v23, %v2522_v46  ;;  %v2612_v14 = vsub.f32 %v5591_v42, %v2522_v46  ;;  %v5593_v23 = vld [vmem:[#allocation32_spill] sm:$0xff]  ;;  %v2606_v17 = vsub.f32 %v5597_v26, %v2513_v25 }
 0x6e5   : > { %2897 = vmatprep.subr.mxu0 %v3576_v8  ;;  %2974 = vmatprep.subr.mxu1 %v3576_v8  ;;  %v3580_v41 = vpop.eup %3579  ;;  %3605 = vpow2.f32 %v2692_v45  ;;  %v2610_v0 = vsub.f32 %v5593_v23, %v2519_v33  ;;  %v5598_v45 = vld [vmem:[#allocation38_spill] sm:$0xff] }
 0x6e6   : > { %v3582_v60 = vpop.eup %3581  ;;  %3607 = vpow2.f32 %v2690_v12  ;;  %v2686_v44 = vmul.f32 1.442695, %v2613_v52  ;;  %v2684_v28 = vmul.f32 1.442695, %v2612_v14  ;;  %v2672_v52 = vmul.f32 1.442695, %v2606_v17 }
 0x6e7   : > { %v3584_v3 = vpop.eup %3583  ;;  %v2516_v5 = vpop.xlane.xlu0 %2515  ;;  %3609 = vpow2.f32 %v2688_v34  ;;  %v2680_v63 = vmul.f32 1.442695, %v2610_v0 }
 0x6e8   : > { %2898 = vmatpush1.xpose.msra.mxu0 %v3578_v24  ;;  %2975 = vmatpush1.xpose.msra.mxu1 %v3578_v24  ;;  %v3586_v2 = vpop.eup %3585  ;;  %3611 = vpow2.f32 %v2686_v44 }
 0x6e9   : > { %2899 = vmatprep.subr.mxu0 %v3580_v41  ;;  %2976 = vmatprep.subr.mxu1 %v3580_v41  ;;  %v3588_v22 = vpop.eup %3587  ;;  %v2609_v41 = vsub.f32 %v5594_v19, %v2516_v5  ;;  %3613 = vpow2.f32 %v2684_v28 }
 0x6ea   : > { %v3590_v57 = vpop.eup %3589  ;;  %3615 = vpow2.f32 %v2682_v55 }
 0x6eb   : > { %v3592_v58 = vpop.eup %3591  ;;  %v2678_v59 = vmul.f32 1.442695, %v2609_v41  ;;  %3617 = vpow2.f32 %v2680_v63 }
 0x6ec   : > { %2900 = vmatpush1.xpose.msra.mxu0 %v3582_v60  ;;  %2977 = vmatpush1.xpose.msra.mxu1 %v3582_v60  ;;  %v3594_v38 = vpop.eup %3593  ;;  %v5595_v60 = vld [vmem:[#allocation37_spill] sm:$0xff] }
 0x6ed   : > { %2901 = vmatprep.subr.mxu0 %v3584_v3  ;;  %2978 = vmatprep.subr.mxu1 %v3584_v3  ;;  %v3596_v8 = vpop.eup %3595  ;;  %v2608_v9 = vsub.f32 %v5595_v60, %v2516_v5  ;;  %v5596_v3 = vld [vmem:[#allocation33_spill] sm:$0xff]  ;;  %3619 = vpow2.f32 %v2678_v59 }
 0x6ee   : > { %v3598_v24 = vpop.eup %3597  ;;  %v2607_v15 = vsub.f32 %v5596_v3, %v2513_v25 }
 0x6ef   : > { %v3600_v20 = vpop.eup %3599 }
 0x6f0   : > { %2902 = vmatpush1.xpose.msra.mxu0 %v3586_v2  ;;  %2979 = vmatpush1.xpose.msra.mxu1 %v3586_v2  ;;  %v3602_v56 = vpop.eup %3601  ;;  %v2510_v2 = vpop.xlane.xlu0 %2509  ;;  %v2674_v36 = vmul.f32 1.442695, %v2607_v15 }
 0x6f1   : > { %2903 = vmatprep.subr.mxu0 %v3588_v22  ;;  %2980 = vmatprep.subr.mxu1 %v3588_v22  ;;  %v3604_v48 = vpop.eup %3603  ;;  %v2676_v22 = vmul.f32 1.442695, %v2608_v9 }
 0x6f2   : > { %v3606_v46 = vpop.eup %3605 }
 0x6f3   : > { %v3608_v12 = vpop.eup %3607  ;;  %3621 = vpow2.f32 %v2676_v22 }
 0x6f4   : > { %2904 = vmatpush1.xpose.msra.mxu0 %v3590_v57  ;;  %2981 = vmatpush1.xpose.msra.mxu1 %v3590_v57  ;;  %v2605_v57 = vsub.f32 %v5598_v45, %v2510_v2  ;;  %v3610_v34 = vpop.eup %3609  ;;  %3623 = vpow2.f32 %v2674_v36 }
 0x6f5   : > { %2905 = vmatprep.subr.mxu0 %v3592_v58  ;;  %2982 = vmatprep.subr.mxu1 %v3592_v58  ;;  %v5599_v58 = vld [vmem:[#allocation39_spill] sm:$0xff]  ;;  %v3612_v14 = vpop.eup %3611  ;;  %3625 = vpow2.f32 %v2672_v52 }
 0x6f6   : > { %v2604_v33 = vsub.f32 %v5599_v58, %v2510_v2  ;;  %v2670_v42 = vmul.f32 1.442695, %v2605_v57  ;;  %v3614_v32 = vpop.eup %3613 }
 0x6f8   : > { %2906 = vmatpush1.xpose.msra.mxu0 %v3594_v38  ;;  %2983 = vmatpush1.xpose.msra.mxu1 %v3594_v38  ;;  %v2668_v38 = vmul.f32 1.442695, %v2604_v33  ;;  %3627 = vpow2.f32 %v2670_v42 }
 0x6f9   : > { %2907 = vmatprep.subr.mxu0 %v3596_v8  ;;  %2984 = vmatprep.subr.mxu1 %v3596_v8  ;;  %v3616_v8 = vpop.eup %3615 }
 0x6fa   : > { %3629 = vpow2.f32 %v2668_v38 }
 0x6fc   : > { %2908 = vmatpush1.xpose.msra.mxu0 %v3598_v24  ;;  %2985 = vmatpush1.xpose.msra.mxu1 %v3598_v24  ;;  %v3618_v24 = vpop.eup %3617 }
 0x6fd   : > { %2909 = vmatprep.subr.mxu0 %v3600_v20  ;;  %2986 = vmatprep.subr.mxu1 %v3600_v20  ;;  %v3620_v41 = vpop.eup %3619  ;;  %v5600_v20 = vld [vmem:[#allocation40_spill] sm:$0xff] }
 0x700   : > { %2910 = vmatpush1.xpose.msra.mxu0 %v3602_v56  ;;  %2987 = vmatpush1.xpose.msra.mxu1 %v3602_v56 }
 0x701   : > { %2911 = vmatprep.subr.mxu0 %v3604_v48  ;;  %2988 = vmatprep.subr.mxu1 %v3604_v48 }
 0x704   : > { %2912 = vmatpush1.xpose.msra.mxu0 %v3606_v46  ;;  %2989 = vmatpush1.xpose.msra.mxu1 %v3606_v46 }
 0x705   : > { %2913 = vmatprep.subr.mxu0 %v3608_v12  ;;  %2990 = vmatprep.subr.mxu1 %v3608_v12 }
 0x707   : > { %v2600_v61 = vpop.xlane.xlu0 %2599 }
 0x708   : > { %2914 = vmatpush1.xpose.msra.mxu0 %v3610_v34  ;;  %2991 = vmatpush1.xpose.msra.mxu1 %v3610_v34  ;;  %v2665_v23 = vsub.f32 %v5104_v29, %v2600_v61  ;;  %v2664_v25 = vsub.f32 %v5600_v20, %v2600_v61  ;;  %v3622_v29 = vpop.eup %3621 }
 0x709   : > { %2915 = vmatprep.subr.mxu0 %v3612_v14  ;;  %2992 = vmatprep.subr.mxu1 %v3612_v14  ;;  %v3624_v9 = vpop.eup %3623 }
 0x70a   : > { %v2790_v63 = vmul.f32 1.442695, %v2665_v23  ;;  %v2788_v56 = vmul.f32 1.442695, %v2664_v25 }
 0x70b   : > { %v2603_v44 = vpop.xlane.xlu1 %2602 }
 0x70c   : > { %2916 = vmatpush1.xpose.msra.mxu0 %v3614_v32  ;;  %2993 = vmatpush1.xpose.msra.mxu1 %v3614_v32  ;;  %v2666_v5 = vsub.f32 %v5115_v40, %v2603_v44  ;;  %v2667_v0 = vsub.f32 %v5118_v6, %v2603_v44  ;;  %v2594_v40 = vpop.xlane.xlu0 %2593 }
 0x70d   : > { %2917 = vmatprep.subr.mxu0 %v3616_v8  ;;  %2994 = vmatprep.subr.mxu1 %v3616_v8  ;;  %v2661_v15 = vsub.f32 %v5107_v21, %v2594_v40  ;;  %v2660_v26 = vsub.f32 %v5112_v13, %v2594_v40 }
 0x70e   : > { %v2792_v28 = vmul.f32 1.442695, %v2666_v5  ;;  %v2794_v55 = vmul.f32 1.442695, %v2667_v0 }
 0x70f   : > { %v2597_v19 = vpop.xlane.xlu1 %2596  ;;  %v2782_v22 = vmul.f32 1.442695, %v2661_v15  ;;  %v2780_v45 = vmul.f32 1.442695, %v2660_v26 }
 0x710   : > { %2918 = vmatpush1.xpose.msra.mxu0 %v3618_v24  ;;  %2995 = vmatpush1.xpose.msra.mxu1 %v3618_v24  ;;  %v2663_v60 = vsub.f32 %v5126_v50, %v2597_v19  ;;  %3631 = vpow2.f32 %v2792_v28  ;;  %v2662_v3 = vsub.f32 %v5134_v27, %v2597_v19  ;;  %v3626_v50 = vpop.eup %3625  ;;  %v2588_v46 = vpop.xlane.xlu0 %2587 }
 0x711   : > { %2919 = vmatprep.subr.mxu0 %v3620_v41  ;;  %2996 = vmatprep.subr.mxu1 %v3620_v41  ;;  %3633 = vpow2.f32 %v2794_v55  ;;  %v3628_v2 = vpop.eup %3627  ;;  %v2657_v13 = vsub.f32 %v5121_v62, %v2588_v46  ;;  %v2656_v33 = vsub.f32 %v5131_v10, %v2588_v46  ;;  %v5302_v28 = vpop.f32.mrf.mxu1 }
 0x712   : > { %3635 = vpow2.f32 %v2790_v63  ;;  %v2786_v59 = vmul.f32 1.442695, %v2663_v60  ;;  %v2784_v17 = vmul.f32 1.442695, %v2662_v3  ;;  %v3630_v21 = vpop.eup %3629 }
 0x713   : > { %v2591_v6 = vpop.xlane.xlu1 %2590  ;;  %3637 = vpow2.f32 %v2788_v56  ;;  %v2774_v42 = vmul.f32 1.442695, %v2657_v13  ;;  %v2772_v61 = vmul.f32 1.442695, %v2656_v33  ;;  %v2884_v25 = vpop.f32.mrf.mxu1  ;;  %v5602_v33 = vld [vmem:[#allocation28_spill] sm:$0xff] }
 0x714   : > { %2920 = vmatpush1.xpose.msra.mxu0 %v3622_v29  ;;  %2997 = vmatpush1.xpose.msra.mxu1 %v3622_v29  ;;  %3639 = vpow2.f32 %v2786_v59  ;;  %v2659_v27 = vsub.f32 %v5142_v37, %v2591_v6  ;;  %v2658_v57 = vsub.f32 %v5150_v7, %v2591_v6  ;;  %v2582_v38 = vpop.xlane.xlu0 %2581 }
 0x715   : > { %2921 = vmatprep.subr.mxu0 %v3624_v9  ;;  %2998 = vmatprep.subr.mxu1 %v3624_v9  ;;  %3641 = vpow2.f32 %v2784_v17  ;;  %v2653_v44 = vsub.f32 %v5137_v11, %v2582_v38  ;;  %v2652_v23 = vsub.f32 %v5147_v1, %v2582_v38 }
 0x716   : > { %3643 = vpow2.f32 %v2782_v22  ;;  %v2778_v12 = vmul.f32 1.442695, %v2659_v27  ;;  %v2776_v34 = vmul.f32 1.442695, %v2658_v57 }
 0x717   : > { %v2585_v48 = vpop.xlane.xlu1 %2584  ;;  %3645 = vpow2.f32 %v2780_v45  ;;  %v2764_v20 = vmul.f32 1.442695, %v2652_v23 }
 0x718   : > { %2922 = vmatpush1.xpose.msra.mxu0 %v3626_v50  ;;  %2999 = vmatpush1.xpose.msra.mxu1 %v3626_v50  ;;  %3647 = vpow2.f32 %v2778_v12  ;;  %v2655_v14 = vsub.f32 %v5158_v47, %v2585_v48  ;;  %v2654_v32 = vsub.f32 %v5166_v51, %v2585_v48  ;;  %v2766_v51 = vmul.f32 1.442695, %v2653_v44  ;;  %v2576_v19 = vpop.xlane.xlu0 %2575  ;;  %v5605_v44 = vld [vmem:[#allocation43_spill] sm:$0xff] }
 0x719   : > { %2923 = vmatprep.subr.mxu0 %v3628_v2  ;;  %3000 = vmatprep.subr.mxu1 %v3628_v2  ;;  %3649 = vpow2.f32 %v2776_v34  ;;  %v2649_v60 = vsub.f32 %v5153_v31, %v2576_v19  ;;  %v2648_v6 = vsub.f32 %v5163_v18, %v2576_v19 }
 0x71a   : > { %3651 = vpow2.f32 %v2774_v42  ;;  %v2770_v8 = vmul.f32 1.442695, %v2655_v14  ;;  %v2768_v0 = vmul.f32 1.442695, %v2654_v32  ;;  %v5603_v14 = vld [vmem:[#allocation27_spill] sm:$0xff] }
 0x71b   : > { %v5287_v36 = vpop.xlane.xlu1 %2578  ;;  %3653 = vpow2.f32 %v2772_v61  ;;  %v2756_v59 = vmul.f32 1.442695, %v2648_v6 }
 0x71c   : > { %2924 = vmatpush1.xpose.msra.mxu0 %v3630_v21  ;;  %3001 = vmatpush1.xpose.msra.mxu1 %v3630_v21  ;;  %3655 = vpow2.f32 %v2770_v8  ;;  %v2651_v11 = vsub.f32 %v5175_v16, %v5287_v36  ;;  %v2650_v1 = vsub.f32 %v5184_v54, %v5287_v36  ;;  %v2758_v54 = vmul.f32 1.442695, %v2649_v60  ;;  %v2570_v15 = vpop.xlane.xlu0 %2569 }
 0x71d   : > { %v3632_v52 = vpop.eup %3631  ;;  %3657 = vpow2.f32 %v2768_v0  ;;  %v2645_v48 = vsub.f32 %v5170_v35, %v2570_v15 }
 0x71e   : > { %v3634_v37 = vpop.eup %3633  ;;  %3659 = vpow2.f32 %v2766_v51  ;;  %v2762_v40 = vmul.f32 1.442695, %v2651_v11  ;;  %v2760_v9 = vmul.f32 1.442695, %v2650_v1 }
 0x71f   : > { %v5291_v58 = vpop.xlane.xlu1 %2572  ;;  %2925 = vmatprep.subr.mxu0 %v3634_v37  ;;  %3002 = vmatprep.subr.mxu1 %v3634_v37  ;;  %v3636_v7 = vpop.eup %3635  ;;  %3661 = vpow2.f32 %v2764_v20  ;;  %v2750_v27 = vmul.f32 1.442695, %v2645_v48 }
 0x720   : > { %2926 = vmatpush2.xpose.msra.mxu0 %v3632_v52  ;;  %3003 = vmatpush2.xpose.msra.mxu1 %v3632_v52  ;;  %v3638_v10 = vpop.eup %3637  ;;  %3663 = vpow2.f32 %v2762_v40  ;;  %v2647_v3 = vsub.f32 %v5194_v53, %v5291_v58  ;;  %v2646_v50 = vsub.f32 %v5204_v39, %v5291_v58  ;;  %v2644_v53 = vsub.f32 %v5181_v30, %v2570_v15  ;;  %v2564_v21 = vpop.xlane.xlu0 %2563 }
 0x721   : > { %2927 = vmatprep.subr.mxu0 %v3636_v7  ;;  %3004 = vmatprep.subr.mxu1 %v3636_v7  ;;  %v3640_v47 = vpop.eup %3639  ;;  %3665 = vpow2.f32 %v2760_v9  ;;  %v2641_v30 = vsub.f32 %v5188_v43, %v2564_v21 }
 0x722   : > { %v3642_v24 = vpop.eup %3641  ;;  %3667 = vpow2.f32 %v2758_v54  ;;  %v2754_v2 = vmul.f32 1.442695, %v2647_v3  ;;  %v2752_v17 = vmul.f32 1.442695, %v2646_v50  ;;  %v2748_v35 = vmul.f32 1.442695, %v2644_v53 }
 0x723   : > { %v5295_v62 = vpop.xlane.xlu1 %2566  ;;  %v3644_v55 = vpop.eup %3643  ;;  %3669 = vpow2.f32 %v2756_v59  ;;  %v2742_v37 = vmul.f32 1.442695, %v2641_v30 }
 0x724   : > { %2928 = vmatpush2.xpose.msra.mxu0 %v3638_v10  ;;  %3005 = vmatpush2.xpose.msra.mxu1 %v3638_v10  ;;  %v3646_v63 = vpop.eup %3645  ;;  %3671 = vpow2.f32 %v2754_v2  ;;  %v2643_v39 = vsub.f32 %v5214_v4, %v5295_v62  ;;  %v2642_v36 = vsub.f32 %v5224_v49, %v5295_v62  ;;  %v5601_v4 = vld [vmem:[#allocation41_spill] sm:$0xff]  ;;  %v2558_v42 = vpop.xlane.xlu0 %2557  ;;  %v5604_v62 = vld [vmem:[#allocation42_spill] sm:$0xff] }
 0x725   : > { %2929 = vmatprep.subr.mxu0 %v3640_v47  ;;  %3006 = vmatprep.subr.mxu1 %v3640_v47  ;;  %v3648_v29 = vpop.eup %3647  ;;  %3673 = vpow2.f32 %v2752_v17  ;;  %v2640_v12 = vsub.f32 %v5601_v4, %v2564_v21  ;;  %v2637_v61 = vsub.f32 %v5604_v62, %v2558_v42  ;;  %v2636_v8 = vsub.f32 %v5605_v44, %v2558_v42 }
 0x726   : > { %v3650_v56 = vpop.eup %3649  ;;  %3675 = vpow2.f32 %v2750_v27  ;;  %v2746_v57 = vmul.f32 1.442695, %v2643_v39  ;;  %v2744_v52 = vmul.f32 1.442695, %v2642_v36 }
 0x727   : > { %v5299_v5 = vpop.xlane.xlu1 %2560  ;;  %v3652_v31 = vpop.eup %3651  ;;  %3677 = vpow2.f32 %v2748_v35  ;;  %v2740_v43 = vmul.f32 1.442695, %v2640_v12  ;;  %v2734_v0 = vmul.f32 1.442695, %v2637_v61 }
 0x728   : > { %2930 = vmatpush2.xpose.msra.mxu0 %v3642_v24  ;;  %3007 = vmatpush2.xpose.msra.mxu1 %v3642_v24  ;;  %v3654_v18 = vpop.eup %3653  ;;  %3679 = vpow2.f32 %v2746_v57  ;;  %v2639_v49 = vsub.f32 %v5602_v33, %v5299_v5  ;;  %v2638_v7 = vsub.f32 %v5603_v14, %v5299_v5  ;;  %v2732_v5 = vmul.f32 1.442695, %v2636_v8 }
 0x729   : > { %2931 = vmatprep.subr.mxu0 %v3644_v55  ;;  %3008 = vmatprep.subr.mxu1 %v3644_v55  ;;  %v3656_v26 = vpop.eup %3655  ;;  %3681 = vpow2.f32 %v2744_v52 }
 0x72a   : > { %v3658_v22 = vpop.eup %3657  ;;  %3683 = vpow2.f32 %v2742_v37  ;;  %v2738_v32 = vmul.f32 1.442695, %v2639_v49  ;;  %v2736_v47 = vmul.f32 1.442695, %v2638_v7 }
 0x72b   : > { %v5306_v41 = vpop.permute.xlu1 %2802  ;;  %v3660_v46 = vpop.eup %3659  ;;  %3685 = vpow2.f32 %v2740_v43 }
 0x72c   : > { %v2885_v16 = vadd.f32 %v2884_v25, %v5306_v41  ;;  %2932 = vmatpush2.xpose.msra.mxu0 %v3646_v63  ;;  %3009 = vmatpush2.xpose.msra.mxu1 %v3646_v63  ;;  %v3662_v45 = vpop.eup %3661  ;;  %3687 = vpow2.f32 %v2738_v32  ;;  %v2888_v63 = vpop.f32.mrf.mxu1  ;;  %v2883_v6 = vadd.f32 %v5302_v28, %v5306_v41 }
 0x72d   : > { %2933 = vmatprep.subr.mxu0 %v3648_v29  ;;  %3010 = vmatprep.subr.mxu1 %v3648_v29  ;;  %v3664_v13 = vpop.eup %3663  ;;  %3689 = vpow2.f32 %v2736_v47  ;;  %v2808_v29 = vpop.permute.xlu0 %2807 }
 0x72e   : > { %2957 = vmatprep.mubr.f32.mxu0 %v2885_v16  ;;  %v3666_v58 = vpop.eup %3665  ;;  %3691 = vpow2.f32 %v2734_v0  ;;  %v2890_v16 = vpop.f32.mrf.mxu1  ;;  %v2889_v54 = vadd.f32 %v2888_v63, %v2808_v29 }
 0x72f   : > { %v3668_v34 = vpop.eup %3667  ;;  %3693 = vpow2.f32 %v2732_v5  ;;  %v2891_v9 = vadd.f32 %v2890_v16, %v2808_v29 }
 0x730   : > { %2934 = vmatpush2.xpose.msra.mxu0 %v3650_v56  ;;  %3011 = vmatpush2.xpose.msra.mxu1 %v3650_v56  ;;  %v3670_v38 = vpop.eup %3669  ;;  %v5607_v56 = vmov 1.0  }
 0x731   : > { %2935 = vmatprep.subr.mxu0 %v3652_v31  ;;  %3012 = vmatprep.subr.mxu1 %v3652_v31  ;;  %v3672_v10 = vpop.eup %3671 }
 0x732   : > { %v3674_v23 = vpop.eup %3673 }
 0x733   : > { %v3676_v24 = vpop.eup %3675 }
 0x734   : > { %2936 = vmatpush2.xpose.msra.mxu0 %v3654_v18  ;;  %3013 = vmatpush2.xpose.msra.mxu1 %v3654_v18  ;;  %v3678_v51 = vpop.eup %3677 }
 0x735   : > { %2937 = vmatprep.subr.mxu0 %v3656_v26  ;;  %3014 = vmatprep.subr.mxu1 %v3656_v26  ;;  %v3680_v11 = vpop.eup %3679 }
 0x736   : > { %v3682_v55 = vpop.eup %3681 }
 0x737   : > { %v3684_v19 = vpop.eup %3683 }
 0x738   : > { %2938 = vmatpush2.xpose.msra.mxu0 %v3658_v22  ;;  %3015 = vmatpush2.xpose.msra.mxu1 %v3658_v22  ;;  %v3686_v20 = vpop.eup %3685 }
 0x739   : > { %2939 = vmatprep.subr.mxu0 %v3660_v46  ;;  %3016 = vmatprep.subr.mxu1 %v3660_v46  ;;  %v3688_v1 = vpop.eup %3687 }
 0x73a   : > { %v3690_v25 = vpop.eup %3689 }
 0x73b   : > { %v3692_v60 = vpop.eup %3691 }
 0x73c   : > { %2940 = vmatpush2.xpose.msra.mxu0 %v3662_v45  ;;  %3017 = vmatpush2.xpose.msra.mxu1 %v3662_v45  ;;  %v3694_v40 = vpop.eup %3693 }
 0x73d   : > { %2941 = vmatprep.subr.mxu0 %v3664_v13  ;;  %3018 = vmatprep.subr.mxu1 %v3664_v13 }
 0x740   : > { %2942 = vmatpush2.xpose.msra.mxu0 %v3666_v58  ;;  %3019 = vmatpush2.xpose.msra.mxu1 %v3666_v58 }
 0x741   : > { %2943 = vmatprep.subr.mxu0 %v3668_v34  ;;  %3020 = vmatprep.subr.mxu1 %v3668_v34 }
 0x744   : > { %2944 = vmatpush2.xpose.msra.mxu0 %v3670_v38  ;;  %3021 = vmatpush2.xpose.msra.mxu1 %v3670_v38 }
 0x745   : > { %2945 = vmatprep.subr.mxu0 %v3672_v10  ;;  %3022 = vmatprep.subr.mxu1 %v3672_v10 }
 0x748   : > { %2946 = vmatpush2.xpose.msra.mxu0 %v3674_v23  ;;  %3023 = vmatpush2.xpose.msra.mxu1 %v3674_v23 }
 0x749   : > { %2947 = vmatprep.subr.mxu0 %v3676_v24  ;;  %3024 = vmatprep.subr.mxu1 %v3676_v24 }
 0x74c   : > { %2948 = vmatpush2.xpose.msra.mxu0 %v3678_v51  ;;  %3025 = vmatpush2.xpose.msra.mxu1 %v3678_v51 }
 0x74d   : > { %2949 = vmatprep.subr.mxu0 %v3680_v11  ;;  %3026 = vmatprep.subr.mxu1 %v3680_v11 }
 0x750   : > { %2950 = vmatpush2.xpose.msra.mxu0 %v3682_v55  ;;  %3027 = vmatpush2.xpose.msra.mxu1 %v3682_v55 }
 0x751   : > { %2951 = vmatprep.subr.mxu0 %v3684_v19  ;;  %3028 = vmatprep.subr.mxu1 %v3684_v19 }
 0x754   : > { %2952 = vmatpush2.xpose.msra.mxu0 %v3686_v20  ;;  %3029 = vmatpush2.xpose.msra.mxu1 %v3686_v20 }
 0x755   : > { %2953 = vmatprep.subr.mxu0 %v3688_v1  ;;  %3030 = vmatprep.subr.mxu1 %v3688_v1 }
 0x758   : > { %2954 = vmatpush2.xpose.msra.mxu0 %v3690_v25  ;;  %3031 = vmatpush2.xpose.msra.mxu1 %v3690_v25 }
 0x759   : > { %2955 = vmatprep.subr.mxu0 %v3692_v60  ;;  %3032 = vmatprep.subr.mxu1 %v3692_v60 }
 0x75c   : > { %2956 = vmatpush2.xpose.msra.mxu0 %v3694_v40  ;;  %3033 = vmatpush2.xpose.msra.mxu1 %v3694_v40 }
 0x75f   : > { %2958 = vmatmul.mubr.f32.vlgmr.msra.gmra.mxu0 %v2883_v6  ;;  %3035 = vmatmul.mubr.f32.vlgmr.msra.gmra.mxu1 %v5607_v56 }
 0x760   : > { %2963 = vmatprep.mubr.f32.mxu0 %v2891_v9 }
 0x763   : > { %2964 = vmatmul.mubr.f32.gmra.mxu0 %v2889_v54 }
 0x764   : > { %3828 = shalt.err (!%p3825_p4)
}
 0x765   : > { %s3829_s11 = scalar_lea.hbm %s5343_s19, 512  ;;  %s3833_s8 = scalar_lea.hbm %s5608_s21, 1024 }
 0x766   : > { %p3830_p5 = scmp.ne.s32.totalorder %s5343_s19, %s3829_s11  ;;  %p3834_p2 = scmp.lt.s32.totalorder %s5343_s19, %s5608_s21 }
 0x767   : > { %p3835_p6 = scmp.lt.s32.totalorder %s3833_s8, %s3829_s11 }
 0x768   : > { %p3831_p7 = pnand %p3830_p5, %p5609_p10 }
 0x769   : > { %p3836_p12 = por %p3835_p6, %p3834_p2 }
 0x76a   : > { %p3832_p8 = pneg %p3831_p7 }
 0x76c   : > { %p3837_p0 = pnand %p3836_p12, %p3832_p8 }
 0x76e   : > { %3840 = shalt.err (!%p3837_p0)
}
 0x76f   : > { %s5505_s23 = smov 256   ;;  %s3934_s28 = smov 16   ;;  %v5610_v2 = vld [vmem:[#allocation30_spill] sm:$0xff]  ;;  %v3703_v46 = vld [vmem:[%s4225_s27] sm:$0xff]  ;;  %v3704_v35 = vld [vmem:[%s4225_s27 + $0x10] sm:$0xff] }
 0x770   : > { %3361 = dma.vmem_to_hbm [thread:$0]  (%p5609_p10), %s5335_s9, 512, %s5343_s19, %s3068_s30, %s5505_s23, %s5505_s23, %s3934_s28  }
 0x771   : > { %s3041_s25 = sld [smem:[#allocation3]]  ;;  %s648_s9 = scalar_lea.vmem [#allocation13], %s4213_s0  ;;  %v3705_v57 = vld [vmem:[%s4225_s27 + $0x8] sm:$0xff]  ;;  %v3706_v4 = vld [vmem:[%s4225_s27 + $0x18] sm:$0xff] }
 0x772   : > { %s3102_s19 = sshll.u32 %s648_s9, 4  ;;  %s5611_s0 = sshll.u32 %s4053_s15, 9  ;;  %s5376_s19 = int_to_ptr.vmem [resolvable:$true] %s3102_s19 }
 0x773   : > { %s5612_s11 = sld [smem:[#allocation51_spill]]  ;;  %s3073_s24 = scalar_lea.sflag [#allocation14], %s4210_s22 }
 0x774   : > { %s3841_s8 = scalar_lea.vmem %s5376_s19, 512  ;;  %s3935_s16 = smov [#allocation13]  }
 0x775   : > { %p3842_p3 = scmp.ne.s32.totalorder %s5376_s19, %s3841_s8 }
 0x777   : > { %v3044_v15 = vstv %s3041_s25  ;;  %p3843_p11 = pnand %p3842_p3, %p5609_p10  ;;  %s3845_s25 = sshll.u32 %s3935_s16, 4  ;;  %s3846_s25 = int_to_ptr.vmem [resolvable:$false] %s3845_s25 }
 0x778   : > { %s3847_s23 = scalar_lea.vmem %s3846_s25, 1024  ;;  %p3848_p13 = scmp.lt.s32.totalorder %s5376_s19, %s3846_s25 }
 0x779   : > { %s5385_s26 = scalar_lea.hbm %s5612_s11, %s5611_s0  ;;  %p3844_p9 = pneg %p3843_p11 }
 0x77a   : > { %p3849_p1 = scmp.lt.s32.totalorder %s3847_s23, %s3841_s8 }
 0x77c   : > { %p3850_p4 = por %p3849_p1, %p3848_p13 }
 0x77e   : > { %p3851_p5 = pnand %p3850_p4, %p3844_p9 }
 0x81f   : > { %v3036_v28 = vpop.f32.mrf.mxu1  ;;  %v2959_v3 = vpop.f32.mrf.mxu0 }
 0x820   : > { %3695 = vrcp.f32 %v3036_v28 }
 0x821   : > { %v3038_v41 = vpop.f32.mrf.mxu1  ;;  %v2961_v31 = vpop.f32.mrf.mxu0 }
 0x822   : > { %3697 = vrcp.f32 %v3038_v41 }
 0x823   : > { %v2965_v48 = vpop.f32.mrf.mxu0 }
 0x825   : > { %v2967_v39 = vpop.f32.mrf.mxu0 }
 0x82d   : > { %v3696_v59 = vpop.eup %3695 }
 0x82e   : > { %v3045_v50 = vmul.f32 %v3696_v59, %v3044_v15 }
 0x82f   : > { %v3698_v18 = vpop.eup %3697 }
 0x830   : > { %v3050_v26 = vrot.slane %v3045_v50, %v5610_v2  ;;  %v3046_v53 = vmul.f32 %v3698_v18, %v3044_v15 }
 0x832   : > { %v3055_v17 = vmul.f32 %v3050_v26, %v2959_v3  ;;  %v3057_v22 = vmul.f32 %v3050_v26, %v2965_v48  ;;  %v3054_v27 = vrot.slane %v3046_v53, %v5610_v2 }
 0x834   : > { %v3059_v21 = vadd.f32 %v3703_v46, %v3055_v17  ;;  %v3061_v36 = vadd.f32 %v3704_v35, %v3057_v22  ;;  %v3056_v45 = vmul.f32 %v3054_v27, %v2961_v31  ;;  %v3058_v30 = vmul.f32 %v3054_v27, %v2967_v39 }
 0x836   : > { %3063 = vst [vmem:[%s648_s9] sm:$0xff] %v3059_v21  ;;  %3065 = vst [vmem:[%s648_s9 + $0x10] sm:$0xff] %v3061_v36  ;;  %v3060_v13 = vadd.f32 %v3705_v57, %v3056_v45  ;;  %v3062_v12 = vadd.f32 %v3706_v4, %v3058_v30 }
 0x838   : > { %3064 = vst [vmem:[%s648_s9 + $0x8] sm:$0xff] %v3060_v13  ;;  %3066 = vst [vmem:[%s648_s9 + $0x18] sm:$0xff] %v3062_v12 }
 0x839   : > { %3854 = shalt.err (!%p3851_p5)
}
 0x83a   : > { %s3855_s15 = scalar_lea.hbm %s5385_s26, 512  ;;  %s3859_s9 = scalar_lea.hbm %s5612_s11, 1024 }
 0x83b   : > { %p3856_p7 = scmp.ne.s32.totalorder %s5385_s26, %s3855_s15  ;;  %p3860_p6 = scmp.lt.s32.totalorder %s5385_s26, %s5612_s11 }
 0x83c   : > { %p3861_p12 = scmp.lt.s32.totalorder %s3859_s9, %s3855_s15 }
 0x83d   : > { %p3857_p8 = pnand %p3856_p7, %p5609_p10 }
 0x83e   : > { %p3862_p0 = por %p3861_p12, %p3860_p6 }
 0x83f   : > { %p3858_p2 = pneg %p3857_p8 }
 0x841   : > { %p3863_p3 = pnand %p3862_p0, %p3858_p2 }
 0x843   : > { %3866 = shalt.err (!%p3863_p3)
}
 0x844   : > { %s5613_s23 = smov 256  }
 0x845   : > { %3362 = dma.vmem_to_hbm [thread:$0]  (%p5609_p10), %s5376_s19, 512, %s5385_s26, %s3073_s24, %s5613_s23, %s5613_s23, %s3934_s28  }
 0x846 PF: > { %s5614_s1 = sld [smem:[#allocation21_spill]]  ;;  %p5617_p9 = scmp.ge.s32.totalorder %s3921_s14, 2 }
 0x847   : > { %s5615_s8 = sld [smem:[#allocation23_spill]] }
 0x84c   : > { %s3117_s16 = sand.u32 1, %s5614_s1  }
 0x84d   : > { %p5616_p11 = scmp.ne.s32.totalorder %s5615_s8, 0  ;;  %s3118_s25 = scalar_lea.sflag [#allocation6], %s3117_s16 }
 0x84f   : > { %p3380_p13 = pnand %p5617_p9, %p5616_p11 }
 0x851   : > { %p3381_p1 = pneg %p3380_p13 }
 0x853   : > { %3900 = dma.done.wait (%p3381_p1), %s3118_s25, 512  }
 0x854   : > { %3902 = vsyncadd (%p3381_p1), %s3118_s25, 4294966784  ;;  %s3127_s15 = scalar_lea.sflag [#allocation14], %s3117_s16 }
 0x855   : > { %3904 = dma.done.wait (%p3381_p1), %s3127_s15, 512  }
 0x856   : > { %3906 = vsyncadd (%p3381_p1), %s3127_s15, 4294966784  ;;  %s5618_s14 = sld [smem:[#allocation24_spill]]  ;;  %s5621_s28 = smov %s3913_s29 }
 0x857   : > { %s5619_s20 = sld [smem:[#allocation22_spill]] }
 0x858   : > { %s5620_s0 = sld [smem:[#allocation26_spill]] }
 0x85c   : > { %p40_p10 = scmp.ge.s32.totalorder %s5618_s14, 4  }
 0x85d   : > { %s5622_s29 = smov %s5619_s20 }
 0x85e   :  { %42 = sbr.rel (!%p40_p10) target bundleno = 21 (0x15), region = 167 }
 0x863   :  { %3132 = vsyncpa [#allocation5], 1 }
 0x864   :  { %3134 = vsyncpa [#allocation5 + $0x1], 1 }
 0x865   :  { %3135 = vsyncpa [#allocation8], 1 }
 0x866   :  { %3137 = vsyncpa [#allocation8 + $0x1], 1 }
 0x867   :  { %3138 = vsyncpa [#allocation11], 1 }
 0x868   :  { %3139 = vsyncpa [#allocation6], 1 }
 0x869   :  { %3141 = vsyncpa [#allocation6 + $0x1], 1 }
 0x86a   :  { %3142 = vsyncpa [#allocation14], 1 }
 0x86b   :  { %3144 = vsyncpa [#allocation14 + $0x1], 1 }

</bundles_post_ra>
